<compile_context>
chip_gen: v7x
topology: tpu7x:2x2x1
jax: 0.10.0
libtpu: 0.0.40
codegen_flags: <defaults>
</compile_context>

<pallas_src>
import functools
import math

import jax
import jax.numpy as jnp
from jax.experimental import pallas as pl
from jax.experimental.pallas import tpu as pltpu


def _ln(z, g, b, eps=1e-5):
    mu = jnp.mean(z, axis=-1, keepdims=True)
    var = jnp.mean((z - mu) ** 2, axis=-1, keepdims=True)
    return (z - mu) * jax.lax.rsqrt(var + eps) * g + b


def decoder_layer_kernel(num_heads,
                         x_ref, y_ref,
                         wq_ref, bq_ref, wk_ref, bk_ref, wv_ref, bv_ref,
                         wo_ref, bo_ref,
                         w1_ref, b1_ref, w2_ref, b2_ref,
                         ln1g_ref, ln1b_ref, ln2g_ref, ln2b_ref,
                         ln3g_ref, ln3b_ref,
                         o_ref):
    Nb, Lq, D = x_ref.shape
    _, Lkv, _ = y_ref.shape
    H = num_heads
    cdt = wq_ref.dtype            # MXU operand dtype (bf16 in production)

    # --- load small vectors once into f32 locals (no re-broadcast per use) ---
    bq = bq_ref[0].astype(jnp.float32)
    bk = bk_ref[0].astype(jnp.float32)
    bv = bv_ref[0].astype(jnp.float32)
    bo = bo_ref[0].astype(jnp.float32)
    b1 = b1_ref[0].astype(jnp.float32)
    b2 = b2_ref[0].astype(jnp.float32)
    ln1g = ln1g_ref[0].astype(jnp.float32)
    ln1b = ln1b_ref[0].astype(jnp.float32)
    ln2g = ln2g_ref[0].astype(jnp.float32)
    ln2b = ln2b_ref[0].astype(jnp.float32)
    ln3g = ln3g_ref[0].astype(jnp.float32)
    ln3b = ln3b_ref[0].astype(jnp.float32)

    # --- flatten batch rows: (Nb, L, D) -> (Nb*L, D) so matmul M is big -------
    x = x_ref[...].astype(jnp.float32).reshape(Nb * Lq, D)
    y = y_ref[...].astype(jnp.float32).reshape(Nb * Lkv, D)

    # --- LayerNorms in fp32 (LayerNorm subclass semantics) --------------------
    x_norm = _ln(x, ln1g, ln1b)
    y_norm = _ln(y, ln3g, ln3b)
    xn = x_norm.astype(cdt)
    yn = y_norm.astype(cdt)

    # --- Q/K/V projections: single big-M matmuls, fp32 accumulation ----------
    q = jnp.dot(xn, wq_ref[...], preferred_element_type=jnp.float32) + bq
    k = jnp.dot(yn, wk_ref[...], preferred_element_type=jnp.float32) + bk
    v = jnp.dot(yn, wv_ref[...], preferred_element_type=jnp.float32) + bv

    Dq = q.shape[-1]
    Dv = v.shape[-1]
    Cqk = Dq // H
    Cv = Dv // H
    q = q * (1.0 / math.sqrt(Cqk))        # scale hoisted out of the head loop

    q3 = q.reshape(Nb, Lq, Dq).astype(cdt)
    k3 = k.reshape(Nb, Lkv, Dq).astype(cdt)
    v3 = v.reshape(Nb, Lkv, Dv).astype(cdt)

    # --- multi-head attention: batched-over-Nb einsums per head --------------
    mixes = []
    for h in range(H):                    # static unroll over heads
        qh = q3[:, :, h * Cqk:(h + 1) * Cqk]          # (Nb, Lq, Cqk)
        kh = k3[:, :, h * Cqk:(h + 1) * Cqk]          # (Nb, Lkv, Cqk)
        vh = v3[:, :, h * Cv:(h + 1) * Cv]            # (Nb, Lkv, Cv)
        s = jnp.einsum('bqc,bkc->bqk', qh, kh,
                       preferred_element_type=jnp.float32)   # (Nb, Lq, Lkv)
        s = s - jnp.max(s, axis=-1, keepdims=True)
        p = jnp.exp(s)
        p = p * pl.reciprocal(jnp.sum(p, axis=-1, keepdims=True), approx=True)
        mixes.append(jnp.einsum('bqk,bkc->bqc', p.astype(cdt), vh,
                                preferred_element_type=jnp.float32))

    # --- ONE concatenated out-projection matmul (K = Dv) ----------------------
    mix = jnp.concatenate(mixes, axis=-1).reshape(Nb * Lq, Dv)
    attn = jnp.dot(mix.astype(cdt), wo_ref[...],
                   preferred_element_type=jnp.float32) + bo

    # --- first residual --------------------------------------------------------
    x1 = x + attn

    # --- MLP branch with QuickGELU (dropout p=0 is identity) -------------------
    xn2 = _ln(x1, ln2g, ln2b).astype(cdt)
    h1 = jnp.dot(xn2, w1_ref[...], preferred_element_type=jnp.float32) + b1
    act = (h1 * jax.nn.sigmoid(1.702 * h1)).astype(cdt)
    mlp = jnp.dot(act, w2_ref[...], preferred_element_type=jnp.float32) + b2

    o_ref[...] = (x1 + mlp).reshape(Nb, Lq, D).astype(o_ref.dtype)


def transformer_decoder_layer(x, y, params, num_heads, block_rows=128):
    N, Lq, D = x.shape
    _, Lkv, _ = y.shape

    # Pick Nb (batch elements per grid step) so Nb*Lq ~ block_rows query rows
    # are processed per step (fills the MXU M dimension, amortizes step cost).
    Nb = 1
    for d in range(1, N + 1):
        if N % d == 0 and d * Lq <= block_rows:
            Nb = d

    weight_names = ("wq", "bq", "wk", "bk", "wv", "bv", "wo", "bo",
                    "w1", "b1", "w2", "b2",
                    "ln1_g", "ln1_b", "ln2_g", "ln2_b", "ln3_g", "ln3_b")
    weights = [params[n] for n in weight_names]

    in_specs = [
        pl.BlockSpec((Nb, Lq, D), lambda n: (n, 0, 0)),
        pl.BlockSpec((Nb, Lkv, D), lambda n: (n, 0, 0)),
    ]
    for w in weights:
        in_specs.append(pl.BlockSpec(w.shape, lambda n, nd=w.ndim: (0,) * nd))

    return pl.pallas_call(
        functools.partial(decoder_layer_kernel, num_heads),
        out_shape=jax.ShapeDtypeStruct((N, Lq, D), x.dtype),
        grid=(N // Nb,),
        in_specs=in_specs,
        out_specs=pl.BlockSpec((Nb, Lq, D), lambda n: (n, 0, 0)),
        compiler_params=pltpu.CompilerParams(
            dimension_semantics=("parallel",)),
    )(x, y, *weights)


# ---------------- deterministic parameter init (synthetic, no checkpoint) ----
def xavier_uniform(key, fan_in, fan_out):
    bound = math.sqrt(6.0 / (fan_in + fan_out))
    return jax.random.uniform(key, (fan_in, fan_out), jnp.float32, -bound, bound)


def init_params(key, in_dim, qkv_dim, mlp_dim):
    ks = jax.random.split(key, 8)
    return {
        "wq": xavier_uniform(ks[0], in_dim, qkv_dim),
        "bq": jnp.zeros((1, qkv_dim), jnp.float32),
        "wk": xavier_uniform(ks[1], in_dim, qkv_dim),
        "bk": jnp.zeros((1, qkv_dim), jnp.float32),
        "wv": xavier_uniform(ks[2], in_dim, qkv_dim),
        "bv": jnp.zeros((1, qkv_dim), jnp.float32),
        "wo": xavier_uniform(ks[3], qkv_dim, in_dim),
        "bo": jnp.zeros((1, in_dim), jnp.float32),
        "w1": xavier_uniform(ks[4], in_dim, mlp_dim),
        "b1": 1e-6 * jax.random.normal(ks[5], (1, mlp_dim), jnp.float32),
        "w2": xavier_uniform(ks[6], mlp_dim, in_dim),
        "b2": 1e-6 * jax.random.normal(ks[7], (1, in_dim), jnp.float32),
        "ln1_g": jnp.ones((1, in_dim), jnp.float32),
        "ln1_b": jnp.zeros((1, in_dim), jnp.float32),
        "ln2_g": jnp.ones((1, in_dim), jnp.float32),
        "ln2_b": jnp.zeros((1, in_dim), jnp.float32),
        "ln3_g": jnp.ones((1, in_dim), jnp.float32),
        "ln3_b": jnp.zeros((1, in_dim), jnp.float32),
    }


# ---------------- pure-JAX reference for correctness check --------------------
def ref_forward(x, y, p, H):
    def ln(z, g, b):
        mu = z.mean(-1, keepdims=True)
        var = ((z - mu) ** 2).mean(-1, keepdims=True)
        return (z - mu) / jnp.sqrt(var + 1e-5) * g[0] + b[0]

    yn = ln(y, p["ln3_g"], p["ln3_b"])
    xn = ln(x, p["ln1_g"], p["ln1_b"])
    q = xn @ p["wq"] + p["bq"][0]
    k = yn @ p["wk"] + p["bk"][0]
    v = yn @ p["wv"] + p["bv"][0]
    N, Lq, Dq = q.shape
    Lkv = k.shape[1]
    Cqk = Dq // H
    Cv = v.shape[-1] // H
    qh = q.reshape(N, Lq, H, Cqk)
    kh = k.reshape(N, Lkv, H, Cqk)
    vh = v.reshape(N, Lkv, H, Cv)
    aff = jnp.einsum("nqhc,nkhc->nqkh", qh / math.sqrt(Cqk), kh)
    aff = jax.nn.softmax(aff, axis=-2)
    mix = jnp.einsum("nqlh,nlhc->nqhc", aff, vh)
    attn = mix.reshape(N, Lq, -1) @ p["wo"] + p["bo"][0]
    x1 = x + attn
    xn2 = ln(x1, p["ln2_g"], p["ln2_b"])
    h1 = xn2 @ p["w1"] + p["b1"][0]
    a = h1 * jax.nn.sigmoid(1.702 * h1)
    return x1 + a @ p["w2"] + p["b2"][0]


if __name__ == "__main__":
    # Small shapes consistent with the module: x (N, Lq, D), y (N, Lkv, D).
    # D = 128 keeps the output tile lane-dense.
    N, Lq, Lkv = 8, 8, 16
    in_feature_dim = 128
    qkv_dim = 128
    num_heads = 4
    mlp_dim = round(4.0 * in_feature_dim)  # 512

    key = jax.random.PRNGKey(0)
    kx, ky, kp = jax.random.split(key, 3)
    x = jax.random.normal(kx, (N, Lq, in_feature_dim), jnp.float32)
    y = jax.random.normal(ky, (N, Lkv, in_feature_dim), jnp.float32)
    params = init_params(kp, in_feature_dim, qkv_dim, mlp_dim)

    # --- fp32 run (grid of 2 steps, Nb=4): tight check; only the approximate
    #     EUP softmax reciprocal deviates from the pure-JAX reference. --------
    out = transformer_decoder_layer(x, y, params, num_heads, block_rows=32)
    out = jax.block_until_ready(out)
    ref = ref_forward(x, y, params, num_heads)
    assert out.shape == (N, Lq, in_feature_dim)
    err = jnp.max(jnp.abs(out - ref))
    assert jnp.allclose(out, ref, atol=1e-2, rtol=1e-2), f"f32 max err {err}"

    # --- bf16 run: the production MXU path (bf16 operands, fp32 accumulation);
    #     looser tolerance accounts for bf16 operand rounding. -----------------
    x_bf = x.astype(jnp.bfloat16)
    y_bf = y.astype(jnp.bfloat16)
    params_bf = {k_: v_.astype(jnp.bfloat16) for k_, v_ in params.items()}
    out_bf = transformer_decoder_layer(x_bf, y_bf, params_bf, num_heads,
                                       block_rows=32)
    out_bf = jax.block_until_ready(out_bf)
    ref_bf = ref_forward(
        x_bf.astype(jnp.float32), y_bf.astype(jnp.float32),
        {k_: v_.astype(jnp.float32) for k_, v_ in params_bf.items()},
        num_heads)
    err_bf = jnp.max(jnp.abs(out_bf.astype(jnp.float32) - ref_bf))
    assert jnp.allclose(out_bf.astype(jnp.float32), ref_bf,
                        atol=1e-1, rtol=1e-1), f"bf16 max err {err_bf}"

    print("KERNEL_OK")
</pallas_src>

<mosaic_0001>
module attributes {stable_mosaic.version = 11 : i64} {
  func.func @decoder_layer_kernel(%arg0: i32, %arg1: memref<4x8x128xf32, #tpu.memory_space<vmem>>, %arg2: memref<4x16x128xf32, #tpu.memory_space<vmem>>, %arg3: memref<128x128xf32, #tpu.memory_space<vmem>>, %arg4: memref<1x128xf32, #tpu.memory_space<vmem>>, %arg5: memref<128x128xf32, #tpu.memory_space<vmem>>, %arg6: memref<1x128xf32, #tpu.memory_space<vmem>>, %arg7: memref<128x128xf32, #tpu.memory_space<vmem>>, %arg8: memref<1x128xf32, #tpu.memory_space<vmem>>, %arg9: memref<128x128xf32, #tpu.memory_space<vmem>>, %arg10: memref<1x128xf32, #tpu.memory_space<vmem>>, %arg11: memref<128x512xf32, #tpu.memory_space<vmem>>, %arg12: memref<1x512xf32, #tpu.memory_space<vmem>>, %arg13: memref<512x128xf32, #tpu.memory_space<vmem>>, %arg14: memref<1x128xf32, #tpu.memory_space<vmem>>, %arg15: memref<1x128xf32, #tpu.memory_space<vmem>>, %arg16: memref<1x128xf32, #tpu.memory_space<vmem>>, %arg17: memref<1x128xf32, #tpu.memory_space<vmem>>, %arg18: memref<1x128xf32, #tpu.memory_space<vmem>>, %arg19: memref<1x128xf32, #tpu.memory_space<vmem>>, %arg20: memref<1x128xf32, #tpu.memory_space<vmem>>, %arg21: memref<4x8x128xf32, #tpu.memory_space<vmem>>) attributes {dimension_semantics = [#tpu.dimension_semantics<parallel>], iteration_bounds = array<i64: 2>, scalar_prefetch = 0 : i64, scratch_operands = 0 : i64, tpu.core_type = #tpu.core_type<tc>, window_params = [{transform_indices = @transform_0, window_bounds = array<i64: 4, 8, 128>}, {transform_indices = @transform_1, window_bounds = array<i64: 4, 16, 128>}, {pipeline_mode = #tpu.pipeline_mode<synchronous>, transform_indices = @transform_2, window_bounds = array<i64: 128, 128>}, {pipeline_mode = #tpu.pipeline_mode<synchronous>, transform_indices = @transform_3, window_bounds = array<i64: 1, 128>}, {pipeline_mode = #tpu.pipeline_mode<synchronous>, transform_indices = @transform_4, window_bounds = array<i64: 128, 128>}, {pipeline_mode = #tpu.pipeline_mode<synchronous>, transform_indices = @transform_5, window_bounds = array<i64: 1, 128>}, {pipeline_mode = #tpu.pipeline_mode<synchronous>, transform_indices = @transform_6, window_bounds = array<i64: 128, 128>}, {pipeline_mode = #tpu.pipeline_mode<synchronous>, transform_indices = @transform_7, window_bounds = array<i64: 1, 128>}, {pipeline_mode = #tpu.pipeline_mode<synchronous>, transform_indices = @transform_8, window_bounds = array<i64: 128, 128>}, {pipeline_mode = #tpu.pipeline_mode<synchronous>, transform_indices = @transform_9, window_bounds = array<i64: 1, 128>}, {pipeline_mode = #tpu.pipeline_mode<synchronous>, transform_indices = @transform_10, window_bounds = array<i64: 128, 512>}, {pipeline_mode = #tpu.pipeline_mode<synchronous>, transform_indices = @transform_11, window_bounds = array<i64: 1, 512>}, {pipeline_mode = #tpu.pipeline_mode<synchronous>, transform_indices = @transform_12, window_bounds = array<i64: 512, 128>}, {pipeline_mode = #tpu.pipeline_mode<synchronous>, transform_indices = @transform_13, window_bounds = array<i64: 1, 128>}, {pipeline_mode = #tpu.pipeline_mode<synchronous>, transform_indices = @transform_14, window_bounds = array<i64: 1, 128>}, {pipeline_mode = #tpu.pipeline_mode<synchronous>, transform_indices = @transform_15, window_bounds = array<i64: 1, 128>}, {pipeline_mode = #tpu.pipeline_mode<synchronous>, transform_indices = @transform_16, window_bounds = array<i64: 1, 128>}, {pipeline_mode = #tpu.pipeline_mode<synchronous>, transform_indices = @transform_17, window_bounds = array<i64: 1, 128>}, {pipeline_mode = #tpu.pipeline_mode<synchronous>, transform_indices = @transform_18, window_bounds = array<i64: 1, 128>}, {pipeline_mode = #tpu.pipeline_mode<synchronous>, transform_indices = @transform_19, window_bounds = array<i64: 1, 128>}, {transform_indices = @transform_20, window_bounds = array<i64: 4, 8, 128>}]} {
    %c0 = arith.constant 0 : index
    %c0_0 = arith.constant 0 : index
    %0 = vector.load %arg4[%c0, %c0_0] : memref<1x128xf32, #tpu.memory_space<vmem>>, vector<1x128xf32>
    %1 = vector.shape_cast %0 : vector<1x128xf32> to vector<128xf32>
    %c0_1 = arith.constant 0 : index
    %c0_2 = arith.constant 0 : index
    %2 = vector.load %arg6[%c0_1, %c0_2] : memref<1x128xf32, #tpu.memory_space<vmem>>, vector<1x128xf32>
    %3 = vector.shape_cast %2 : vector<1x128xf32> to vector<128xf32>
    %c0_3 = arith.constant 0 : index
    %c0_4 = arith.constant 0 : index
    %4 = vector.load %arg8[%c0_3, %c0_4] : memref<1x128xf32, #tpu.memory_space<vmem>>, vector<1x128xf32>
    %5 = vector.shape_cast %4 : vector<1x128xf32> to vector<128xf32>
    %c0_5 = arith.constant 0 : index
    %c0_6 = arith.constant 0 : index
    %6 = vector.load %arg10[%c0_5, %c0_6] : memref<1x128xf32, #tpu.memory_space<vmem>>, vector<1x128xf32>
    %7 = vector.shape_cast %6 : vector<1x128xf32> to vector<128xf32>
    %c0_7 = arith.constant 0 : index
    %c0_8 = arith.constant 0 : index
    %8 = vector.load %arg12[%c0_7, %c0_8] : memref<1x512xf32, #tpu.memory_space<vmem>>, vector<1x512xf32>
    %9 = vector.shape_cast %8 : vector<1x512xf32> to vector<512xf32>
    %c0_9 = arith.constant 0 : index
    %c0_10 = arith.constant 0 : index
    %10 = vector.load %arg14[%c0_9, %c0_10] : memref<1x128xf32, #tpu.memory_space<vmem>>, vector<1x128xf32>
    %11 = vector.shape_cast %10 : vector<1x128xf32> to vector<128xf32>
    %c0_11 = arith.constant 0 : index
    %c0_12 = arith.constant 0 : index
    %12 = vector.load %arg15[%c0_11, %c0_12] : memref<1x128xf32, #tpu.memory_space<vmem>>, vector<1x128xf32>
    %13 = vector.shape_cast %12 : vector<1x128xf32> to vector<128xf32>
    %c0_13 = arith.constant 0 : index
    %c0_14 = arith.constant 0 : index
    %14 = vector.load %arg16[%c0_13, %c0_14] : memref<1x128xf32, #tpu.memory_space<vmem>>, vector<1x128xf32>
    %15 = vector.shape_cast %14 : vector<1x128xf32> to vector<128xf32>
    %c0_15 = arith.constant 0 : index
    %c0_16 = arith.constant 0 : index
    %16 = vector.load %arg17[%c0_15, %c0_16] : memref<1x128xf32, #tpu.memory_space<vmem>>, vector<1x128xf32>
    %17 = vector.shape_cast %16 : vector<1x128xf32> to vector<128xf32>
    %c0_17 = arith.constant 0 : index
    %c0_18 = arith.constant 0 : index
    %18 = vector.load %arg18[%c0_17, %c0_18] : memref<1x128xf32, #tpu.memory_space<vmem>>, vector<1x128xf32>
    %19 = vector.shape_cast %18 : vector<1x128xf32> to vector<128xf32>
    %c0_19 = arith.constant 0 : index
    %c0_20 = arith.constant 0 : index
    %20 = vector.load %arg19[%c0_19, %c0_20] : memref<1x128xf32, #tpu.memory_space<vmem>>, vector<1x128xf32>
    %21 = vector.shape_cast %20 : vector<1x128xf32> to vector<128xf32>
    %c0_21 = arith.constant 0 : index
    %c0_22 = arith.constant 0 : index
    %22 = vector.load %arg20[%c0_21, %c0_22] : memref<1x128xf32, #tpu.memory_space<vmem>>, vector<1x128xf32>
    %23 = vector.shape_cast %22 : vector<1x128xf32> to vector<128xf32>
    %c0_23 = arith.constant 0 : index
    %c0_24 = arith.constant 0 : index
    %c0_25 = arith.constant 0 : index
    %24 = vector.load %arg1[%c0_23, %c0_24, %c0_25] : memref<4x8x128xf32, #tpu.memory_space<vmem>>, vector<4x8x128xf32>
    %25 = vector.shape_cast %24 : vector<4x8x128xf32> to vector<32x128xf32>
    %c0_26 = arith.constant 0 : index
    %c0_27 = arith.constant 0 : index
    %c0_28 = arith.constant 0 : index
    %26 = vector.load %arg2[%c0_26, %c0_27, %c0_28] : memref<4x16x128xf32, #tpu.memory_space<vmem>>, vector<4x16x128xf32>
    %27 = vector.shape_cast %26 : vector<4x16x128xf32> to vector<64x128xf32>
    %cst = arith.constant dense<0.000000e+00> : vector<32xf32>
    %28 = vector.multi_reduction <add>, %25, %cst [1] : vector<32x128xf32> to vector<32xf32>
    %29 = vector.shape_cast %28 : vector<32xf32> to vector<32x1xf32>
    %cst_29 = arith.constant 1.280000e+02 : f32
    %30 = vector.broadcast %cst_29 : f32 to vector<32x1xf32>
    %31 = arith.divf %29, %30 : vector<32x1xf32>
    %32 = vector.broadcast %31 : vector<32x1xf32> to vector<32x128xf32>
    %33 = arith.subf %25, %32 : vector<32x128xf32>
    %34 = arith.mulf %33, %33 : vector<32x128xf32>
    %cst_30 = arith.constant dense<0.000000e+00> : vector<32xf32>
    %35 = vector.multi_reduction <add>, %34, %cst_30 [1] : vector<32x128xf32> to vector<32xf32>
    %36 = vector.shape_cast %35 : vector<32xf32> to vector<32x1xf32>
    %cst_31 = arith.constant 1.280000e+02 : f32
    %37 = vector.broadcast %cst_31 : f32 to vector<32x1xf32>
    %38 = arith.divf %36, %37 : vector<32x1xf32>
    %39 = vector.broadcast %31 : vector<32x1xf32> to vector<32x128xf32>
    %40 = arith.subf %25, %39 : vector<32x128xf32>
    %cst_32 = arith.constant 9.99999974E-6 : f32
    %41 = vector.broadcast %cst_32 : f32 to vector<32x1xf32>
    %42 = arith.addf %38, %41 : vector<32x1xf32>
    %43 = math.rsqrt %42 : vector<32x1xf32>
    %44 = vector.broadcast %43 : vector<32x1xf32> to vector<32x128xf32>
    %45 = arith.mulf %40, %44 : vector<32x128xf32>
    %46 = vector.shape_cast %13 : vector<128xf32> to vector<1x128xf32>
    %47 = vector.broadcast %46 : vector<1x128xf32> to vector<32x128xf32>
    %48 = arith.mulf %45, %47 : vector<32x128xf32>
    %49 = vector.shape_cast %15 : vector<128xf32> to vector<1x128xf32>
    %50 = vector.broadcast %49 : vector<1x128xf32> to vector<32x128xf32>
    %51 = arith.addf %48, %50 : vector<32x128xf32>
    %cst_33 = arith.constant dense<0.000000e+00> : vector<64xf32>
    %52 = vector.multi_reduction <add>, %27, %cst_33 [1] : vector<64x128xf32> to vector<64xf32>
    %53 = vector.shape_cast %52 : vector<64xf32> to vector<64x1xf32>
    %cst_34 = arith.constant 1.280000e+02 : f32
    %54 = vector.broadcast %cst_34 : f32 to vector<64x1xf32>
    %55 = arith.divf %53, %54 : vector<64x1xf32>
    %56 = vector.broadcast %55 : vector<64x1xf32> to vector<64x128xf32>
    %57 = arith.subf %27, %56 : vector<64x128xf32>
    %58 = arith.mulf %57, %57 : vector<64x128xf32>
    %cst_35 = arith.constant dense<0.000000e+00> : vector<64xf32>
    %59 = vector.multi_reduction <add>, %58, %cst_35 [1] : vector<64x128xf32> to vector<64xf32>
    %60 = vector.shape_cast %59 : vector<64xf32> to vector<64x1xf32>
    %cst_36 = arith.constant 1.280000e+02 : f32
    %61 = vector.broadcast %cst_36 : f32 to vector<64x1xf32>
    %62 = arith.divf %60, %61 : vector<64x1xf32>
    %63 = vector.broadcast %55 : vector<64x1xf32> to vector<64x128xf32>
    %64 = arith.subf %27, %63 : vector<64x128xf32>
    %cst_37 = arith.constant 9.99999974E-6 : f32
    %65 = vector.broadcast %cst_37 : f32 to vector<64x1xf32>
    %66 = arith.addf %62, %65 : vector<64x1xf32>
    %67 = math.rsqrt %66 : vector<64x1xf32>
    %68 = vector.broadcast %67 : vector<64x1xf32> to vector<64x128xf32>
    %69 = arith.mulf %64, %68 : vector<64x128xf32>
    %70 = vector.shape_cast %21 : vector<128xf32> to vector<1x128xf32>
    %71 = vector.broadcast %70 : vector<1x128xf32> to vector<64x128xf32>
    %72 = arith.mulf %69, %71 : vector<64x128xf32>
    %73 = vector.shape_cast %23 : vector<128xf32> to vector<1x128xf32>
    %74 = vector.broadcast %73 : vector<1x128xf32> to vector<64x128xf32>
    %75 = arith.addf %72, %74 : vector<64x128xf32>
    %c0_38 = arith.constant 0 : index
    %c0_39 = arith.constant 0 : index
    %76 = vector.load %arg3[%c0_38, %c0_39] : memref<128x128xf32, #tpu.memory_space<vmem>>, vector<128x128xf32>
    %cst_40 = arith.constant dense<0.000000e+00> : vector<32x128xf32>
    %77 = tpu.matmul %51, %76, %cst_40 {dimension_numbers = #tpu.dot_dimension_numbers<[1], [0], [0], [1], [0, 0, 1, 1], [], []>} : vector<32x128xf32>, vector<128x128xf32>, vector<32x128xf32> -> vector<32x128xf32>
    %78 = vector.shape_cast %1 : vector<128xf32> to vector<1x128xf32>
    %79 = vector.broadcast %78 : vector<1x128xf32> to vector<32x128xf32>
    %80 = arith.addf %77, %79 : vector<32x128xf32>
    %c0_41 = arith.constant 0 : index
    %c0_42 = arith.constant 0 : index
    %81 = vector.load %arg5[%c0_41, %c0_42] : memref<128x128xf32, #tpu.memory_space<vmem>>, vector<128x128xf32>
    %cst_43 = arith.constant dense<0.000000e+00> : vector<64x128xf32>
    %82 = tpu.matmul %75, %81, %cst_43 {dimension_numbers = #tpu.dot_dimension_numbers<[1], [0], [0], [1], [0, 0, 1, 1], [], []>} : vector<64x128xf32>, vector<128x128xf32>, vector<64x128xf32> -> vector<64x128xf32>
    %83 = vector.shape_cast %3 : vector<128xf32> to vector<1x128xf32>
    %84 = vector.broadcast %83 : vector<1x128xf32> to vector<64x128xf32>
    %85 = arith.addf %82, %84 : vector<64x128xf32>
    %c0_44 = arith.constant 0 : index
    %c0_45 = arith.constant 0 : index
    %86 = vector.load %arg7[%c0_44, %c0_45] : memref<128x128xf32, #tpu.memory_space<vmem>>, vector<128x128xf32>
    %cst_46 = arith.constant dense<0.000000e+00> : vector<64x128xf32>
    %87 = tpu.matmul %75, %86, %cst_46 {dimension_numbers = #tpu.dot_dimension_numbers<[1], [0], [0], [1], [0, 0, 1, 1], [], []>} : vector<64x128xf32>, vector<128x128xf32>, vector<64x128xf32> -> vector<64x128xf32>
    %88 = vector.shape_cast %5 : vector<128xf32> to vector<1x128xf32>
    %89 = vector.broadcast %88 : vector<1x128xf32> to vector<64x128xf32>
    %90 = arith.addf %87, %89 : vector<64x128xf32>
    %cst_47 = arith.constant 0.176776692 : f32
    %91 = vector.broadcast %cst_47 : f32 to vector<32x128xf32>
    %92 = arith.mulf %80, %91 : vector<32x128xf32>
    %93 = vector.shape_cast %92 : vector<32x128xf32> to vector<4x8x128xf32>
    %94 = vector.shape_cast %85 : vector<64x128xf32> to vector<4x16x128xf32>
    %95 = vector.shape_cast %90 : vector<64x128xf32> to vector<4x16x128xf32>
    %96 = vector.extract_strided_slice %93 {offsets = [0, 0, 0], sizes = [4, 8, 32], strides = [1, 1, 1]} : vector<4x8x128xf32> to vector<4x8x32xf32>
    %97 = vector.extract_strided_slice %94 {offsets = [0, 0, 0], sizes = [4, 16, 32], strides = [1, 1, 1]} : vector<4x16x128xf32> to vector<4x16x32xf32>
    %98 = vector.extract_strided_slice %95 {offsets = [0, 0, 0], sizes = [4, 16, 32], strides = [1, 1, 1]} : vector<4x16x128xf32> to vector<4x16x32xf32>
    "tpu.trace_start"() <{level = 10 : i32, message = "bqc,bkc->bqk"}> : () -> ()
    %cst_48 = arith.constant dense<0.000000e+00> : vector<4x8x16xf32>
    %99 = tpu.matmul %96, %97, %cst_48 {dimension_numbers = #tpu.dot_dimension_numbers<[2], [2], [1], [1], [0, 0, 0, 1, 1, 1], [0], [0]>} : vector<4x8x32xf32>, vector<4x16x32xf32>, vector<4x8x16xf32> -> vector<4x8x16xf32>
    "tpu.trace_stop"() : () -> ()
    %cst_49 = arith.constant dense<0xFF800000> : vector<4x8xf32>
    %100 = vector.multi_reduction <maximumf>, %99, %cst_49 [2] : vector<4x8x16xf32> to vector<4x8xf32>
    %101 = vector.shape_cast %100 : vector<4x8xf32> to vector<4x8x1xf32>
    %102 = vector.broadcast %101 : vector<4x8x1xf32> to vector<4x8x16xf32>
    %103 = arith.subf %99, %102 : vector<4x8x16xf32>
    %104 = math.exp %103 : vector<4x8x16xf32>
    %cst_50 = arith.constant dense<0.000000e+00> : vector<4x8xf32>
    %105 = vector.multi_reduction <add>, %104, %cst_50 [2] : vector<4x8x16xf32> to vector<4x8xf32>
    %106 = vector.shape_cast %105 : vector<4x8xf32> to vector<4x8x1xf32>
    %107 = tpu.reciprocal %106 {approx = true} : vector<4x8x1xf32> -> vector<4x8x1xf32>
    %108 = vector.broadcast %107 : vector<4x8x1xf32> to vector<4x8x16xf32>
    %109 = arith.mulf %104, %108 : vector<4x8x16xf32>
    "tpu.trace_start"() <{level = 10 : i32, message = "bqk,bkc->bqc"}> : () -> ()
    %cst_51 = arith.constant dense<0.000000e+00> : vector<4x8x32xf32>
    %110 = tpu.matmul %109, %98, %cst_51 {dimension_numbers = #tpu.dot_dimension_numbers<[2], [1], [1], [2], [0, 0, 0, 1, 1, 2], [0], [0]>} : vector<4x8x16xf32>, vector<4x16x32xf32>, vector<4x8x32xf32> -> vector<4x8x32xf32>
    "tpu.trace_stop"() : () -> ()
    %111 = vector.extract_strided_slice %93 {offsets = [0, 0, 32], sizes = [4, 8, 32], strides = [1, 1, 1]} : vector<4x8x128xf32> to vector<4x8x32xf32>
    %112 = vector.extract_strided_slice %94 {offsets = [0, 0, 32], sizes = [4, 16, 32], strides = [1, 1, 1]} : vector<4x16x128xf32> to vector<4x16x32xf32>
    %113 = vector.extract_strided_slice %95 {offsets = [0, 0, 32], sizes = [4, 16, 32], strides = [1, 1, 1]} : vector<4x16x128xf32> to vector<4x16x32xf32>
    "tpu.trace_start"() <{level = 10 : i32, message = "bqc,bkc->bqk"}> : () -> ()
    %cst_52 = arith.constant dense<0.000000e+00> : vector<4x8x16xf32>
    %114 = tpu.matmul %111, %112, %cst_52 {dimension_numbers = #tpu.dot_dimension_numbers<[2], [2], [1], [1], [0, 0, 0, 1, 1, 1], [0], [0]>} : vector<4x8x32xf32>, vector<4x16x32xf32>, vector<4x8x16xf32> -> vector<4x8x16xf32>
    "tpu.trace_stop"() : () -> ()
    %cst_53 = arith.constant dense<0xFF800000> : vector<4x8xf32>
    %115 = vector.multi_reduction <maximumf>, %114, %cst_53 [2] : vector<4x8x16xf32> to vector<4x8xf32>
    %116 = vector.shape_cast %115 : vector<4x8xf32> to vector<4x8x1xf32>
    %117 = vector.broadcast %116 : vector<4x8x1xf32> to vector<4x8x16xf32>
    %118 = arith.subf %114, %117 : vector<4x8x16xf32>
    %119 = math.exp %118 : vector<4x8x16xf32>
    %cst_54 = arith.constant dense<0.000000e+00> : vector<4x8xf32>
    %120 = vector.multi_reduction <add>, %119, %cst_54 [2] : vector<4x8x16xf32> to vector<4x8xf32>
    %121 = vector.shape_cast %120 : vector<4x8xf32> to vector<4x8x1xf32>
    %122 = tpu.reciprocal %121 {approx = true} : vector<4x8x1xf32> -> vector<4x8x1xf32>
    %123 = vector.broadcast %122 : vector<4x8x1xf32> to vector<4x8x16xf32>
    %124 = arith.mulf %119, %123 : vector<4x8x16xf32>
    "tpu.trace_start"() <{level = 10 : i32, message = "bqk,bkc->bqc"}> : () -> ()
    %cst_55 = arith.constant dense<0.000000e+00> : vector<4x8x32xf32>
    %125 = tpu.matmul %124, %113, %cst_55 {dimension_numbers = #tpu.dot_dimension_numbers<[2], [1], [1], [2], [0, 0, 0, 1, 1, 2], [0], [0]>} : vector<4x8x16xf32>, vector<4x16x32xf32>, vector<4x8x32xf32> -> vector<4x8x32xf32>
    "tpu.trace_stop"() : () -> ()
    %126 = vector.extract_strided_slice %93 {offsets = [0, 0, 64], sizes = [4, 8, 32], strides = [1, 1, 1]} : vector<4x8x128xf32> to vector<4x8x32xf32>
    %127 = vector.extract_strided_slice %94 {offsets = [0, 0, 64], sizes = [4, 16, 32], strides = [1, 1, 1]} : vector<4x16x128xf32> to vector<4x16x32xf32>
    %128 = vector.extract_strided_slice %95 {offsets = [0, 0, 64], sizes = [4, 16, 32], strides = [1, 1, 1]} : vector<4x16x128xf32> to vector<4x16x32xf32>
    "tpu.trace_start"() <{level = 10 : i32, message = "bqc,bkc->bqk"}> : () -> ()
    %cst_56 = arith.constant dense<0.000000e+00> : vector<4x8x16xf32>
    %129 = tpu.matmul %126, %127, %cst_56 {dimension_numbers = #tpu.dot_dimension_numbers<[2], [2], [1], [1], [0, 0, 0, 1, 1, 1], [0], [0]>} : vector<4x8x32xf32>, vector<4x16x32xf32>, vector<4x8x16xf32> -> vector<4x8x16xf32>
    "tpu.trace_stop"() : () -> ()
    %cst_57 = arith.constant dense<0xFF800000> : vector<4x8xf32>
    %130 = vector.multi_reduction <maximumf>, %129, %cst_57 [2] : vector<4x8x16xf32> to vector<4x8xf32>
    %131 = vector.shape_cast %130 : vector<4x8xf32> to vector<4x8x1xf32>
    %132 = vector.broadcast %131 : vector<4x8x1xf32> to vector<4x8x16xf32>
    %133 = arith.subf %129, %132 : vector<4x8x16xf32>
    %134 = math.exp %133 : vector<4x8x16xf32>
    %cst_58 = arith.constant dense<0.000000e+00> : vector<4x8xf32>
    %135 = vector.multi_reduction <add>, %134, %cst_58 [2] : vector<4x8x16xf32> to vector<4x8xf32>
    %136 = vector.shape_cast %135 : vector<4x8xf32> to vector<4x8x1xf32>
    %137 = tpu.reciprocal %136 {approx = true} : vector<4x8x1xf32> -> vector<4x8x1xf32>
    %138 = vector.broadcast %137 : vector<4x8x1xf32> to vector<4x8x16xf32>
    %139 = arith.mulf %134, %138 : vector<4x8x16xf32>
    "tpu.trace_start"() <{level = 10 : i32, message = "bqk,bkc->bqc"}> : () -> ()
    %cst_59 = arith.constant dense<0.000000e+00> : vector<4x8x32xf32>
    %140 = tpu.matmul %139, %128, %cst_59 {dimension_numbers = #tpu.dot_dimension_numbers<[2], [1], [1], [2], [0, 0, 0, 1, 1, 2], [0], [0]>} : vector<4x8x16xf32>, vector<4x16x32xf32>, vector<4x8x32xf32> -> vector<4x8x32xf32>
    "tpu.trace_stop"() : () -> ()
    %141 = vector.extract_strided_slice %93 {offsets = [0, 0, 96], sizes = [4, 8, 32], strides = [1, 1, 1]} : vector<4x8x128xf32> to vector<4x8x32xf32>
    %142 = vector.extract_strided_slice %94 {offsets = [0, 0, 96], sizes = [4, 16, 32], strides = [1, 1, 1]} : vector<4x16x128xf32> to vector<4x16x32xf32>
    %143 = vector.extract_strided_slice %95 {offsets = [0, 0, 96], sizes = [4, 16, 32], strides = [1, 1, 1]} : vector<4x16x128xf32> to vector<4x16x32xf32>
    "tpu.trace_start"() <{level = 10 : i32, message = "bqc,bkc->bqk"}> : () -> ()
    %cst_60 = arith.constant dense<0.000000e+00> : vector<4x8x16xf32>
    %144 = tpu.matmul %141, %142, %cst_60 {dimension_numbers = #tpu.dot_dimension_numbers<[2], [2], [1], [1], [0, 0, 0, 1, 1, 1], [0], [0]>} : vector<4x8x32xf32>, vector<4x16x32xf32>, vector<4x8x16xf32> -> vector<4x8x16xf32>
    "tpu.trace_stop"() : () -> ()
    %cst_61 = arith.constant dense<0xFF800000> : vector<4x8xf32>
    %145 = vector.multi_reduction <maximumf>, %144, %cst_61 [2] : vector<4x8x16xf32> to vector<4x8xf32>
    %146 = vector.shape_cast %145 : vector<4x8xf32> to vector<4x8x1xf32>
    %147 = vector.broadcast %146 : vector<4x8x1xf32> to vector<4x8x16xf32>
    %148 = arith.subf %144, %147 : vector<4x8x16xf32>
    %149 = math.exp %148 : vector<4x8x16xf32>
    %cst_62 = arith.constant dense<0.000000e+00> : vector<4x8xf32>
    %150 = vector.multi_reduction <add>, %149, %cst_62 [2] : vector<4x8x16xf32> to vector<4x8xf32>
    %151 = vector.shape_cast %150 : vector<4x8xf32> to vector<4x8x1xf32>
    %152 = tpu.reciprocal %151 {approx = true} : vector<4x8x1xf32> -> vector<4x8x1xf32>
    %153 = vector.broadcast %152 : vector<4x8x1xf32> to vector<4x8x16xf32>
    %154 = arith.mulf %149, %153 : vector<4x8x16xf32>
    "tpu.trace_start"() <{level = 10 : i32, message = "bqk,bkc->bqc"}> : () -> ()
    %cst_63 = arith.constant dense<0.000000e+00> : vector<4x8x32xf32>
    %155 = tpu.matmul %154, %143, %cst_63 {dimension_numbers = #tpu.dot_dimension_numbers<[2], [1], [1], [2], [0, 0, 0, 1, 1, 2], [0], [0]>} : vector<4x8x16xf32>, vector<4x16x32xf32>, vector<4x8x32xf32> -> vector<4x8x32xf32>
    "tpu.trace_stop"() : () -> ()
    %156 = tpu.concatenate %110, %125, %140, %155 in 2 : vector<4x8x32xf32>, vector<4x8x32xf32>, vector<4x8x32xf32>, vector<4x8x32xf32> -> vector<4x8x128xf32>
    %157 = vector.shape_cast %156 : vector<4x8x128xf32> to vector<32x128xf32>
    %c0_64 = arith.constant 0 : index
    %c0_65 = arith.constant 0 : index
    %158 = vector.load %arg9[%c0_64, %c0_65] : memref<128x128xf32, #tpu.memory_space<vmem>>, vector<128x128xf32>
    %cst_66 = arith.constant dense<0.000000e+00> : vector<32x128xf32>
    %159 = tpu.matmul %157, %158, %cst_66 {dimension_numbers = #tpu.dot_dimension_numbers<[1], [0], [0], [1], [0, 0, 1, 1], [], []>} : vector<32x128xf32>, vector<128x128xf32>, vector<32x128xf32> -> vector<32x128xf32>
    %160 = vector.shape_cast %7 : vector<128xf32> to vector<1x128xf32>
    %161 = vector.broadcast %160 : vector<1x128xf32> to vector<32x128xf32>
    %162 = arith.addf %159, %161 : vector<32x128xf32>
    %163 = arith.addf %25, %162 : vector<32x128xf32>
    %cst_67 = arith.constant dense<0.000000e+00> : vector<32xf32>
    %164 = vector.multi_reduction <add>, %163, %cst_67 [1] : vector<32x128xf32> to vector<32xf32>
    %165 = vector.shape_cast %164 : vector<32xf32> to vector<32x1xf32>
    %cst_68 = arith.constant 1.280000e+02 : f32
    %166 = vector.broadcast %cst_68 : f32 to vector<32x1xf32>
    %167 = arith.divf %165, %166 : vector<32x1xf32>
    %168 = vector.broadcast %167 : vector<32x1xf32> to vector<32x128xf32>
    %169 = arith.subf %163, %168 : vector<32x128xf32>
    %170 = arith.mulf %169, %169 : vector<32x128xf32>
    %cst_69 = arith.constant dense<0.000000e+00> : vector<32xf32>
    %171 = vector.multi_reduction <add>, %170, %cst_69 [1] : vector<32x128xf32> to vector<32xf32>
    %172 = vector.shape_cast %171 : vector<32xf32> to vector<32x1xf32>
    %cst_70 = arith.constant 1.280000e+02 : f32
    %173 = vector.broadcast %cst_70 : f32 to vector<32x1xf32>
    %174 = arith.divf %172, %173 : vector<32x1xf32>
    %175 = vector.broadcast %167 : vector<32x1xf32> to vector<32x128xf32>
    %176 = arith.subf %163, %175 : vector<32x128xf32>
    %cst_71 = arith.constant 9.99999974E-6 : f32
    %177 = vector.broadcast %cst_71 : f32 to vector<32x1xf32>
    %178 = arith.addf %174, %177 : vector<32x1xf32>
    %179 = math.rsqrt %178 : vector<32x1xf32>
    %180 = vector.broadcast %179 : vector<32x1xf32> to vector<32x128xf32>
    %181 = arith.mulf %176, %180 : vector<32x128xf32>
    %182 = vector.shape_cast %17 : vector<128xf32> to vector<1x128xf32>
    %183 = vector.broadcast %182 : vector<1x128xf32> to vector<32x128xf32>
    %184 = arith.mulf %181, %183 : vector<32x128xf32>
    %185 = vector.shape_cast %19 : vector<128xf32> to vector<1x128xf32>
    %186 = vector.broadcast %185 : vector<1x128xf32> to vector<32x128xf32>
    %187 = arith.addf %184, %186 : vector<32x128xf32>
    %c0_72 = arith.constant 0 : index
    %c0_73 = arith.constant 0 : index
    %188 = vector.load %arg11[%c0_72, %c0_73] : memref<128x512xf32, #tpu.memory_space<vmem>>, vector<128x512xf32>
    %cst_74 = arith.constant dense<0.000000e+00> : vector<32x512xf32>
    %189 = tpu.matmul %187, %188, %cst_74 {dimension_numbers = #tpu.dot_dimension_numbers<[1], [0], [0], [1], [0, 0, 1, 1], [], []>} : vector<32x128xf32>, vector<128x512xf32>, vector<32x512xf32> -> vector<32x512xf32>
    %190 = vector.shape_cast %9 : vector<512xf32> to vector<1x512xf32>
    %191 = vector.broadcast %190 : vector<1x512xf32> to vector<32x512xf32>
    %192 = arith.addf %189, %191 : vector<32x512xf32>
    %cst_75 = arith.constant 1.702000e+00 : f32
    %193 = vector.broadcast %cst_75 : f32 to vector<32x512xf32>
    %194 = arith.mulf %193, %192 : vector<32x512xf32>
    %195 = arith.negf %194 : vector<32x512xf32>
    %196 = math.exp %195 : vector<32x512xf32>
    %cst_76 = arith.constant 1.000000e+00 : f32
    %197 = vector.broadcast %cst_76 : f32 to vector<32x512xf32>
    %198 = arith.addf %197, %196 : vector<32x512xf32>
    %199 = arith.divf %197, %198 : vector<32x512xf32>
    %200 = arith.mulf %192, %199 : vector<32x512xf32>
    %c0_77 = arith.constant 0 : index
    %c0_78 = arith.constant 0 : index
    %201 = vector.load %arg13[%c0_77, %c0_78] : memref<512x128xf32, #tpu.memory_space<vmem>>, vector<512x128xf32>
    %cst_79 = arith.constant dense<0.000000e+00> : vector<32x128xf32>
    %202 = tpu.matmul %200, %201, %cst_79 {dimension_numbers = #tpu.dot_dimension_numbers<[1], [0], [0], [1], [0, 0, 1, 1], [], []>} : vector<32x512xf32>, vector<512x128xf32>, vector<32x128xf32> -> vector<32x128xf32>
    %203 = vector.shape_cast %11 : vector<128xf32> to vector<1x128xf32>
    %204 = vector.broadcast %203 : vector<1x128xf32> to vector<32x128xf32>
    %205 = arith.addf %202, %204 : vector<32x128xf32>
    %206 = arith.addf %163, %205 : vector<32x128xf32>
    %207 = vector.shape_cast %206 : vector<32x128xf32> to vector<4x8x128xf32>
    %c0_80 = arith.constant 0 : index
    %c0_81 = arith.constant 0 : index
    %c0_82 = arith.constant 0 : index
    %208 = vector.load %arg21[%c0_80, %c0_81, %c0_82] : memref<4x8x128xf32, #tpu.memory_space<vmem>>, vector<4x8x128xf32>
    tpu.vector_store %arg21[%c0_80, %c0_81, %c0_82], %207 {strides = array<i32>} : memref<4x8x128xf32, #tpu.memory_space<vmem>>, vector<4x8x128xf32>,
    return
  }
  func.func @transform_0(%arg0: i32) -> (i32, i32, i32) {
    %c0_i32 = arith.constant 0 : i32
    %c0_i32_0 = arith.constant 0 : i32
    %c0_i32_1 = arith.constant 0 : i32
    return %arg0, %c0_i32, %c0_i32_0 : i32, i32, i32
  }
  func.func @transform_1(%arg0: i32) -> (i32, i32, i32) {
    %c0_i32 = arith.constant 0 : i32
    %c0_i32_0 = arith.constant 0 : i32
    %c0_i32_1 = arith.constant 0 : i32
    return %arg0, %c0_i32, %c0_i32_0 : i32, i32, i32
  }
  func.func @transform_2(%arg0: i32) -> (i32, i32) {
    %c0_i32 = arith.constant 0 : i32
    %c0_i32_0 = arith.constant 0 : i32
    %c0_i32_1 = arith.constant 0 : i32
    return %c0_i32, %c0_i32_0 : i32, i32
  }
  func.func @transform_3(%arg0: i32) -> (i32, i32) {
    %c0_i32 = arith.constant 0 : i32
    %c0_i32_0 = arith.constant 0 : i32
    %c0_i32_1 = arith.constant 0 : i32
    return %c0_i32, %c0_i32_0 : i32, i32
  }
  func.func @transform_4(%arg0: i32) -> (i32, i32) {
    %c0_i32 = arith.constant 0 : i32
    %c0_i32_0 = arith.constant 0 : i32
    %c0_i32_1 = arith.constant 0 : i32
    return %c0_i32, %c0_i32_0 : i32, i32
  }
  func.func @transform_5(%arg0: i32) -> (i32, i32) {
    %c0_i32 = arith.constant 0 : i32
    %c0_i32_0 = arith.constant 0 : i32
    %c0_i32_1 = arith.constant 0 : i32
    return %c0_i32, %c0_i32_0 : i32, i32
  }
  func.func @transform_6(%arg0: i32) -> (i32, i32) {
    %c0_i32 = arith.constant 0 : i32
    %c0_i32_0 = arith.constant 0 : i32
    %c0_i32_1 = arith.constant 0 : i32
    return %c0_i32, %c0_i32_0 : i32, i32
  }
  func.func @transform_7(%arg0: i32) -> (i32, i32) {
    %c0_i32 = arith.constant 0 : i32
    %c0_i32_0 = arith.constant 0 : i32
    %c0_i32_1 = arith.constant 0 : i32
    return %c0_i32, %c0_i32_0 : i32, i32
  }
  func.func @transform_8(%arg0: i32) -> (i32, i32) {
    %c0_i32 = arith.constant 0 : i32
    %c0_i32_0 = arith.constant 0 : i32
    %c0_i32_1 = arith.constant 0 : i32
    return %c0_i32, %c0_i32_0 : i32, i32
  }
  func.func @transform_9(%arg0: i32) -> (i32, i32) {
    %c0_i32 = arith.constant 0 : i32
    %c0_i32_0 = arith.constant 0 : i32
    %c0_i32_1 = arith.constant 0 : i32
    return %c0_i32, %c0_i32_0 : i32, i32
  }
  func.func @transform_10(%arg0: i32) -> (i32, i32) {
    %c0_i32 = arith.constant 0 : i32
    %c0_i32_0 = arith.constant 0 : i32
    %c0_i32_1 = arith.constant 0 : i32
    return %c0_i32, %c0_i32_0 : i32, i32
  }
  func.func @transform_11(%arg0: i32) -> (i32, i32) {
    %c0_i32 = arith.constant 0 : i32
    %c0_i32_0 = arith.constant 0 : i32
    %c0_i32_1 = arith.constant 0 : i32
    return %c0_i32, %c0_i32_0 : i32, i32
  }
  func.func @transform_12(%arg0: i32) -> (i32, i32) {
    %c0_i32 = arith.constant 0 : i32
    %c0_i32_0 = arith.constant 0 : i32
    %c0_i32_1 = arith.constant 0 : i32
    return %c0_i32, %c0_i32_0 : i32, i32
  }
  func.func @transform_13(%arg0: i32) -> (i32, i32) {
    %c0_i32 = arith.constant 0 : i32
    %c0_i32_0 = arith.constant 0 : i32
    %c0_i32_1 = arith.constant 0 : i32
    return %c0_i32, %c0_i32_0 : i32, i32
  }
  func.func @transform_14(%arg0: i32) -> (i32, i32) {
    %c0_i32 = arith.constant 0 : i32
    %c0_i32_0 = arith.constant 0 : i32
    %c0_i32_1 = arith.constant 0 : i32
    return %c0_i32, %c0_i32_0 : i32, i32
  }
  func.func @transform_15(%arg0: i32) -> (i32, i32) {
    %c0_i32 = arith.constant 0 : i32
    %c0_i32_0 = arith.constant 0 : i32
    %c0_i32_1 = arith.constant 0 : i32
    return %c0_i32, %c0_i32_0 : i32, i32
  }
  func.func @transform_16(%arg0: i32) -> (i32, i32) {
    %c0_i32 = arith.constant 0 : i32
    %c0_i32_0 = arith.constant 0 : i32
    %c0_i32_1 = arith.constant 0 : i32
    return %c0_i32, %c0_i32_0 : i32, i32
  }
  func.func @transform_17(%arg0: i32) -> (i32, i32) {
    %c0_i32 = arith.constant 0 : i32
    %c0_i32_0 = arith.constant 0 : i32
    %c0_i32_1 = arith.constant 0 : i32
    return %c0_i32, %c0_i32_0 : i32, i32
  }
  func.func @transform_18(%arg0: i32) -> (i32, i32) {
    %c0_i32 = arith.constant 0 : i32
    %c0_i32_0 = arith.constant 0 : i32
    %c0_i32_1 = arith.constant 0 : i32
    return %c0_i32, %c0_i32_0 : i32, i32
  }
  func.func @transform_19(%arg0: i32) -> (i32, i32) {
    %c0_i32 = arith.constant 0 : i32
    %c0_i32_0 = arith.constant 0 : i32
    %c0_i32_1 = arith.constant 0 : i32
    return %c0_i32, %c0_i32_0 : i32, i32
  }
  func.func @transform_20(%arg0: i32) -> (i32, i32, i32) {
    %c0_i32 = arith.constant 0 : i32
    %c0_i32_0 = arith.constant 0 : i32
    %c0_i32_1 = arith.constant 0 : i32
    return %arg0, %c0_i32, %c0_i32_0 : i32, i32, i32
  }
}

</mosaic_0001>

<bundles_post_ra>
// kernel: tpu_custom_call.1
= control target key start
LH: loop header
LB: loop body
LE: loop exit
PB: predicated region body
PF: predicated region fallthrough
CT: control target
= control target key end

     0   :  { %s8202_s0 = inlined_call_operand.hbm [shape: f32[8,8,128], index: 0, kind: input, shape index: {}]   ;;  %s8203_s1 = inlined_call_operand.hbm [shape: f32[8,16,128], index: 1, kind: input, shape index: {}]   ;;  %s8204_s2 = inlined_call_operand.hbm [shape: f32[128,128], index: 2, kind: input, shape index: {}]   ;;  %s8205_s3 = inlined_call_operand.vmem [shape: f32[1,128], index: 3, kind: input, shape index: {}]   ;;  %s8206_s4 = inlined_call_operand.hbm [shape: f32[128,128], index: 4, kind: input, shape index: {}]   ;;  %s8207_s5 = inlined_call_operand.vmem [shape: f32[1,128], index: 5, kind: input, shape index: {}]   ;;  %s8208_s6 = inlined_call_operand.hbm [shape: f32[128,128], index: 6, kind: input, shape index: {}]   ;;  %s8209_s7 = inlined_call_operand.vmem [shape: f32[1,128], index: 7, kind: input, shape index: {}]   ;;  %s8210_s8 = inlined_call_operand.hbm [shape: f32[128,128], index: 8, kind: input, shape index: {}]   ;;  %s8211_s9 = inlined_call_operand.vmem [shape: f32[1,128], index: 9, kind: input, shape index: {}]   ;;  %s8212_s10 = inlined_call_operand.hbm [shape: f32[128,512], index: 10, kind: input, shape index: {}]   ;;  %s8213_s11 = inlined_call_operand.vmem [shape: f32[1,512], index: 11, kind: input, shape index: {}]   ;;  %s8214_s12 = inlined_call_operand.hbm [shape: f32[512,128], index: 12, kind: input, shape index: {}]   ;;  %s8215_s13 = inlined_call_operand.vmem [shape: f32[1,128], index: 13, kind: input, shape index: {}]   ;;  %s8216_s14 = inlined_call_operand.vmem [shape: f32[1,128], index: 14, kind: input, shape index: {}]   ;;  %s8217_s15 = inlined_call_operand.vmem [shape: f32[1,128], index: 15, kind: input, shape index: {}]   ;;  %s8218_s16 = inlined_call_operand.vmem [shape: f32[1,128], index: 16, kind: input, shape index: {}]   ;;  %s8219_s17 = inlined_call_operand.vmem [shape: f32[1,128], index: 17, kind: input, shape index: {}]   ;;  %s8220_s18 = inlined_call_operand.vmem [shape: f32[1,128], index: 18, kind: input, shape index: {}]   ;;  %s8221_s19 = inlined_call_operand.vmem [shape: f32[1,128], index: 19, kind: input, shape index: {}]   ;;  %s8222_s20 = inlined_call_operand.hbm [shape: f32[8,8,128], index: 20, kind: output, shape index: {}]  }
   0x1   :  { %8238 = sst [smem:[#allocation25_spill]] %s8202_s0 }
   0x2   :  { %8239 = sst [smem:[#allocation26_spill]] %s8203_s1 }
   0x3   :  { %8240 = sst [smem:[#allocation27_spill]] %s8204_s2 }
   0x4   :  { %8241 = sst [smem:[#allocation28_spill]] %s8205_s3 }
   0x5   :  { %8242 = sst [smem:[#allocation29_spill]] %s8206_s4 }
   0x6   :  { %8243 = sst [smem:[#allocation30_spill]] %s8207_s5 }
   0x7   :  { %8244 = sst [smem:[#allocation31_spill]] %s8208_s6 }
   0x8   :  { %8245 = sst [smem:[#allocation32_spill]] %s8209_s7 }
   0x9   :  { %8246 = sst [smem:[#allocation33_spill]] %s8210_s8 }
   0xa   :  { %8247 = sst [smem:[#allocation34_spill]] %s8211_s9 }
   0xb   :  { %8248 = sst [smem:[#allocation35_spill]] %s8212_s10 }
   0xc   :  { %8249 = sst [smem:[#allocation36_spill]] %s8213_s11 }
   0xd   :  { %8250 = sst [smem:[#allocation37_spill]] %s8214_s12 }
   0xe   :  { %8251 = sst [smem:[#allocation38_spill]] %s8215_s13 }
   0xf   :  { %8252 = sst [smem:[#allocation39_spill]] %s8217_s15 }
  0x10   :  { %8253 = sst [smem:[#allocation40_spill]] %s8218_s16 }
  0x11   :  { %8254 = sst [smem:[#allocation41_spill]] %s8219_s17 }
  0x12   :  { %8255 = sst [smem:[#allocation42_spill]] %s8222_s20 }
  0x13   :  { %25 = vsyncpa [#allocation3], 0 }
  0x14   :  { %27 = vsyncpa [#allocation3 + $0x1], 0 }
  0x15   :  { %28 = vsyncpa [#allocation6], 0 }
  0x16   :  { %30 = vsyncpa [#allocation6 + $0x1], 0 }
  0x17   :  { %31 = vsyncpa [#allocation9], 0 }
  0x18   :  { %32 = vsyncpa [#allocation12], 0 }
  0x19   :  { %33 = vsyncpa [#allocation15], 0 }
  0x1a   :  { %34 = vsyncpa [#allocation4], 0 }
  0x1b   :  { %36 = vsyncpa [#allocation4 + $0x1], 0  ;;  %s7152_s1 = smov 0   ;;  %s7154_s22 = smov 0  }
  0x1c   :  { %s7156_s23 = smov 0   ;;  %s7158_s24 = smov 0  }
  0x1d LB: > { %s7026_s2 = smov [#allocation7]   ;;  %s7173_s3 = sadd.s32 4294967295, %s7024_s24   ;;  %s7024_s24 = sphi %s7158_s24, %s8305_s24   ;;  %s7020_s23 = sphi %s7156_s23, %s8304_s23   ;;  %s7016_s22 = sphi %s7154_s22, %s8303_s22   ;;  %s7012_s1 = sphi %s7152_s1, %s8302_s1  }
  0x1e   : > { %s515_s25 = sshll.u32 %s7026_s2, 4  ;;  %p5119_p0 = scmp.ge.s32.totalorder %s7024_s24, 1  ;;  %s7178_s25 = int_to_ptr.vmem [resolvable:$true] %s515_s25 }
  0x1f   : > { %p8229_p1 = scmp.eq.s32.totalorder %s7173_s3, 0  ;;  %p503_p2 = scmp.lt.s32.totalorder %s7024_s24, 3 }
  0x20   : > { %s7027_s27 = smov [#allocation8]   ;;  %s7028_s29 = smov [#allocation11]  }
  0x21   : > { %p7180_p3 = pnand %p5119_p0, %p503_p2  ;;  %s531_s28 = sshll.u32 %s7027_s27, 4  ;;  %s7193_s28 = int_to_ptr.vmem [resolvable:$true] %s531_s28 }
  0x22   : > { %s563_s30 = sshll.u32 %s7028_s29, 4  ;;  %s8258_s2 = sld [smem:[#allocation27_spill]]  ;;  %s7195_s30 = int_to_ptr.vmem [resolvable:$true] %s563_s30 }
  0x23   : > { %s8256_s26 = scalar_select %p7180_p3, 1, 0 }
  0x24   : > { %p6302_p5 = pneg %p7180_p3 }
  0x26   : > { %p7189_p6 = pnand %p6302_p5, %p8229_p1 }
  0x28   : > { %s6710_s20 = scalar_lea.hbm %s8258_s2, 2048  ;;  %p7205_p8 = pneg %p7189_p6 }
  0x29   : > { %p6711_p7 = scmp.ne.s32.totalorder %s8258_s2, %s6710_s20  ;;  %p6717_p11 = scmp.lt.u32.totalorder %s6710_s20, %s8258_s2 }
  0x2b   : > { %p6713_p9 = pnand %p7205_p8, %p6711_p7 }
  0x2d   : > { %p6714_p10 = pneg %p6713_p9 }
  0x2f   : > { %p6719_p12 = pnand %p6717_p11, %p6714_p10 }
  0x31   : > { %6722 = shalt.err (!%p6719_p12)
}
  0x32   : > { %s6723_s11 = scalar_lea.vmem %s7178_s25, 2048  ;;  %p6731_p5 = scmp.lt.s32.totalorder %s7178_s25, %s7178_s25 }
  0x33   : > { %p6724_p13 = scmp.ne.s32.totalorder %s7178_s25, %s6723_s11  ;;  %p6732_p4 = scmp.lt.s32.totalorder %s6723_s11, %s6723_s11 }
  0x35   : > { %p6726_p0 = pnand %p6724_p13, %p7205_p8  ;;  %p6733_p7 = por %p6732_p4, %p6731_p5 }
  0x37   : > { %p6727_p2 = pneg %p6726_p0 }
  0x39   : > { %p6734_p9 = pnand %p6733_p7, %p6727_p2 }
  0x3b   : > { %6737 = shalt.err (!%p6734_p9)
}
  0x3c   : > { %s8231_s13 = smov 128   ;;  %s8233_s17 = smov 8  }
  0x3d   : > { %6305 = dma.hbm_to_vmem [thread:$0]  (!%p7189_p6), %s8258_s2, 2048, %s7178_s25, [#allocation6], %s8231_s13, %s8231_s13, %s8233_s17  }
  0x3e   : > { %s8260_s16 = sld [smem:[#allocation29_spill]] }
  0x44   : > { %s6738_s11 = scalar_lea.hbm %s8260_s16, 2048 }
  0x45   : > { %p6739_p4 = scmp.ne.s32.totalorder %s8260_s16, %s6738_s11  ;;  %p6745_p12 = scmp.lt.u32.totalorder %s6738_s11, %s8260_s16 }
  0x47   : > { %p6741_p10 = pnand %p6739_p4, %p7205_p8 }
  0x49   : > { %p6742_p11 = pneg %p6741_p10 }
  0x4b   : > { %p6747_p13 = pnand %p6745_p12, %p6742_p11 }
  0x4d   : > { %6750 = shalt.err (!%p6747_p13)
}
  0x4e   : > { %s6751_s25 = scalar_lea.vmem %s7193_s28, 2048  ;;  %p6759_p7 = scmp.lt.s32.totalorder %s7193_s28, %s7193_s28 }
  0x4f   : > { %p6752_p0 = scmp.ne.s32.totalorder %s7193_s28, %s6751_s25  ;;  %p6760_p9 = scmp.lt.s32.totalorder %s6751_s25, %s6751_s25 }
  0x51   : > { %p6754_p2 = pnand %p6752_p0, %p7205_p8  ;;  %p6761_p4 = por %p6760_p9, %p6759_p7 }
  0x53   : > { %p6755_p5 = pneg %p6754_p2 }
  0x55   : > { %p6762_p10 = pnand %p6761_p4, %p6755_p5 }
  0x57   : > { %6765 = shalt.err (!%p6762_p10)
}
  0x58   : > { %6308 = dma.hbm_to_vmem [thread:$0]  (!%p7189_p6), %s8260_s16, 2048, %s7193_s28, [#allocation9], %s8231_s13, %s8231_s13, %s8233_s17  }
  0x59   : > { %s8261_s8 = sld [smem:[#allocation33_spill]] }
  0x5f   : > { %s6766_s20 = scalar_lea.hbm %s8261_s8, 2048 }
  0x60   : > { %p6767_p11 = scmp.ne.s32.totalorder %s8261_s8, %s6766_s20  ;;  %p6773_p0 = scmp.lt.u32.totalorder %s6766_s20, %s8261_s8 }
  0x62   : > { %p6769_p12 = pnand %p6767_p11, %p7205_p8 }
  0x64   : > { %p6770_p13 = pneg %p6769_p12 }
  0x66   : > { %p6775_p2 = pnand %p6773_p0, %p6770_p13 }
  0x68   : > { %6778 = shalt.err (!%p6775_p2)
}
  0x69   : > { %s6779_s28 = scalar_lea.vmem %s7195_s30, 2048  ;;  %p6787_p4 = scmp.lt.s32.totalorder %s7195_s30, %s7195_s30 }
  0x6a   : > { %p6780_p5 = scmp.ne.s32.totalorder %s7195_s30, %s6779_s28  ;;  %p6788_p10 = scmp.lt.s32.totalorder %s6779_s28, %s6779_s28 }
  0x6c   : > { %p6782_p7 = pnand %p6780_p5, %p7205_p8  ;;  %p6789_p11 = por %p6788_p10, %p6787_p4 }
  0x6e   : > { %p6783_p9 = pneg %p6782_p7 }
  0x70   : > { %p6790_p12 = pnand %p6789_p11, %p6783_p9 }
  0x72   : > { %6793 = shalt.err (!%p6790_p12)
}
  0x73   : > { %6314 = dma.hbm_to_vmem [thread:$0]  (!%p7189_p6), %s8261_s8, 2048, %s7195_s30, [#allocation12], %s8231_s13, %s8231_s13, %s8233_s17  }
  0x74   : > { %s7031_s7 = smov [#allocation10]   ;;  %s7032_s15 = smov [#allocation13]  }
  0x75   : > { %s547_s9 = sshll.u32 %s7031_s7, 4  ;;  %s579_s20 = sshll.u32 %s7032_s15, 4  ;;  %s548_s9 = int_to_ptr.vmem [resolvable:$true] %s547_s9  ;;  %s580_s20 = int_to_ptr.vmem [resolvable:$true] %s579_s20 }
  0x76   : > { %s8262_s6 = sld [smem:[#allocation31_spill]] }
  0x7c   : > { %s6794_s29 = scalar_lea.hbm %s8262_s6, 2048 }
  0x7d   : > { %p6795_p13 = scmp.ne.s32.totalorder %s8262_s6, %s6794_s29  ;;  %p6801_p5 = scmp.lt.u32.totalorder %s6794_s29, %s8262_s6 }
  0x7f   : > { %p6797_p0 = pnand %p6795_p13, %p7205_p8 }
  0x81   : > { %p6798_p2 = pneg %p6797_p0 }
  0x83   : > { %p6803_p7 = pnand %p6801_p5, %p6798_p2 }
  0x85   : > { %6806 = shalt.err (!%p6803_p7)
}
  0x86   : > { %s6807_s30 = scalar_lea.vmem %s548_s9, 2048  ;;  %p6815_p11 = scmp.lt.s32.totalorder %s548_s9, %s548_s9 }
  0x87   : > { %p6808_p9 = scmp.ne.s32.totalorder %s548_s9, %s6807_s30  ;;  %p6816_p12 = scmp.lt.s32.totalorder %s6807_s30, %s6807_s30 }
  0x89   : > { %p6810_p4 = pnand %p6808_p9, %p7205_p8  ;;  %p6817_p1 = por %p6816_p12, %p6815_p11 }
  0x8b   : > { %p6811_p10 = pneg %p6810_p4 }
  0x8d   : > { %p6818_p3 = pnand %p6817_p1, %p6811_p10 }
  0x8f   : > { %6821 = shalt.err (!%p6818_p3)
}
  0x90   : > { %6311 = dma.hbm_to_vmem [thread:$0]  (!%p7189_p6), %s8262_s6, 2048, %s548_s9, [#allocation9], %s8231_s13, %s8231_s13, %s8233_s17  }
  0x91   : > { %s8263_s10 = sld [smem:[#allocation35_spill]] }
  0x97   : > { %s6822_s0 = scalar_lea.hbm %s8263_s10, 8192 }
  0x98   : > { %p6823_p1 = scmp.ne.s32.totalorder %s8263_s10, %s6822_s0  ;;  %p6829_p0 = scmp.lt.u32.totalorder %s6822_s0, %s8263_s10 }
  0x9a   : > { %p6825_p3 = pnand %p6823_p1, %p7205_p8 }
  0x9c   : > { %p6826_p13 = pneg %p6825_p3 }
  0x9e   : > { %p6831_p2 = pnand %p6829_p0, %p6826_p13 }
  0xa0   : > { %6834 = shalt.err (!%p6831_p2)
}
  0xa1   : > { %s6835_s25 = scalar_lea.vmem %s580_s20, 8192  ;;  %p6843_p4 = scmp.lt.s32.totalorder %s580_s20, %s580_s20 }
  0xa2   : > { %p6836_p5 = scmp.ne.s32.totalorder %s580_s20, %s6835_s25  ;;  %p6844_p10 = scmp.lt.s32.totalorder %s6835_s25, %s6835_s25 }
  0xa4   : > { %p6838_p7 = pnand %p6836_p5, %p7205_p8  ;;  %p6845_p11 = por %p6844_p10, %p6843_p4 }
  0xa6   : > { %p6839_p9 = pneg %p6838_p7 }
  0xa8   : > { %p6846_p12 = pnand %p6845_p11, %p6839_p9 }
  0xaa   : > { %6849 = shalt.err (!%p6846_p12)
}
  0xab   : > { %s7033_s9 = smov 512   ;;  %s7034_s30 = smov 32  }
  0xac   : > { %6317 = dma.hbm_to_vmem [thread:$0]  (!%p7189_p6), %s8263_s10, 8192, %s580_s20, [#allocation12], %s7033_s9, %s7033_s9, %s7034_s30  }
  0xad   : > { %s7035_s7 = smov [#allocation14]   ;;  %s8264_s12 = sld [smem:[#allocation37_spill]] }
  0xae   : > { %s595_s15 = sshll.u32 %s7035_s7, 4  ;;  %s596_s15 = int_to_ptr.vmem [resolvable:$true] %s595_s15 }
  0xb3   : > { %s6850_s29 = scalar_lea.hbm %s8264_s12, 8192 }
  0xb4   : > { %p6851_p1 = scmp.ne.s32.totalorder %s8264_s12, %s6850_s29  ;;  %p6857_p0 = scmp.lt.u32.totalorder %s6850_s29, %s8264_s12 }
  0xb6   : > { %p6853_p3 = pnand %p6851_p1, %p7205_p8 }
  0xb8   : > { %p6854_p13 = pneg %p6853_p3 }
  0xba   : > { %p6859_p2 = pnand %p6857_p0, %p6854_p13 }
  0xbc   : > { %6862 = shalt.err (!%p6859_p2)
}
  0xbd   : > { %s6863_s20 = scalar_lea.vmem %s596_s15, 8192  ;;  %p6871_p4 = scmp.lt.s32.totalorder %s596_s15, %s596_s15 }
  0xbe   : > { %p6864_p5 = scmp.ne.s32.totalorder %s596_s15, %s6863_s20  ;;  %p6872_p10 = scmp.lt.s32.totalorder %s6863_s20, %s6863_s20 }
  0xc0   : > { %p6866_p7 = pnand %p6864_p5, %p7205_p8  ;;  %p6873_p11 = por %p6872_p10, %p6871_p4 }
  0xc2   : > { %p6867_p9 = pneg %p6866_p7 }
  0xc4   : > { %p6874_p12 = pnand %p6873_p11, %p6867_p9 }
  0xc6   : > { %6877 = shalt.err (!%p6874_p12)
}
  0xc7   : > { %s8265_s9 = smov 128   ;;  %s5118_s4 = sadd.s32 4294967294, %s7024_s24  }
  0xc8   : > { %6320 = dma.hbm_to_vmem [thread:$0]  (!%p7189_p6), %s8264_s12, 8192, %s596_s15, [#allocation15], %s8265_s9, %s8265_s9, %s8233_s17  }
  0xc9   : > { %s7343_s27 = sadd.s32 1, %s7024_s24   ;;  %s49_s5 = sadd.s32 1, %s7020_s23 }
  0xca   : > { %s46_s2 = ssub.s32 %s7024_s24, %s7343_s27  ;;  %p56_p1 = scmp.ne.s32.totalorder %s7020_s23, %s7016_s22 }
  0xcb   : > { %p47_p8 = scmp.eq.s32.totalorder %s46_s2, 0  ;;  %p57_p3 = scmp.eq.s32.totalorder %s7024_s24, 0 }
  0xcc   : > { %p62_p13 = scmp.ne.s32.totalorder %s7016_s22, %s7012_s1  ;;  %p8268_p2 = scmp.eq.s32.totalorder %s7173_s3, 0 }
  0xcd   : > { %s7354_s7 = scalar_select %p47_p8, %s7020_s23, %s49_s5  }
  0xce   : > { %p7356_p0 = por %p57_p3, %p56_p1  ;;  %p7362_p6 = por %p8268_p2, %p62_p13 }
  0xcf   : > { %8266 = sst [smem:[#allocation24_spill]] %s7354_s7  ;;  %p490_p5 = scmp.eq.s32.totalorder %s7173_s3, 1 }
  0xd0   : > { %p496_p7 = scmp.eq.s32.totalorder %s5118_s4, 1  ;;  %p6338_p9 = scmp.lt.s32.totalorder %s7024_s24, 2 }
  0xd1   : > { %s7369_s21 = sand.u32 1, %s7020_s23   ;;  %p7371_p4 = por %p490_p5, %p56_p1 }
  0xd2   : > { %p7375_p10 = por %p496_p7, %p62_p13  ;;  %s5127_s28 = sshll.u32 %s7369_s21, 5 }
  0xd3   : > { %s8270_s29 = scalar_select %p7371_p4, 1, 0 }
  0xd4   : > { %s8271_s11 = scalar_select %p7375_p10, 1, 0 }
  0xd5   : > { %s5240_s25 = sshll.u32 %s7024_s24, 9  ;;  %s8272_s30 = sld [smem:[#allocation25_spill]] }
  0xd6   : > { %s634_s2 = scalar_lea.vmem [#allocation2], %s5127_s28  ;;  %p7390_p11 = pnand %p6338_p9, %p7356_p0 }
  0xd7   : > { %s641_s5 = sshll.u32 %s634_s2, 4  ;;  %s5130_s8 = sshll.u32 %s7369_s21, 6  ;;  %s7386_s5 = int_to_ptr.vmem [resolvable:$true] %s641_s5 }
  0xd8   : > { %s631_s20 = scalar_lea.sflag [#allocation3], %s7369_s21  ;;  %p6880_p8 = pneg %p7390_p11 }
  0xdb   : > { %s7384_s4 = scalar_lea.hbm %s8272_s30, %s5240_s25  ;;  %s6883_s0 = scalar_lea.hbm %s8272_s30, 1024 }
  0xdc   : > { %s6878_s25 = scalar_lea.hbm %s7384_s4, 512  ;;  %p6884_p13 = scmp.lt.u32.totalorder %s7384_s4, %s8272_s30 }
  0xdd   : > { %p6879_p12 = scmp.ne.s32.totalorder %s7384_s4, %s6878_s25  ;;  %p6885_p0 = scmp.lt.u32.totalorder %s6883_s0, %s6878_s25 }
  0xde   : > { %p6887_p5 = scmp.lt.u32.totalorder %s6878_s25, %s7384_s4 }
  0xdf   : > { %p6881_p1 = pnand %p6880_p8, %p6879_p12  ;;  %p6886_p2 = por %p6885_p0, %p6884_p13 }
  0xe1   : > { %p6882_p3 = pneg %p6881_p1  ;;  %p6888_p7 = por %p6887_p5, %p6886_p2 }
  0xe3   : > { %p6889_p9 = pnand %p6888_p7, %p6882_p3 }
  0xe5   : > { %6892 = shalt.err (!%p6889_p9)
}
  0xe6   : > { %s6893_s6 = scalar_lea.vmem %s7386_s5, 512  ;;  %s7036_s28 = smov [#allocation2]  }
  0xe7   : > { %p6894_p12 = scmp.ne.s32.totalorder %s7386_s5, %s6893_s6  ;;  %s6898_s13 = sshll.u32 %s7036_s28, 4  ;;  %s6899_s13 = int_to_ptr.vmem [resolvable:$false] %s6898_s13 }
  0xe8   : > { %s6900_s10 = scalar_lea.vmem %s6899_s13, 1024  ;;  %p6901_p4 = scmp.lt.s32.totalorder %s7386_s5, %s6899_s13 }
  0xe9   : > { %p6896_p1 = pnand %p6894_p12, %p6880_p8  ;;  %p6902_p13 = scmp.lt.s32.totalorder %s6900_s10, %s6893_s6 }
  0xeb   : > { %p6897_p10 = pneg %p6896_p1  ;;  %p6903_p0 = por %p6902_p13, %p6901_p4 }
  0xed   : > { %p6904_p2 = pnand %p6903_p0, %p6897_p10 }
  0xef   : > { %6907 = shalt.err (!%p6904_p2)
}
  0xf0   : > { %s8274_s25 = smov 8   ;;  %s5242_s0 = sshll.u32 %s7024_s24, 10 }
  0xf1   : > { %6324 = dma.hbm_to_vmem [thread:$0]  (!%p7390_p11), %s7384_s4, 512, %s7386_s5, %s631_s20, %s8265_s9, %s8265_s9, %s8274_s25  }
  0xf2   : > { %s8275_s28 = sld [smem:[#allocation26_spill]]  ;;  %s655_s10 = scalar_lea.vmem [#allocation5], %s5130_s8 }
  0xf3   : > { %s663_s12 = sshll.u32 %s655_s10, 4  ;;  %s8276_s16 = sand.u32 1, %s7024_s24   ;;  %s7435_s12 = int_to_ptr.vmem [resolvable:$true] %s663_s12 }
  0xf4   : > { %s7439_s30 = scalar_lea.sflag [#allocation6], %s8276_s16 }
  0xf8   : > { %s7431_s13 = scalar_lea.hbm %s8275_s28, %s5242_s0  ;;  %s6913_s21 = scalar_lea.hbm %s8275_s28, 2048 }
  0xf9   : > { %s6908_s7 = scalar_lea.hbm %s7431_s13, 1024  ;;  %p6914_p5 = scmp.lt.u32.totalorder %s7431_s13, %s8275_s28 }
  0xfa   : > { %p6909_p4 = scmp.ne.s32.totalorder %s7431_s13, %s6908_s7  ;;  %p6915_p7 = scmp.lt.u32.totalorder %s6913_s21, %s6908_s7 }
  0xfb   : > { %p6917_p12 = scmp.lt.u32.totalorder %s6908_s7, %s7431_s13 }
  0xfc   : > { %p6911_p10 = pnand %p6909_p4, %p6880_p8  ;;  %p6916_p9 = por %p6915_p7, %p6914_p5 }
  0xfe   : > { %p6912_p3 = pneg %p6911_p10  ;;  %p6918_p1 = por %p6917_p12, %p6916_p9 }
 0x100   : > { %p6919_p13 = pnand %p6918_p1, %p6912_p3 }
 0x102   : > { %6922 = shalt.err (!%p6919_p13)
}
 0x103   : > { %s6923_s8 = scalar_lea.vmem %s7435_s12, 1024  ;;  %s7037_s16 = smov [#allocation5]  }
 0x104   : > { %p6924_p0 = scmp.ne.s32.totalorder %s7435_s12, %s6923_s8  ;;  %s6928_s2 = sshll.u32 %s7037_s16, 4  ;;  %s6929_s2 = int_to_ptr.vmem [resolvable:$false] %s6928_s2 }
 0x105   : > { %s6930_s6 = scalar_lea.vmem %s6929_s2, 2048  ;;  %p6931_p10 = scmp.lt.s32.totalorder %s7435_s12, %s6929_s2 }
 0x106   : > { %p6926_p2 = pnand %p6924_p0, %p6880_p8  ;;  %p6932_p5 = scmp.lt.s32.totalorder %s6930_s6, %s6923_s8 }
 0x108   : > { %p6927_p4 = pneg %p6926_p2  ;;  %p6933_p7 = por %p6932_p5, %p6931_p10 }
 0x10a   : > { %p6934_p9 = pnand %p6933_p7, %p6927_p4 }
 0x10c   : > { %6937 = shalt.err (!%p6934_p9)
}
 0x10d   : > { %6327 = dma.hbm_to_vmem [thread:$0]  (!%p7390_p11), %s7431_s13, 1024, %s7435_s12, %s7439_s30, %s8265_s9, %s8265_s9, %s8274_s25  }
 0x10e   : > { %p8277_p8 = scmp.ne.s32.totalorder %s8256_s26, 0 }
 0x10f   : > { %s7471_s7 = sand.u32 (!%p8277_p8), 1, %s7016_s22  }
 0x110   : > { %675 = sbr.rel (%p8277_p8) target bundleno = 4545 (0x11c1), region = 100  ;;  %s5135_s10 = sshll.u32 (!%p8277_p8), %s7471_s7, 5 }
 0x111   : > { %s678_s4 = scalar_lea.sflag (!%p8277_p8), [#allocation3], %s7471_s7  ;;  %s7477_s17 = scalar_lea.vmem (!%p8277_p8), [#allocation2], %s5135_s10 }
 0x117   : > { %6983 = dma.done.wait (%p7362_p6), %s678_s4, 512  }
 0x118   : > { %6985 = vsyncadd (%p7362_p6), %s678_s4, 4294966784  ;;  %s686_s12 = sand.u32 1, %s7173_s3   ;;  %s5136_s26 = sshll.u32 %s7471_s7, 6 }
 0x119   : > { %s687_s9 = scalar_lea.sflag [#allocation6], %s686_s12  ;;  %s7485_s30 = scalar_lea.vmem [#allocation5], %s5136_s26 }
 0x11a   : > { %6987 = dma.done.wait (%p7362_p6), %s687_s9, 1024  }
 0x11b   : > { %6989 = vsyncadd (%p7362_p6), %s687_s9, 4294966272  ;;  %p8278_p11 = scmp.eq.s32.totalorder %s7173_s3, 0 }
 0x11d   : > { %6991 = dma.done.wait (%p8278_p11), [#allocation6], 2048   ;;  %p8279_p3 = pmov %p8278_p11 }
 0x11f   : > { %6993 = vsyncadd (%p8279_p3), [#allocation6], 4294965248  ;;  %p8280_p12 = pmov %p8279_p3 }
 0x120   : > { %p8281_p1 = pmov %p8279_p3 }
 0x121   : > { %6995 = dma.done.wait (%p8280_p12), [#allocation9], 4096  }
 0x122   : > { %6997 = vsyncadd (%p8281_p1), [#allocation9], 4294963200  ;;  %p8282_p13 = pmov %p8281_p1 }
 0x123   : > { %p8283_p0 = pmov %p8281_p1 }
 0x124   : > { %6999 = dma.done.wait (%p8282_p13), [#allocation12], 10240  }
 0x125   : > { %7001 = vsyncadd (%p8283_p0), [#allocation12], 4294957056  ;;  %p8284_p6 = pmov %p8283_p0 }
 0x126   : > { %p8285_p2 = pmov %p8283_p0 }
 0x127   : > { %7003 = dma.done.wait (%p8284_p6), [#allocation15], 8192  }
 0x128   : > { %7005 = vsyncadd (%p8285_p2), [#allocation15], 4294959104  ;;  %v795_v0 = vld [vmem:[%s7485_s30] sm:$0xff]  ;;  %v797_v1 = vld [vmem:[%s7485_s30 + $0x10] sm:$0xff]  ;;  %s8286_s16 = sld [smem:[#allocation39_spill]]  ;;  %vm7039_vm0 = vmmov 0  }
 0x129   : > { %868 = vadd.xlane.f32.xlu0 %v795_v0  ;;  %872 = vadd.xlane.f32.xlu1 %v797_v1  ;;  %v796_v2 = vld [vmem:[%s7485_s30 + $0x8] sm:$0xff]  ;;  %v798_v3 = vld [vmem:[%s7485_s30 + $0x18] sm:$0xff]  ;;  %v791_v4 = vld [vmem:[%s7477_s17] sm:$0xff]  ;;  %s8287_s4 = sld [smem:[#allocation30_spill]]  ;;  %vm1349_vm1 = vcmask 261120   ;;  %s8290_s9 = sld [smem:[#allocation28_spill]] }
 0x12a   : > { %v792_v5 = vld [vmem:[%s7477_s17 + $0x8] sm:$0xff]  ;;  %v799_v6 = vld [vmem:[%s7485_s30 + $0x20] sm:$0xff]  ;;  %v793_v8 = vld [vmem:[%s7477_s17 + $0x10] sm:$0xff]  ;;  %s8291_s25 = sld [smem:[#allocation32_spill]]  ;;  %vm1666_vm3 = vcmask 130048   ;;  %s7041_s13 = smov 96  }
 0x12b   : > { %v800_v7 = vld [vmem:[%s7485_s30 + $0x28] sm:$0xff]  ;;  %v7517_v9 = vld [vmem:[%s7485_s30 + $0x30] sm:$0xff]  ;;  %v7521_v10 = vld [vmem:[%s7477_s17 + $0x18] sm:$0xff]  ;;  %s7042_s5 = smov 64   ;;  %s7043_s21 = smov 32   ;;  %vm4127_vm4 = vcmask 523264  }
 0x12c   : > { %v7524_v11 = vld [vmem:[%s7485_s30 + $0x38] sm:$0xff]  ;;  %v1091_v12 = vld [vmem:[#allocation8] sm:$0xff]  ;;  %v1092_v13 = vld [vmem:[#allocation8 + $0x8] sm:$0xff]  ;;  %vm4132_vm5 = vcmask 785408   ;;  %s8292_s8 = sld [smem:[#allocation34_spill]]  ;;  %s8293_s2 = sld [smem:[#allocation40_spill]] }
 0x12d   : > { %870 = vadd.xlane.f32.xlu0 %v796_v2  ;;  %874 = vadd.xlane.f32.xlu1 %v798_v3  ;;  %v1093_v14 = vld [vmem:[#allocation8 + $0x10] sm:$0xff]  ;;  %v5936_v15 = vpack.c.bf16 %v1092_v13, %v1091_v12  ;;  %v1094_v16 = vld [vmem:[#allocation8 + $0x18] sm:$0xff]  ;;  %v984_v54 = vld [vmem:[#allocation7] sm:$0xff]  ;;  %s8294_s12 = sld [smem:[#allocation41_spill]]  ;;  %s8295_s30 = sld [smem:[#allocation36_spill]] }
 0x12e   : > { %v5940_v17 = vpack.c.bf16 %v1094_v16, %v1093_v14  ;;  %v985_v55 = vld [vmem:[#allocation7 + $0x8] sm:$0xff]  ;;  %v1095_v59 = vld [vmem:[#allocation8 + $0x20] sm:$0xff]  ;;  %v1098_v12 = vld [vmem:[#allocation8 + $0x38] sm:$0xff]  ;;  %p8298_p10 = scmp.ne.s32.totalorder %s8270_s29, 0 }
 0x12f   : > { %5937 = vmatprep.subr.bf16.mxu1 %v5936_v15  ;;  %v5904_v58 = vpack.c.bf16 %v985_v55, %v984_v54  ;;  %v1096_v60 = vld [vmem:[#allocation8 + $0x28] sm:$0xff]  ;;  %vm7654_vm2 = vmpackc.low %vm1349_vm1, %vm1349_vm1 }
 0x130   : > { %5939 = vmatpush3.bf16.msra.mxu1 %v5936_v15  ;;  %v5944_v63 = vpack.c.bf16 %v1096_v60, %v1095_v59  ;;  %v989_v15 = vld [vmem:[#allocation7 + $0x28] sm:$0xff] }
 0x131   : > { %803 = vadd.xlane.f32.xlu0 %v791_v4  ;;  %805 = vadd.xlane.f32.xlu1 %v792_v5 }
 0x132   : > { %5941 = vmatprep.subr.bf16.mxu1 %v5940_v17  ;;  %5905 = vmatprep.subr.bf16.mxu0 %v5904_v58 }
 0x133   : > { %5907 = vmatpush3.bf16.msra.mxu0 %v5904_v58 }
 0x134   : > { %5943 = vmatpush3.bf16.msra.mxu1 %v5940_v17  ;;  %v1099_v17 = vld [vmem:[#allocation8 + $0x40] sm:$0xff] }
 0x135   : > { %876 = vadd.xlane.f32.xlu0 %v799_v6  ;;  %878 = vadd.xlane.f32.xlu1 %v800_v7 }
 0x136   : > { %5945 = vmatprep.subr.bf16.mxu1 %v5944_v63 }
 0x138   : > { %5947 = vmatpush3.bf16.msra.mxu1 %v5944_v63 }
 0x139   : > { %807 = vadd.xlane.f32.xlu0 %v793_v8  ;;  %880 = vadd.xlane.f32.xlu1 %v7517_v9 }
 0x13d   : > { %809 = vadd.xlane.f32.xlu0 %v7521_v10  ;;  %882 = vadd.xlane.f32.xlu1 %v7524_v11 }
 0x1b6   : > { %v869_v18 = vpop.xlane.xlu0 %868  ;;  %v873_v19 = vpop.xlane.xlu1 %872 }
 0x1b7   : > { %v884_v20 = vmul.f32 0.0078125, %v869_v18  ;;  %v886_v21 = vmul.f32 0.0078125, %v873_v19  ;;  %v1100_v18 = vld [vmem:[#allocation8 + $0x48] sm:$0xff] }
 0x1b8   : > { %v5952_v19 = vpack.c.bf16 %v1100_v18, %v1099_v17  ;;  %v7585_v17 = vld [vmem:[%s8220_s18] ss:$0 sm:$0xff] }
 0x1b9   : > { %v7528_v22 = vsub.f32 %v795_v0, %v884_v20  ;;  %v7530_v23 = vsub.f32 %v797_v1, %v886_v21  ;;  %v990_v20 = vld [vmem:[#allocation7 + $0x30] sm:$0xff]  ;;  %v991_v21 = vld [vmem:[#allocation7 + $0x38] sm:$0xff] }
 0x1ba   : > { %v871_v24 = vpop.xlane.xlu0 %870  ;;  %v875_v25 = vpop.xlane.xlu1 %874 }
 0x1bb   : > { %v885_v26 = vmul.f32 0.0078125, %v871_v24  ;;  %v900_v27 = vmul.f32 %v7528_v22, %v7528_v22  ;;  %v887_v28 = vmul.f32 0.0078125, %v875_v25  ;;  %v902_v30 = vmul.f32 %v7530_v23, %v7530_v23  ;;  %v1101_v25 = vld [vmem:[#allocation8 + $0x50] sm:$0xff] }
 0x1bc   : > { %v5916_v24 = vpack.c.bf16 %v991_v21, %v990_v20 }
 0x1bd   : > { %908 = vadd.xlane.f32.xlu0 %v900_v27  ;;  %v7534_v29 = vsub.f32 %v796_v2, %v885_v26  ;;  %v7538_v31 = vsub.f32 %v798_v3, %v887_v28  ;;  %v1102_v26 = vld [vmem:[#allocation8 + $0x58] sm:$0xff]  ;;  %v992_v28 = vld [vmem:[#allocation7 + $0x40] sm:$0xff] }
 0x1be   : > { %v804_v32 = vpop.xlane.xlu0 %803  ;;  %v806_v33 = vpop.xlane.xlu1 %805  ;;  %v5956_v27 = vpack.c.bf16 %v1102_v26, %v1101_v25  ;;  %v7591_v25 = vld [vmem:[%s8221_s19] ss:$0 sm:$0xff] }
 0x1bf   : > { %v812_v34 = vmul.f32 0.0078125, %v804_v32  ;;  %v901_v35 = vmul.f32 %v7534_v29, %v7534_v29  ;;  %v813_v36 = vmul.f32 0.0078125, %v806_v33  ;;  %v903_v37 = vmul.f32 %v7538_v31, %v7538_v31  ;;  %v1103_v33 = vld [vmem:[#allocation8 + $0x60] sm:$0xff] }
 0x1c1   : > { %910 = vadd.xlane.f32.xlu1 %v901_v35  ;;  %912 = vadd.xlane.f32.xlu0 %v902_v30  ;;  %v7544_v38 = vsub.f32 %v791_v4, %v812_v34  ;;  %v7546_v39 = vsub.f32 %v792_v5, %v813_v36  ;;  %v993_v30 = vld [vmem:[#allocation7 + $0x48] sm:$0xff]  ;;  %v994_v36 = vld [vmem:[#allocation7 + $0x50] sm:$0xff] }
 0x1c2   : > { %v877_v40 = vpop.xlane.xlu0 %876  ;;  %v879_v41 = vpop.xlane.xlu1 %878  ;;  %v5920_v32 = vpack.c.bf16 %v993_v30, %v992_v28  ;;  %v1104_v34 = vld [vmem:[#allocation8 + $0x68] sm:$0xff] }
 0x1c3   : > { %v888_v42 = vmul.f32 0.0078125, %v877_v40  ;;  %v820_v43 = vmul.f32 %v7544_v38, %v7544_v38  ;;  %v889_v44 = vmul.f32 0.0078125, %v879_v41  ;;  %v821_v45 = vmul.f32 %v7546_v39, %v7546_v39  ;;  %v1105_v41 = vld [vmem:[#allocation8 + $0x70] sm:$0xff] }
 0x1c4   : > { %v5960_v35 = vpack.c.bf16 %v1104_v34, %v1103_v33 }
 0x1c5   : > { %914 = vadd.xlane.f32.xlu1 %v903_v37  ;;  %824 = vadd.xlane.f32.xlu0 %v820_v43  ;;  %v7552_v46 = vsub.f32 %v799_v6, %v888_v42  ;;  %v7554_v47 = vsub.f32 %v800_v7, %v889_v44  ;;  %v986_v6 = vld [vmem:[#allocation7 + $0x10] sm:$0xff]  ;;  %v987_v7 = vld [vmem:[#allocation7 + $0x18] sm:$0xff]  ;;  %v996_v44 = vld [vmem:[#allocation7 + $0x60] sm:$0xff] }
 0x1c6   : > { %v808_v48 = vpop.xlane.xlu0 %807  ;;  %v881_v49 = vpop.xlane.xlu1 %880  ;;  %v995_v37 = vld [vmem:[#allocation7 + $0x58] sm:$0xff] }
 0x1c7   : > { %v814_v50 = vmul.f32 0.0078125, %v808_v48  ;;  %v904_v51 = vmul.f32 %v7552_v46, %v7552_v46  ;;  %v890_v52 = vmul.f32 0.0078125, %v881_v49  ;;  %v905_v53 = vmul.f32 %v7554_v47, %v7554_v47  ;;  %v1106_v42 = vld [vmem:[#allocation8 + $0x78] sm:$0xff]  ;;  %v998_v49 = vld [vmem:[#allocation7 + $0x70] sm:$0xff] }
 0x1c8   : > { %v5924_v40 = vpack.c.bf16 %v995_v37, %v994_v36  ;;  %v5964_v43 = vpack.c.bf16 %v1106_v42, %v1105_v41 }
 0x1c9   : > { %v7560_v56 = vsub.f32 %v793_v8, %v814_v50  ;;  %826 = vadd.xlane.f32.xlu1 %v821_v45  ;;  %916 = vadd.xlane.f32.xlu0 %v904_v51  ;;  %v7563_v57 = vsub.f32 %v7517_v9, %v890_v52  ;;  %v5908_v8 = vpack.c.bf16 %v987_v7, %v986_v6  ;;  %v1097_v9 = vld [vmem:[#allocation8 + $0x30] sm:$0xff]  ;;  %v997_v45 = vld [vmem:[#allocation7 + $0x68] sm:$0xff]  ;;  %v999_v50 = vld [vmem:[#allocation7 + $0x78] sm:$0xff] }
 0x1ca   : > { %v810_v61 = vpop.xlane.xlu0 %809  ;;  %v883_v62 = vpop.xlane.xlu1 %882  ;;  %v5948_v14 = vpack.c.bf16 %v1098_v12, %v1097_v9  ;;  %v5928_v48 = vpack.c.bf16 %v997_v45, %v996_v44  ;;  %v5932_v51 = vpack.c.bf16 %v999_v50, %v998_v49  ;;  %v1218_v52 = vld [vmem:[#allocation10] sm:$0xff] }
 0x1cb   : > { %v815_v0 = vmul.f32 0.0078125, %v810_v61  ;;  %v822_v1 = vmul.f32 %v7560_v56, %v7560_v56  ;;  %v891_v2 = vmul.f32 0.0078125, %v883_v62  ;;  %v906_v5 = vmul.f32 %v7563_v57, %v7563_v57  ;;  %5909 = vmatprep.subr.bf16.mxu0 %v5908_v8 }
 0x1cc   : > { %5911 = vmatpush3.bf16.msra.mxu0 %v5908_v8  ;;  %5949 = vmatprep.subr.bf16.mxu1 %v5948_v14 }
 0x1cd   : > { %v7568_v3 = vsub.f32 %v7521_v10, %v815_v0  ;;  %918 = vadd.xlane.f32.xlu1 %v905_v53  ;;  %828 = vadd.xlane.f32.xlu0 %v822_v1  ;;  %v7571_v4 = vsub.f32 %v7524_v11, %v891_v2  ;;  %v988_v11 = vld [vmem:[#allocation7 + $0x20] sm:$0xff]  ;;  %v1219_v53 = vld [vmem:[#allocation10 + $0x8] sm:$0xff] }
 0x1ce   : > { %v5912_v16 = vpack.c.bf16 %v989_v15, %v988_v11  ;;  %5951 = vmatpush3.bf16.msra.mxu1 %v5948_v14  ;;  %v7579_v54 = vpack.c.bf16 %v1219_v53, %v1218_v52 }
 0x1cf   : > { %v823_v13 = vmul.f32 %v7568_v3, %v7568_v3  ;;  %v907_v10 = vmul.f32 %v7571_v4, %v7571_v4  ;;  %5953 = vmatprep.subr.bf16.mxu1 %v5952_v19 }
 0x1d0   : > { %5913 = vmatprep.subr.bf16.mxu0 %v5912_v16 }
 0x1d1   : > { %920 = vadd.xlane.f32.xlu1 %v906_v5  ;;  %830 = vadd.xlane.f32.xlu0 %v823_v13 }
 0x1d2   : > { %5915 = vmatpush3.bf16.msra.mxu0 %v5912_v16  ;;  %5955 = vmatpush3.bf16.msra.mxu1 %v5952_v19 }
 0x1d3   : > { %5917 = vmatprep.subr.bf16.mxu0 %v5916_v24  ;;  %5957 = vmatprep.subr.bf16.mxu1 %v5956_v27 }
 0x1d5   : > { %922 = vadd.xlane.f32.xlu1 %v907_v10 }
 0x1d6   : > { %5919 = vmatpush3.bf16.msra.mxu0 %v5916_v24  ;;  %5959 = vmatpush3.bf16.msra.mxu1 %v5956_v27 }
 0x1d7   : > { %5921 = vmatprep.subr.bf16.mxu0 %v5920_v32  ;;  %5961 = vmatprep.subr.bf16.mxu1 %v5960_v35 }
 0x1da   : > { %5923 = vmatpush3.bf16.msra.mxu0 %v5920_v32  ;;  %5963 = vmatpush3.bf16.msra.mxu1 %v5960_v35 }
 0x1db   : > { %5925 = vmatprep.subr.bf16.mxu0 %v5924_v40  ;;  %5965 = vmatprep.subr.bf16.mxu1 %v5964_v43 }
 0x1de   : > { %5927 = vmatpush3.bf16.msra.mxu0 %v5924_v40  ;;  %5967 = vmatpush3.bf16.msra.mxu1 %v5964_v43 }
 0x1df   : > { %5929 = vmatprep.subr.bf16.mxu0 %v5928_v48 }
 0x1e2   : > { %5931 = vmatpush3.bf16.msra.mxu0 %v5928_v48 }
 0x1e3   : > { %5933 = vmatprep.subr.bf16.mxu0 %v5932_v51 }
 0x1e6   : > { %5935 = vmatpush3.bf16.msra.mxu0 %v5932_v51 }
 0x1e7   : > { %5969 = vmatprep.subr.bf16.mxu0 %v7579_v54 }
 0x24a   : > { %v909_v55 = vpop.xlane.xlu0 %908 }
 0x24b   : > { %v924_v58 = vmul.f32 0.0078125, %v909_v55  ;;  %v5145_v55 = vld [vmem:[%s8286_s16] ss:$0 sm:$0xff]  ;;  %s4952_s16 = scalar_lea.sflag [#allocation4], %s7471_s7 }
 0x24d   : > { %v932_v59 = vadd.f32 1e-05, %v924_v58 }
 0x24e   : > { %v911_v60 = vpop.xlane.xlu1 %910  ;;  %v913_v61 = vpop.xlane.xlu0 %912 }
 0x24f   : > { %6546 = vrsqrt.f32 %v932_v59  ;;  %v925_v62 = vmul.f32 0.0078125, %v911_v60  ;;  %v926_v63 = vmul.f32 0.0078125, %v913_v61 }
 0x251   : > { %v933_v0 = vadd.f32 1e-05, %v925_v62  ;;  %v934_v1 = vadd.f32 1e-05, %v926_v63 }
 0x252   : > { %v915_v2 = vpop.xlane.xlu1 %914  ;;  %v825_v5 = vpop.xlane.xlu0 %824 }
 0x253   : > { %6548 = vrsqrt.f32 %v933_v0  ;;  %v927_v6 = vmul.f32 0.0078125, %v915_v2  ;;  %v832_v7 = vmul.f32 0.0078125, %v825_v5  ;;  %v1221_v2 = vld [vmem:[#allocation10 + $0x18] sm:$0xff] }
 0x254   : > { %6550 = vrsqrt.f32 %v934_v1  ;;  %v1220_v1 = vld [vmem:[#allocation10 + $0x10] sm:$0xff] }
 0x255   : > { %v935_v8 = vadd.f32 1e-05, %v927_v6  ;;  %v836_v9 = vadd.f32 1e-05, %v832_v7 }
 0x256   : > { %v827_v12 = vpop.xlane.xlu1 %826  ;;  %v917_v13 = vpop.xlane.xlu0 %916 }
 0x257   : > { %6552 = vrsqrt.f32 %v935_v8  ;;  %v833_v14 = vmul.f32 0.0078125, %v827_v12  ;;  %v928_v10 = vmul.f32 0.0078125, %v917_v13  ;;  %v5972_v12 = vpack.c.bf16 %v1221_v2, %v1220_v1 }
 0x258   : > { %6554 = vrsqrt.f32 %v836_v9 }
 0x259   : > { %v6547_v11 = vpop.eup %6546  ;;  %v837_v15 = vadd.f32 1e-05, %v833_v14  ;;  %v936_v16 = vadd.f32 1e-05, %v928_v10  ;;  %v1222_v10 = vld [vmem:[#allocation10 + $0x20] sm:$0xff] }
 0x25a   : > { %v919_v18 = vpop.xlane.xlu1 %918  ;;  %v829_v19 = vpop.xlane.xlu0 %828  ;;  %v948_v20 = vmul.f32 %v6547_v11, %v7528_v22 }
 0x25b   : > { %6556 = vrsqrt.f32 %v837_v15  ;;  %v929_v21 = vmul.f32 0.0078125, %v919_v18  ;;  %v834_v24 = vmul.f32 0.0078125, %v829_v19 }
 0x25c   : > { %6558 = vrsqrt.f32 %v936_v16  ;;  %v962_v26 = vmul.f32 %v7585_v17, %v948_v20 }
 0x25d   : > { %v6549_v27 = vpop.eup %6548  ;;  %v937_v28 = vadd.f32 1e-05, %v929_v21  ;;  %v838_v30 = vadd.f32 1e-05, %v834_v24 }
 0x25e   : > { %v6551_v32 = vpop.eup %6550  ;;  %v921_v33 = vpop.xlane.xlu1 %920  ;;  %v7595_v35 = vadd.f32 %v7591_v25, %v962_v26  ;;  %v949_v22 = vmul.f32 %v6549_v27, %v7534_v29  ;;  %v5144_v29 = vld [vmem:[%s8216_s14] ss:$0 sm:$0xff]  ;;  %v1224_v26 = vld [vmem:[#allocation10 + $0x30] sm:$0xff]  ;;  %v1225_v27 = vld [vmem:[#allocation10 + $0x38] sm:$0xff] }
 0x25f   : > { %v831_v34 = vpop.xlane.xlu0 %830  ;;  %6560 = vrsqrt.f32 %v937_v28  ;;  %v930_v36 = vmul.f32 0.0078125, %v921_v33  ;;  %v950_v40 = vmul.f32 %v6551_v32, %v7530_v23 }
 0x260   : > { %v835_v37 = vmul.f32 0.0078125, %v831_v34  ;;  %6562 = vrsqrt.f32 %v838_v30  ;;  %5586 = vmatprep.mubr.f32.mxu1 %v7595_v35  ;;  %v963_v41 = vmul.f32 %v7585_v17, %v949_v22  ;;  %v5980_v34 = vpack.c.bf16 %v1225_v27, %v1224_v26  ;;  %v1227_v22 = vld [vmem:[#allocation10 + $0x48] sm:$0xff] }
 0x261   : > { %v6553_v42 = vpop.eup %6552  ;;  %v938_v43 = vadd.f32 1e-05, %v930_v36  ;;  %v964_v45 = vmul.f32 %v7585_v17, %v950_v40  ;;  %v1228_v40 = vld [vmem:[#allocation10 + $0x50] sm:$0xff] }
 0x262   : > { %v839_v44 = vadd.f32 1e-05, %v835_v37  ;;  %v6555_v48 = vpop.eup %6554  ;;  %v923_v49 = vpop.xlane.xlu1 %922  ;;  %v7603_v50 = vadd.f32 %v7591_v25, %v963_v41  ;;  %v951_v23 = vmul.f32 %v6553_v42, %v7538_v31  ;;  %v1229_v41 = vld [vmem:[#allocation10 + $0x58] sm:$0xff]  ;;  %v1230_v42 = vld [vmem:[#allocation10 + $0x60] sm:$0xff] }
 0x263   : > { %6564 = vrsqrt.f32 %v938_v43  ;;  %v931_v51 = vmul.f32 0.0078125, %v923_v49  ;;  %v7610_v52 = vadd.f32 %v7591_v25, %v964_v45  ;;  %v844_v53 = vmul.f32 %v6555_v48, %v7544_v38  ;;  %v1231_v43 = vld [vmem:[#allocation10 + $0x68] sm:$0xff]  ;;  %v1233_v45 = vld [vmem:[#allocation10 + $0x78] sm:$0xff]  ;;  %v5149_v49 = vld [vmem:[%s8287_s4] ss:$0 sm:$0xff] }
 0x264   : > { %6566 = vrsqrt.f32 %v839_v44  ;;  %5587 = vmatmul.mubr.f32.vlgmr.msra.gmra.mrb[0].mxu1 %v7603_v50  ;;  %v965_v58 = vmul.f32 %v7585_v17, %v951_v23  ;;  %v1232_v44 = vld [vmem:[#allocation10 + $0x70] sm:$0xff]  ;;  %v7040_v48 = vmov 0.0  }
 0x265   : > { %v6557_v59 = vpop.eup %6556  ;;  %v939_v60 = vadd.f32 1e-05, %v931_v51  ;;  %5589 = vmatprep.mubr.f32.mxu1 %v7610_v52  ;;  %v854_v31 = vmul.f32 %v5144_v29, %v844_v53 }
 0x266   : > { %v6559_v61 = vpop.eup %6558  ;;  %v7620_v62 = vadd.f32 %v7591_v25, %v965_v58  ;;  %v845_v38 = vmul.f32 %v6557_v59, %v7546_v39 }
 0x267   : > { %6568 = vrsqrt.f32 %v939_v60  ;;  %v864_v63 = vadd.f32 %v5145_v55, %v854_v31  ;;  %v952_v0 = vmul.f32 %v6559_v61, %v7552_v46  ;;  %v1223_v46 = vld [vmem:[#allocation10 + $0x28] sm:$0xff]  ;;  %v5148_v61 = vld [vmem:[%s8290_s9] ss:$0 sm:$0xff] }
 0x268   : > { %5590 = vmatmul.mubr.f32.gmra.mrb[2].mxu1 %v7620_v62  ;;  %v855_v5 = vmul.f32 %v5144_v29, %v845_v38  ;;  %v5976_v20 = vpack.c.bf16 %v1223_v46, %v1222_v10 }
 0x269   : > { %v6561_v6 = vpop.eup %6560  ;;  %5548 = vmatprep.mubr.f32.mxu0 %v864_v63  ;;  %v966_v7 = vmul.f32 %v7585_v17, %v952_v0 }
 0x26a   : > { %v6563_v8 = vpop.eup %6562  ;;  %v865_v9 = vadd.f32 %v5145_v55, %v855_v5  ;;  %v953_v13 = vmul.f32 %v6561_v6, %v7554_v47 }
 0x26b   : > { %v980_v39 = vadd.f32 %v7591_v25, %v966_v7  ;;  %v846_v14 = vmul.f32 %v6563_v8, %v7560_v56 }
 0x26c   : > { %5549 = vmatmul.mubr.f32.vlgmr.msra.gmra.mrb[0].mxu0 %v865_v9  ;;  %v967_v11 = vmul.f32 %v7585_v17, %v953_v13 }
 0x26d   : > { %v6565_v15 = vpop.eup %6564  ;;  %5592 = vmatprep.mubr.f32.mxu1 %v980_v39  ;;  %5971 = vmatpush3.bf16.msra.mxu0 %v7579_v54  ;;  %v856_v16 = vmul.f32 %v5144_v29, %v846_v14 }
 0x26e   : > { %v6567_v18 = vpop.eup %6566  ;;  %5973 = vmatprep.subr.bf16.mxu0 %v5972_v12  ;;  %v981_v19 = vadd.f32 %v7591_v25, %v967_v11  ;;  %v954_v47 = vmul.f32 %v6565_v15, %v7563_v57 }
 0x26f   : > { %v866_v21 = vadd.f32 %v5145_v55, %v856_v16  ;;  %v847_v56 = vmul.f32 %v6567_v18, %v7568_v3  ;;  %v1226_v3 = vld [vmem:[#allocation10 + $0x40] sm:$0xff] }
 0x270   : > { %5593 = vmatmul.mubr.f32.gmra.mrb[4].mxu1 %v981_v19  ;;  %v968_v24 = vmul.f32 %v7585_v17, %v954_v47  ;;  %v5984_v37 = vpack.c.bf16 %v1227_v22, %v1226_v3 }
 0x271   : > { %v6569_v28 = vpop.eup %6568  ;;  %5551 = vmatprep.mubr.f32.mxu0 %v866_v21  ;;  %5975 = vmatpush3.bf16.msra.mxu0 %v5972_v12  ;;  %v857_v54 = vmul.f32 %v5144_v29, %v847_v56 }
 0x272   : > { %5977 = vmatprep.subr.bf16.mxu0 %v5976_v20  ;;  %v982_v30 = vadd.f32 %v7591_v25, %v968_v24  ;;  %v955_v32 = vmul.f32 %v6569_v28, %v7571_v4  ;;  %v5988_v4 = vpack.c.bf16 %v1229_v41, %v1228_v40  ;;  %v5150_v24 = vld [vmem:[%s8291_s25] ss:$0 sm:$0xff] }
 0x273   : > { %v867_v33 = vadd.f32 %v5145_v55, %v857_v54 }
 0x274   : > { %5595 = vmatprep.mubr.f32.mxu1 %v982_v30  ;;  %v969_v57 = vmul.f32 %v7585_v17, %v955_v32  ;;  %v5992_v17 = vpack.c.bf16 %v1231_v43, %v1230_v42 }
 0x275   : > { %5552 = vmatmul.mubr.f32.gmra.mrb[2].mxu0 %v867_v33 }
 0x276   : > { %5979 = vmatpush3.bf16.msra.mxu0 %v5976_v20  ;;  %5630 = vmatprep.mubr.f32.mxu0 %v7595_v35  ;;  %v983_v36 = vadd.f32 %v7591_v25, %v969_v57  ;;  %v5996_v35 = vpack.c.bf16 %v1233_v45, %v1232_v44  ;;  %v7038_v25 = vmov 0.0|0.0  }
 0x277   : > { %5981 = vmatprep.subr.bf16.mxu0 %v5980_v34  ;;  %6008 = vmatprep.subr.bf16.mxu1 %v7038_v25 }
 0x278   : > { %5596 = vmatmul.mubr.f32.gmra.mrb[6].mxu1 %v983_v36 }
 0x279   : > { %5660 = vmatprep.mubr.msk.f32.mxu1 %vm7039_vm0, %v7040_v48 }
 0x27a   : > { %5983 = vmatpush3.bf16.msra.mxu0 %v5980_v34 }
 0x27b   : > { %5985 = vmatprep.subr.bf16.mxu0 %v5984_v37 }
 0x27e   : > { %5987 = vmatpush3.bf16.msra.mxu0 %v5984_v37 }
 0x27f   : > { %5989 = vmatprep.subr.bf16.mxu0 %v5988_v4 }
 0x282   : > { %5991 = vmatpush3.bf16.msra.mxu0 %v5988_v4 }
 0x283   : > { %5993 = vmatprep.subr.bf16.mxu0 %v5992_v17 }
 0x286   : > { %5995 = vmatpush3.bf16.msra.mxu0 %v5992_v17 }
 0x287   : > { %5997 = vmatprep.subr.bf16.mxu0 %v5996_v35 }
 0x28a   : > { %5999 = vmatpush3.bf16.msra.mxu0 %v5996_v35 }
 0x28b   : > { %6000 = vmatprep.subr.bf16.mxu0 %v7038_v25 }
 0x28d   : > { %5631 = vmatmul.mubr.f32.vlgmr.msra.gmra.mrb[4].mxu0 %v7603_v50 }
 0x28e   : > { %5633 = vmatprep.mubr.f32.mxu0 %v7610_v52 }
 0x291   : > { %5634 = vmatmul.mubr.f32.gmra.mrb[6].mxu0 %v7620_v62 }
 0x292   : > { %5636 = vmatprep.mubr.f32.mxu0 %v980_v39 }
 0x295   : > { %5637 = vmatmul.mubr.f32.gmra.mrb[8].mxu0 %v981_v19 }
 0x296   : > { %5639 = vmatprep.mubr.f32.mxu0 %v982_v30 }
 0x299   : > { %5640 = vmatmul.mubr.f32.gmra.mrb[10].mxu0 %v983_v36 }
 0x29a   : > { %5646 = vmatprep.mubr.msk.f32.mxu0 %vm7039_vm0, %v7040_v48 }
 0x337   : > { %v5588_v50 = vpop.f32.mrb[0].mxu1 }
 0x338   : > { %v1185_v29 = vadd.f32 %v5588_v50, %v5149_v49  ;;  %v1179_v23 = vpop.f32.mrb[1].mxu1 }
 0x339   : > { %v1180_v51 = vadd.f32 %v5149_v49, %v1179_v23 }
 0x33b   : > { %v6001_v53 = vpack.c.bf16 %v1185_v29, %v1180_v51  ;;  %v5591_v55 = vpop.f32.mrb[2].mxu1  ;;  %v7658_v58 = vpack.i.bf16 %v1185_v29, %v1180_v51 }
 0x33c   : > { %v1195_v59 = vadd.f32 %v5591_v55, %v5149_v49  ;;  %v1189_v60 = vpop.f32.mrb[3].mxu1 }
 0x33d   : > { %v1190_v31 = vadd.f32 %v5149_v49, %v1189_v60  ;;  %6003 = vmatpush3.bf16.xpose.msk.msra.mxu0 %vm7654_vm2, %v6001_v53 }
 0x33e   : > { %6004 = vmatprep.subr.bf16.mxu0 %v7038_v25 }
 0x33f   : > { %v6005_v62 = vpack.c.bf16 %v1195_v59, %v1190_v31  ;;  %v5550_v38 = vpop.f32.mrb[0].mxu0  ;;  %v7666_v63 = vpack.i.bf16 %v1195_v59, %v1190_v31 }
 0x340   : > { %v1072_v0 = vpop.f32.mrb[1].mxu0  ;;  %v1078_v9 = vadd.f32 %v5550_v38, %v5148_v61 }
 0x341   : > { %v1073_v1 = vadd.f32 %v5148_v61, %v1072_v0 }
 0x342   : > { %v7682_v46 = vmul.f32 0.17677669, %v1078_v9 }
 0x343   : > { %v7668_v2 = vmul.f32 0.17677669, %v1073_v1  ;;  %v5594_v5 = vpop.f32.mrb[4].mxu1 }
 0x344   : > { %v1205_v6 = vadd.f32 %v5594_v5, %v5149_v49  ;;  %v1199_v7 = vpop.f32.mrb[5].mxu1 }
 0x345   : > { %v1200_v8 = vadd.f32 %v5149_v49, %v1199_v7  ;;  %5647 = vmatmul.mubr.msk.f32.vlgmr.msra.gmra.mrb[12].mxu0 %vm1349_vm1, %v7668_v2 }
 0x346   : > { %6007 = vmatpush3.bf16.xpose.msk.msra.mxu0 %vm7654_vm2, %v6005_v62  ;;  %5653 = vmatprep.mubr.msk.f32.mxu0 %vm7039_vm0, %v7040_v48 }
 0x347   : > { %v6009_v12 = vpack.c.bf16 %v1205_v6, %v1200_v8  ;;  %6019 = vmatprep.subr.bf16.mxu0 %v7038_v25  ;;  %v7677_v13 = vpack.i.bf16 %v1205_v6, %v1200_v8 }
 0x348   : > { %v5553_v39 = vpop.f32.mrb[2].mxu0 }
 0x349   : > { %v1082_v14 = vpop.f32.mrb[3].mxu0  ;;  %6011 = vmatpush3.bf16.xpose.msk.msra.mxu1 %vm7654_vm2, %v6009_v12  ;;  %v1088_v21 = vadd.f32 %v5553_v39, %v5148_v61 }
 0x34a   : > { %v1083_v10 = vadd.f32 %v5148_v61, %v1082_v14  ;;  %6012 = vmatprep.subr.bf16.mxu1 %v7038_v25 }
 0x34b   : > { %v5597_v11 = vpop.f32.mrb[6].mxu1  ;;  %v7699_v56 = vmul.f32 0.17677669, %v1088_v21 }
 0x34c   : > { %v1215_v15 = vadd.f32 %v5597_v11, %v5149_v49  ;;  %v1209_v16 = vpop.f32.mrb[7].mxu1  ;;  %v7686_v19 = vmul.f32 0.17677669, %v1083_v10 }
 0x34d   : > { %v1210_v18 = vadd.f32 %v5149_v49, %v1209_v16  ;;  %5654 = vmatmul.mubr.msk.f32.vlgmr.msra.gmra.mrb[14].mxu0 %vm1349_vm1, %v7682_v46 }
 0x34e   : > { %5681 = vmatprep.mubr.msk.f32.mxu0 %vm7039_vm0, %v7040_v48 }
 0x34f   : > { %v6013_v20 = vpack.c.bf16 %v1215_v15, %v1210_v18  ;;  %v7690_v47 = vpack.i.bf16 %v1215_v15, %v1210_v18 }
 0x350   : > { %5661 = vmatmul.mubr.msk.f32.vlgmr.msra.gmra.mrb[8].mxu1 %vm1349_vm1, %v7686_v19 }
 0x351   : > { %6015 = vmatpush3.bf16.xpose.msk.msra.mxu1 %vm7654_vm2, %v6013_v20  ;;  %5667 = vmatprep.mubr.msk.f32.mxu1 %vm7039_vm0, %v7040_v48 }
 0x352   : > { %6016 = vmatprep.subr.bf16.mxu1 %v7038_v25 }
 0x358   : > { %5668 = vmatmul.mubr.msk.f32.vlgmr.msra.gmra.mrb[10].mxu1 %vm1349_vm1, %v7699_v56 }
 0x359   : > { %5674 = vmatprep.mubr.msk.f32.mxu1 %vm7039_vm0, %v7040_v48 }
 0x360   : > { %v5632_v26 = vpop.f32.mrb[4].mxu0 }
 0x361   : > { %v1312_v27 = vadd.f32 %v5632_v26, %v5150_v24  ;;  %v1306_v28 = vpop.f32.mrb[5].mxu0 }
 0x362   : > { %v1307_v54 = vadd.f32 %v5150_v24, %v1306_v28 }
 0x364   : > { %v5635_v30 = vpop.f32.mrb[6].mxu0  ;;  %v6017_v32 = vpack.c.bf16 %v1312_v27, %v1307_v54  ;;  %v7708_v33 = vpack.i.bf16 %v1312_v27, %v1307_v54 }
 0x365   : > { %v1322_v34 = vadd.f32 %v5635_v30, %v5150_v24  ;;  %v1316_v57 = vpop.f32.mrb[7].mxu0 }
 0x366   : > { %v1317_v3 = vadd.f32 %v5150_v24, %v1316_v57  ;;  %6018 = vmatpush3.bf16.msra.mxu1 %v6017_v32 }
 0x367   : > { %6022 = vmatprep.subr.bf16.mxu1 %v7038_v25 }
 0x368   : > { %v5638_v22 = vpop.f32.mrb[8].mxu0  ;;  %v6020_v36 = vpack.c.bf16 %v1322_v34, %v1317_v3  ;;  %v7711_v37 = vpack.i.bf16 %v1322_v34, %v1317_v3 }
 0x369   : > { %v7713_v40 = vadd.f32 %v5638_v22, %v5150_v24  ;;  %v1326_v41 = vpop.f32.mrb[9].mxu0 }
 0x36a   : > { %v7715_v4 = vadd.f32 %v5150_v24, %v1326_v41  ;;  %6021 = vmatpush3.bf16.msra.mxu0 %v6020_v36 }
 0x36b   : > { %6025 = vmatprep.subr.bf16.mxu0 %v7038_v25 }
 0x36c   : > { %v5641_v42 = vpop.f32.mrb[10].mxu0  ;;  %v6023_v43 = vpack.c.bf16 %v7713_v40, %v7715_v4  ;;  %v7722_v17 = vpack.i.bf16 %v7713_v40, %v7715_v4 }
 0x36d   : > { %v7724_v44 = vadd.f32 %v5641_v42, %v5150_v24  ;;  %v1336_v45 = vpop.f32.mrb[11].mxu0 }
 0x36e   : > { %v7726_v35 = vadd.f32 %v5150_v24, %v1336_v45 }
 0x370   : > { %v6026_v49 = vpack.c.bf16 %v7724_v44, %v7726_v35  ;;  %v7732_v50 = vpack.i.bf16 %v7724_v44, %v7726_v35 }
 0x418   : > { %v1425_v29 = vpop.f32.mrb[12].mxu0 }
 0x419   : > { %v5648_v23 = vpop.f32.mrb[13].mxu0  ;;  %v1667_v51 = vsel %vm1666_vm3, %v1425_v29, -inf }
 0x41a   : > { %1668 = vmax.xlane.f32.xlu0 %v1667_v51 }
 0x420   : > { %v1504_v53 = vpop.f32.mrb[14].mxu0 }
 0x421   : > { %v5655_v55 = vpop.f32.mrb[15].mxu0  ;;  %v1670_v59 = vsel %vm1666_vm3, %v1504_v53, -inf }
 0x422   : > { %1671 = vmax.xlane.f32.xlu1 %v1670_v59 }
 0x423   : > { %v1583_v60 = vpop.f32.mrb[8].mxu1 }
 0x424   : > { %v5662_v31 = vpop.f32.mrb[9].mxu1  ;;  %v1673_v61 = vsel %vm1666_vm3, %v1583_v60, -inf }
 0x425   : > { %1674 = vmax.xlane.f32.xlu0 %v1673_v61 }
 0x42b   : > { %v1662_v62 = vpop.f32.mrb[10].mxu1 }
 0x42c   : > { %v5669_v38 = vpop.f32.mrb[11].mxu1  ;;  %v1676_v0 = vsel %vm1666_vm3, %v1662_v62, -inf }
 0x42d   : > { %1677 = vmax.xlane.f32.xlu1 %v1676_v0 }
 0x4a7   : > { %v1669_v1 = vpop.xlane.xlu0 %1668 }
 0x4a8   : > { %v1679_v5 = vsub.f32 %v1425_v29, %v1669_v1 }
 0x4aa   : > { %v1683_v6 = vmul.f32 1.442695, %v1679_v5 }
 0x4ac   : > { %6570 = vpow2.f32 %v1683_v6 }
 0x4af   : > { %v1672_v7 = vpop.xlane.xlu1 %1671 }
 0x4b0   : > { %v1680_v8 = vsub.f32 %v1504_v53, %v1672_v7 }
 0x4b2   : > { %v1685_v9 = vmul.f32 1.442695, %v1680_v8  ;;  %v1675_v12 = vpop.xlane.xlu0 %1674 }
 0x4b3   : > { %v1681_v39 = vsub.f32 %v1583_v60, %v1675_v12 }
 0x4b4   : > { %6572 = vpow2.f32 %v1685_v9 }
 0x4b5   : > { %v1687_v14 = vmul.f32 1.442695, %v1681_v39 }
 0x4b6   : > { %v6571_v10 = vpop.eup %6570 }
 0x4b7   : > { %6574 = vpow2.f32 %v1687_v14  ;;  %v1691_v11 = vsel %vm1666_vm3, %v6571_v10, 0.0 }
 0x4b8   : > { %1692 = vadd.xlane.f32.xlu0 %v1691_v11 }
 0x4ba   : > { %v1678_v21 = vpop.xlane.xlu1 %1677 }
 0x4bb   : > { %v1682_v24 = vsub.f32 %v1662_v62, %v1678_v21 }
 0x4bd   : > { %v1689_v26 = vmul.f32 1.442695, %v1682_v24 }
 0x4be   : > { %v6573_v15 = vpop.eup %6572 }
 0x4bf   : > { %v1694_v16 = vsel %vm1666_vm3, %v6573_v15, 0.0  ;;  %6576 = vpow2.f32 %v1689_v26 }
 0x4c0   : > { %1695 = vadd.xlane.f32.xlu1 %v1694_v16 }
 0x4c1   : > { %v6575_v18 = vpop.eup %6574 }
 0x4c2   : > { %v1697_v20 = vsel %vm1666_vm3, %v6575_v18, 0.0 }
 0x4c3   : > { %1698 = vadd.xlane.f32.xlu0 %v1697_v20 }
 0x4c9   : > { %v6577_v27 = vpop.eup %6576 }
 0x4ca   : > { %v1700_v28 = vsel %vm1666_vm3, %v6577_v27, 0.0 }
 0x4d1   : > { %6402 = vrot.lane.b32.xlu1 %v7666_v63, %s7041_s13 }
 0x4d5   : > { %2003 = vrot.lane.b32.xlu1 %v7668_v2, %s7041_s13 }
 0x4d9   : > { %6407 = vrot.lane.b32.xlu1 %v7677_v13, %s7041_s13  ;;  %6397 = vrot.lane.b32.xlu0 %v7658_v58, %s7041_s13 }
 0x4dd   : > { %2085 = vrot.lane.b32.xlu0 %v7682_v46, %s7041_s13 }
 0x4e1   : > { %2167 = vrot.lane.b32.xlu0 %v7686_v19, %s7041_s13 }
 0x4fd   : > { %1701 = vadd.xlane.f32.xlu1 %v1700_v28 }
 0x50e   : > { %6412 = vrot.lane.b32.xlu1 %v7690_v47, %s7041_s13 }
 0x512   : > { %2249 = vrot.lane.b32.xlu1 %v7699_v56, %s7041_s13 }
 0x545   : > { %v1693_v54 = vpop.xlane.xlu0 %1692 }
 0x546   : > { %6578 = vrcp.f32 %v1693_v54 }
 0x54d   : > { %v1696_v30 = vpop.xlane.xlu1 %1695 }
 0x54e   : > { %6580 = vrcp.f32 %v1696_v30 }
 0x550   : > { %v6579_v32 = vpop.eup %6578  ;;  %v1699_v34 = vpop.xlane.xlu0 %1698 }
 0x551   : > { %v1707_v57 = vmul.f32 %v6579_v32, %v6571_v10  ;;  %6582 = vrcp.f32 %v1699_v34  ;;  %v6403_v3 = vpop.permute.xlu1 %6402 }
 0x552   : > { %v6405_v59 = vunpack.i.h.bf16 %v6403_v3  ;;  %v6404_v60 = vunpack.i.l.bf16 %v6403_v3 }
 0x553   : > { %5675 = vmatmul.mubr.msk.f32.vlgmr.msra.gmra.mrb[12].mxu1 %vm1666_vm3, %v1707_v57 }
 0x554   : > { %6024 = vmatpush3.bf16.msra.mxu1 %v6023_v43  ;;  %5688 = vmatprep.mubr.msk.f32.mxu1 %vm7039_vm0, %v7040_v48  ;;  %v6398_v22 = vpop.permute.xlu0 %6397  ;;  %v6033_v62 = vpack.c.bf16 %v6405_v59, %v6404_v60 }
 0x555   : > { %6028 = vmatprep.subr.bf16.mxu1 %v7038_v25  ;;  %v2004_v41 = vpop.permute.xlu1 %2003  ;;  %v6400_v45 = vunpack.i.h.bf16 %v6398_v22  ;;  %v6399_v29 = vunpack.i.l.bf16 %v6398_v22 }
 0x557   : > { %v6029_v40 = vpack.c.bf16 %v6400_v45, %v6399_v29 }
 0x558   : > { %v6581_v36 = vpop.eup %6580 }
 0x559   : > { %v1708_v42 = vmul.f32 %v6581_v36, %v6573_v15  ;;  %v6408_v4 = vpop.permute.xlu1 %6407 }
 0x55a   : > { %v6410_v43 = vunpack.i.h.bf16 %v6408_v4  ;;  %v6409_v44 = vunpack.i.l.bf16 %v6408_v4 }
 0x55b   : > { %v6583_v23 = vpop.eup %6582  ;;  %5682 = vmatmul.mubr.msk.f32.vlgmr.msra.gmra.mrb[16].mxu0 %vm1666_vm3, %v1708_v42 }
 0x55c   : > { %v1709_v51 = vmul.f32 %v6583_v23, %v6575_v18  ;;  %6027 = vmatpush3.bf16.msra.mxu0 %v6026_v49  ;;  %5695 = vmatprep.mubr.msk.f32.mxu0 %vm7039_vm0, %v7040_v48  ;;  %v6037_v35 = vpack.c.bf16 %v6410_v43, %v6409_v44  ;;  %v2086_v49 = vpop.permute.xlu0 %2085 }
 0x55d   : > { %6032 = vmatprep.subr.bf16.mxu0 %v7038_v25 }
 0x55e   : > { %5689 = vmatmul.mubr.msk.f32.vlgmr.msra.gmra.mrb[14].mxu1 %vm1666_vm3, %v1709_v51 }
 0x55f   : > { %6031 = vmatpush3.bf16.xpose.msk.msra.mxu1 %vm7654_vm2, %v6029_v40  ;;  %5702 = vmatprep.mubr.msk.f32.mxu1 %vm7039_vm0, %v7040_v48 }
 0x560   : > { %6036 = vmatprep.subr.bf16.mxu1 %v7038_v25  ;;  %v2168_v53 = vpop.permute.xlu0 %2167 }
 0x566   : > { %5703 = vmatmul.mubr.msk.f32.vlgmr.msra.gmra.mrb[16].mxu1 %vm1349_vm1, %v2004_v41 }
 0x567   : > { %6039 = vmatpush3.bf16.xpose.msk.msra.mxu1 %vm7654_vm2, %v6037_v35  ;;  %5716 = vmatprep.mubr.msk.f32.mxu1 %vm7039_vm0, %v7040_v48 }
 0x568   : > { %6044 = vmatprep.subr.bf16.mxu1 %v7038_v25 }
 0x56e   : > { %5717 = vmatmul.mubr.msk.f32.vlgmr.msra.gmra.mrb[18].mxu1 %vm1349_vm1, %v2168_v53 }
 0x56f   : > { %5730 = vmatprep.mubr.msk.f32.mxu1 %vm7039_vm0, %v7040_v48 }
 0x58a   : > { %v1702_v55 = vpop.xlane.xlu1 %1701 }
 0x58b   : > { %6584 = vrcp.f32 %v1702_v55 }
 0x58e   : > { %v6413_v38 = vpop.permute.xlu1 %6412 }
 0x58f   : > { %v6415_v0 = vunpack.i.h.bf16 %v6413_v38  ;;  %v6414_v1 = vunpack.i.l.bf16 %v6413_v38 }
 0x591   : > { %v6041_v5 = vpack.c.bf16 %v6415_v0, %v6414_v1 }
 0x592   : > { %v2250_v6 = vpop.permute.xlu1 %2249 }
 0x595   : > { %v6585_v31 = vpop.eup %6584 }
 0x596   : > { %v1710_v61 = vmul.f32 %v6585_v31, %v6577_v27 }
 0x598   : > { %5696 = vmatmul.mubr.msk.f32.vlgmr.msra.gmra.mrb[18].mxu0 %vm1666_vm3, %v1710_v61 }
 0x599   : > { %6035 = vmatpush3.bf16.xpose.msk.msra.mxu0 %vm7654_vm2, %v6033_v62  ;;  %5709 = vmatprep.mubr.msk.f32.mxu0 %vm7039_vm0, %v7040_v48 }
 0x59a   : > { %6040 = vmatprep.subr.bf16.mxu0 %v7038_v25 }
 0x5a0   : > { %5710 = vmatmul.mubr.msk.f32.vlgmr.msra.gmra.mrb[20].mxu0 %vm1349_vm1, %v2086_v49 }
 0x5a1   : > { %6043 = vmatpush3.bf16.xpose.msk.msra.mxu0 %vm7654_vm2, %v6041_v5  ;;  %5723 = vmatprep.mubr.msk.f32.mxu0 %vm7039_vm0, %v7040_v48 }
 0x5a2   : > { %6047 = vmatprep.subr.bf16.mxu0 %v7038_v25 }
 0x5a8   : > { %5724 = vmatmul.mubr.msk.f32.vlgmr.msra.gmra.mrb[22].mxu0 %vm1349_vm1, %v2250_v6 }
 0x5a9   : > { %5737 = vmatprep.mubr.msk.f32.mxu0 %vm7039_vm0, %v7040_v48 }
 0x626   : > { %v7802_v7 = vpop.f32.mrb[12].mxu1 }
 0x627   : > { %v5676_v8 = vpop.f32.mrb[13].mxu1 }
 0x62e   : > { %v7804_v9 = vpop.f32.mrb[16].mxu0 }
 0x62f   : > { %v5683_v12 = vpop.f32.mrb[17].mxu0 }
 0x631   : > { %v7806_v39 = vpop.f32.mrb[14].mxu1 }
 0x632   : > { %v5690_v14 = vpop.f32.mrb[15].mxu1 }
 0x639   : > { %v2081_v10 = vpop.f32.mrb[16].mxu1 }
 0x63a   : > { %v5704_v11 = vpop.f32.mrb[17].mxu1  ;;  %v2331_v15 = vsel %vm1666_vm3, %v2081_v10, -inf }
 0x63b   : > { %2332 = vmax.xlane.f32.xlu0 %v2331_v15 }
 0x641   : > { %v2245_v16 = vpop.f32.mrb[18].mxu1 }
 0x642   : > { %v5718_v18 = vpop.f32.mrb[19].mxu1  ;;  %v2337_v20 = vsel %vm1666_vm3, %v2245_v16, -inf }
 0x643   : > { %2338 = vmax.xlane.f32.xlu0 %v2337_v20 }
 0x66b   : > { %v7810_v21 = vpop.f32.mrb[18].mxu0 }
 0x66c   : > { %v5697_v24 = vpop.f32.mrb[19].mxu0 }
 0x673   : > { %v2163_v26 = vpop.f32.mrb[20].mxu0 }
 0x674   : > { %v5711_v27 = vpop.f32.mrb[21].mxu0  ;;  %v2334_v28 = vsel %vm1666_vm3, %v2163_v26, -inf }
 0x675   : > { %2335 = vmax.xlane.f32.xlu1 %v2334_v28 }
 0x67b   : > { %v2327_v54 = vpop.f32.mrb[22].mxu0 }
 0x67c   : > { %v5725_v30 = vpop.f32.mrb[23].mxu0  ;;  %v2340_v32 = vsel %vm1666_vm3, %v2327_v54, -inf }
 0x67d   : > { %2341 = vmax.xlane.f32.xlu0 %v2340_v32 }
 0x686   : > { %6422 = vrot.lane.b32.xlu1 %v7711_v37, %s7041_s13 }
 0x68a   : > { %6427 = vrot.lane.b32.xlu1 %v7722_v17, %s7041_s13 }
 0x68e   : > { %6432 = vrot.lane.b32.xlu1 %v7732_v50, %s7041_s13 }
 0x692   : > { %6442 = vrot.lane.b32.xlu1 %v7666_v63, %s7042_s5 }
 0x693   : > { %6417 = vrot.lane.b32.xlu0 %v7708_v33, %s7041_s13 }
 0x6c8   : > { %v2333_v34 = vpop.xlane.xlu0 %2332 }
 0x6c9   : > { %v2343_v57 = vsub.f32 %v2081_v10, %v2333_v34 }
 0x6cb   : > { %v2347_v3 = vmul.f32 1.442695, %v2343_v57 }
 0x6cd   : > { %6586 = vpow2.f32 %v2347_v3 }
 0x6d0   : > { %v2339_v41 = vpop.xlane.xlu0 %2338 }
 0x6d1   : > { %v2345_v42 = vsub.f32 %v2245_v16, %v2339_v41 }
 0x6d3   : > { %v2351_v45 = vmul.f32 1.442695, %v2345_v42 }
 0x6d5   : > { %6588 = vpow2.f32 %v2351_v45 }
 0x6d7   : > { %v6587_v22 = vpop.eup %6586 }
 0x6d8   : > { %v2355_v36 = vsel %vm1666_vm3, %v6587_v22, 0.0 }
 0x6d9   : > { %2356 = vadd.xlane.f32.xlu0 %v2355_v36 }
 0x6df   : > { %v6589_v35 = vpop.eup %6588 }
 0x6e0   : > { %v2361_v53 = vsel %vm1666_vm3, %v6589_v35, 0.0 }
 0x6ef   : > { %6437 = vrot.lane.b32.xlu0 %v7658_v58, %s7042_s5 }
 0x702   : > { %v2336_v29 = vpop.xlane.xlu1 %2335 }
 0x703   : > { %v2344_v23 = vsub.f32 %v2163_v26, %v2336_v29 }
 0x705   : > { %v2349_v51 = vmul.f32 1.442695, %v2344_v23 }
 0x706   : > { %v6423_v40 = vpop.permute.xlu1 %6422 }
 0x707   : > { %6590 = vpow2.f32 %v2349_v51  ;;  %v6425_v4 = vunpack.i.h.bf16 %v6423_v40  ;;  %v6424_v43 = vunpack.i.l.bf16 %v6423_v40 }
 0x709   : > { %v6048_v44 = vpack.c.bf16 %v6425_v4, %v6424_v43 }
 0x70a   : > { %v2342_v49 = vpop.xlane.xlu0 %2341  ;;  %v6428_v8 = vpop.permute.xlu1 %6427 }
 0x70b   : > { %6049 = vmatpush3.bf16.msra.mxu0 %v6048_v44  ;;  %v2346_v38 = vsub.f32 %v2327_v54, %v2342_v49  ;;  %v6430_v12 = vunpack.i.h.bf16 %v6428_v8  ;;  %v6429_v14 = vunpack.i.l.bf16 %v6428_v8 }
 0x70c   : > { %6053 = vmatprep.subr.bf16.mxu0 %v7038_v25 }
 0x70d   : > { %v2353_v0 = vmul.f32 1.442695, %v2346_v38  ;;  %v6051_v15 = vpack.c.bf16 %v6430_v12, %v6429_v14 }
 0x70e   : > { %v6418_v55 = vpop.permute.xlu0 %6417  ;;  %2362 = vadd.xlane.f32.xlu0 %v2361_v53  ;;  %v6433_v16 = vpop.permute.xlu1 %6432 }
 0x70f   : > { %v6420_v59 = vunpack.i.h.bf16 %v6418_v55  ;;  %v6419_v60 = vunpack.i.l.bf16 %v6418_v55  ;;  %6592 = vpow2.f32 %v2353_v0  ;;  %v6435_v34 = vunpack.i.h.bf16 %v6433_v16 }
 0x710   : > { %v6434_v57 = vunpack.i.l.bf16 %v6433_v16 }
 0x711   : > { %v6591_v31 = vpop.eup %6590  ;;  %v6045_v61 = vpack.c.bf16 %v6420_v59, %v6419_v60 }
 0x712   : > { %v2358_v62 = vsel %vm1666_vm3, %v6591_v31, 0.0  ;;  %v6443_v24 = vpop.permute.xlu1 %6442  ;;  %v6054_v29 = vpack.c.bf16 %v6435_v34, %v6434_v57 }
 0x713   : > { %2359 = vadd.xlane.f32.xlu1 %v2358_v62  ;;  %6046 = vmatpush3.bf16.msra.mxu1 %v6045_v61  ;;  %v6445_v43 = vunpack.i.h.bf16 %v6443_v24  ;;  %v6444_v44 = vunpack.i.l.bf16 %v6443_v24 }
 0x714   : > { %6050 = vmatprep.subr.bf16.mxu1 %v7038_v25 }
 0x715   : > { %v6061_v53 = vpack.c.bf16 %v6445_v43, %v6444_v44 }
 0x719   : > { %v6593_v1 = vpop.eup %6592 }
 0x71a   : > { %v2364_v5 = vsel %vm1666_vm3, %v6593_v1, 0.0 }
 0x724   : > { %6447 = vrot.lane.b32.xlu1 %v7677_v13, %s7042_s5  ;;  %2699 = vrot.lane.b32.xlu0 %v7668_v2, %s7042_s5 }
 0x728   : > { %2781 = vrot.lane.b32.xlu0 %v7682_v46, %s7042_s5 }
 0x72c   : > { %2863 = vrot.lane.b32.xlu0 %v7686_v19, %s7042_s5 }
 0x748   : > { %2365 = vadd.xlane.f32.xlu1 %v2364_v5 }
 0x759   : > { %6452 = vrot.lane.b32.xlu1 %v7690_v47, %s7042_s5 }
 0x75d   : > { %2945 = vrot.lane.b32.xlu1 %v7699_v56, %s7042_s5 }
 0x766   : > { %v2357_v6 = vpop.xlane.xlu0 %2356 }
 0x767   : > { %6594 = vrcp.f32 %v2357_v6 }
 0x76a   : > { %v6438_v18 = vpop.permute.xlu0 %6437 }
 0x76b   : > { %v6440_v27 = vunpack.i.h.bf16 %v6438_v18  ;;  %v6439_v28 = vunpack.i.l.bf16 %v6438_v18 }
 0x76d   : > { %v6057_v32 = vpack.c.bf16 %v6440_v27, %v6439_v28 }
 0x771   : > { %v6595_v10 = vpop.eup %6594 }
 0x772   : > { %v2371_v11 = vmul.f32 %v6595_v10, %v6587_v22 }
 0x774   : > { %5731 = vmatmul.mubr.msk.f32.vlgmr.msra.gmra.mrb[20].mxu1 %vm1666_vm3, %v2371_v11 }
 0x775   : > { %6052 = vmatpush3.bf16.msra.mxu1 %v6051_v15  ;;  %5744 = vmatprep.mubr.msk.f32.mxu1 %vm7039_vm0, %v7040_v48 }
 0x776   : > { %6056 = vmatprep.subr.bf16.mxu1 %v7038_v25 }
 0x79b   : > { %v2363_v20 = vpop.xlane.xlu0 %2362 }
 0x79c   : > { %6596 = vrcp.f32 %v2363_v20 }
 0x79f   : > { %v2700_v41 = vpop.permute.xlu0 %2699 }
 0x7a0   : > { %v2360_v26 = vpop.xlane.xlu1 %2359 }
 0x7a1   : > { %6598 = vrcp.f32 %v2360_v26 }
 0x7a3   : > { %v2782_v51 = vpop.permute.xlu0 %2781 }
 0x7a4   : > { %v6448_v3 = vpop.permute.xlu1 %6447 }
 0x7a5   : > { %v6450_v42 = vunpack.i.h.bf16 %v6448_v3  ;;  %v6449_v45 = vunpack.i.l.bf16 %v6448_v3 }
 0x7a6   : > { %v6597_v54 = vpop.eup %6596 }
 0x7a7   : > { %v2373_v30 = vmul.f32 %v6597_v54, %v6589_v35  ;;  %v6065_v23 = vpack.c.bf16 %v6450_v42, %v6449_v45  ;;  %v2864_v40 = vpop.permute.xlu0 %2863 }
 0x7a9   : > { %5745 = vmatmul.mubr.msk.f32.vlgmr.msra.gmra.mrb[22].mxu1 %vm1666_vm3, %v2373_v30 }
 0x7aa   : > { %6059 = vmatpush3.bf16.xpose.msk.msra.mxu1 %vm7654_vm2, %v6057_v32  ;;  %5758 = vmatprep.mubr.msk.f32.mxu1 %vm7039_vm0, %v7040_v48 }
 0x7ab   : > { %v6599_v22 = vpop.eup %6598  ;;  %6064 = vmatprep.subr.bf16.mxu1 %v7038_v25 }
 0x7ac   : > { %v2372_v36 = vmul.f32 %v6599_v22, %v6591_v31 }
 0x7ae   : > { %5738 = vmatmul.mubr.msk.f32.vlgmr.msra.gmra.mrb[24].mxu0 %vm1666_vm3, %v2372_v36 }
 0x7af   : > { %6055 = vmatpush3.bf16.msra.mxu0 %v6054_v29  ;;  %5751 = vmatprep.mubr.msk.f32.mxu0 %vm7039_vm0, %v7040_v48 }
 0x7b0   : > { %6060 = vmatprep.subr.bf16.mxu0 %v7038_v25 }
 0x7b1   : > { %5759 = vmatmul.mubr.msk.f32.vlgmr.msra.gmra.mrb[24].mxu1 %vm1349_vm1, %v2700_v41 }
 0x7b2   : > { %6067 = vmatpush3.bf16.xpose.msk.msra.mxu1 %vm7654_vm2, %v6065_v23  ;;  %5772 = vmatprep.mubr.msk.f32.mxu1 %vm7039_vm0, %v7040_v48 }
 0x7b3   : > { %6072 = vmatprep.subr.bf16.mxu1 %v7038_v25 }
 0x7b9   : > { %5773 = vmatmul.mubr.msk.f32.vlgmr.msra.gmra.mrb[26].mxu1 %vm1349_vm1, %v2864_v40 }
 0x7ba   : > { %5786 = vmatprep.mubr.msk.f32.mxu1 %vm7039_vm0, %v7040_v48 }
 0x7d5   : > { %v2366_v4 = vpop.xlane.xlu1 %2365 }
 0x7d6   : > { %6600 = vrcp.f32 %v2366_v4 }
 0x7d9   : > { %v6453_v55 = vpop.permute.xlu1 %6452 }
 0x7da   : > { %v6455_v59 = vunpack.i.h.bf16 %v6453_v55  ;;  %v6454_v60 = vunpack.i.l.bf16 %v6453_v55 }
 0x7dc   : > { %v6069_v31 = vpack.c.bf16 %v6455_v59, %v6454_v60 }
 0x7dd   : > { %v2946_v61 = vpop.permute.xlu1 %2945 }
 0x7e0   : > { %v6601_v35 = vpop.eup %6600 }
 0x7e1   : > { %v2374_v49 = vmul.f32 %v6601_v35, %v6593_v1 }
 0x7e3   : > { %5752 = vmatmul.mubr.msk.f32.vlgmr.msra.gmra.mrb[26].mxu0 %vm1666_vm3, %v2374_v49 }
 0x7e4   : > { %6063 = vmatpush3.bf16.xpose.msk.msra.mxu0 %vm7654_vm2, %v6061_v53  ;;  %5765 = vmatprep.mubr.msk.f32.mxu0 %vm7039_vm0, %v7040_v48 }
 0x7e5   : > { %6068 = vmatprep.subr.bf16.mxu0 %v7038_v25 }
 0x7eb   : > { %5766 = vmatmul.mubr.msk.f32.vlgmr.msra.gmra.mrb[28].mxu0 %vm1349_vm1, %v2782_v51 }
 0x7ec   : > { %6071 = vmatpush3.bf16.xpose.msk.msra.mxu0 %vm7654_vm2, %v6069_v31  ;;  %5779 = vmatprep.mubr.msk.f32.mxu0 %vm7039_vm0, %v7040_v48 }
 0x7ed   : > { %6075 = vmatprep.subr.bf16.mxu0 %v7038_v25 }
 0x7f3   : > { %5780 = vmatmul.mubr.msk.f32.vlgmr.msra.gmra.mrb[30].mxu0 %vm1349_vm1, %v2946_v61 }
 0x7f4   : > { %5793 = vmatprep.mubr.msk.f32.mxu0 %vm7039_vm0, %v7040_v48 }
 0x847   : > { %v7882_v62 = vpop.f32.mrb[20].mxu1 }
 0x848   : > { %v5732_v38 = vpop.f32.mrb[21].mxu1 }
 0x87c   : > { %v7884_v0 = vpop.f32.mrb[22].mxu1 }
 0x87d   : > { %v5746_v1 = vpop.f32.mrb[23].mxu1 }
 0x881   : > { %v7886_v5 = vpop.f32.mrb[24].mxu0 }
 0x882   : > { %v6516_v6 = vpack.i.bf16 %v7886_v5, %v7882_v62  ;;  %v5739_v8 = vpop.f32.mrb[25].mxu0 }
 0x884   : > { %v2777_v12 = vpop.f32.mrb[24].mxu1 }
 0x885   : > { %v5760_v14 = vpop.f32.mrb[25].mxu1  ;;  %v3027_v10 = vsel %vm1666_vm3, %v2777_v12, -inf }
 0x886   : > { %3028 = vmax.xlane.f32.xlu0 %v3027_v10 }
 0x88c   : > { %v2941_v11 = vpop.f32.mrb[26].mxu1 }
 0x88d   : > { %v5774_v15 = vpop.f32.mrb[27].mxu1  ;;  %v3033_v16 = vsel %vm1666_vm3, %v2941_v11, -inf }
 0x88e   : > { %3034 = vmax.xlane.f32.xlu0 %v3033_v16 }
 0x8b6   : > { %v7892_v18 = vpop.f32.mrb[26].mxu0 }
 0x8b7   : > { %v6531_v20 = vpack.i.bf16 %v7892_v18, %v7884_v0  ;;  %v5753_v24 = vpop.f32.mrb[27].mxu0 }
 0x8be   : > { %v2859_v26 = vpop.f32.mrb[28].mxu0 }
 0x8bf   : > { %v5767_v27 = vpop.f32.mrb[29].mxu0  ;;  %v3030_v28 = vsel %vm1666_vm3, %v2859_v26, -inf }
 0x8c0   : > { %3031 = vmax.xlane.f32.xlu1 %v3030_v28 }
 0x8c6   : > { %v3023_v54 = vpop.f32.mrb[30].mxu0 }
 0x8c7   : > { %v5781_v30 = vpop.f32.mrb[31].mxu0  ;;  %v3036_v32 = vsel %vm1666_vm3, %v3023_v54, -inf }
 0x8c8   : > { %3037 = vmax.xlane.f32.xlu0 %v3036_v32 }
 0x8d1   : > { %6462 = vrot.lane.b32.xlu1 %v7711_v37, %s7042_s5 }
 0x8d5   : > { %6467 = vrot.lane.b32.xlu1 %v7722_v17, %s7042_s5 }
 0x8d9   : > { %6472 = vrot.lane.b32.xlu1 %v7732_v50, %s7042_s5 }
 0x8dd   : > { %6482 = vrot.lane.b32.xlu1 %v7666_v63, %s7043_s21 }
 0x8de   : > { %6457 = vrot.lane.b32.xlu0 %v7708_v33, %s7042_s5 }
 0x913   : > { %v3029_v34 = vpop.xlane.xlu0 %3028 }
 0x914   : > { %v3039_v57 = vsub.f32 %v2777_v12, %v3029_v34 }
 0x916   : > { %v3043_v3 = vmul.f32 1.442695, %v3039_v57 }
 0x918   : > { %6602 = vpow2.f32 %v3043_v3 }
 0x91b   : > { %v3035_v41 = vpop.xlane.xlu0 %3034 }
 0x91c   : > { %v3041_v42 = vsub.f32 %v2941_v11, %v3035_v41 }
 0x91e   : > { %v3047_v45 = vmul.f32 1.442695, %v3041_v42 }
 0x920   : > { %6604 = vpow2.f32 %v3047_v45 }
 0x922   : > { %v6603_v22 = vpop.eup %6602 }
 0x923   : > { %v3051_v36 = vsel %vm1666_vm3, %v6603_v22, 0.0 }
 0x924   : > { %3052 = vadd.xlane.f32.xlu0 %v3051_v36 }
 0x92a   : > { %v6605_v44 = vpop.eup %6604 }
 0x92b   : > { %v3057_v49 = vsel %vm1666_vm3, %v6605_v44, 0.0 }
 0x93a   : > { %6477 = vrot.lane.b32.xlu0 %v7658_v58, %s7043_s21 }
 0x94d   : > { %v3032_v29 = vpop.xlane.xlu1 %3031 }
 0x94e   : > { %v3040_v63 = vsub.f32 %v2859_v26, %v3032_v29 }
 0x950   : > { %v3045_v23 = vmul.f32 1.442695, %v3040_v63 }
 0x951   : > { %v6463_v51 = vpop.permute.xlu1 %6462 }
 0x952   : > { %6606 = vpow2.f32 %v3045_v23  ;;  %v6465_v40 = vunpack.i.h.bf16 %v6463_v51  ;;  %v6464_v4 = vunpack.i.l.bf16 %v6463_v51 }
 0x954   : > { %v6076_v43 = vpack.c.bf16 %v6465_v40, %v6464_v4 }
 0x955   : > { %v3038_v35 = vpop.xlane.xlu0 %3037 }
 0x956   : > { %6077 = vmatpush3.bf16.msra.mxu0 %v6076_v43  ;;  %v3042_v61 = vsub.f32 %v3023_v54, %v3038_v35 }
 0x957   : > { %6081 = vmatprep.subr.bf16.mxu0 %v7038_v25 }
 0x958   : > { %v3049_v38 = vmul.f32 1.442695, %v3042_v61 }
 0x959   : > { %v6458_v58 = vpop.permute.xlu0 %6457  ;;  %3058 = vadd.xlane.f32.xlu0 %v3057_v49 }
 0x95a   : > { %v6460_v53 = vunpack.i.h.bf16 %v6458_v58  ;;  %v6459_v55 = vunpack.i.l.bf16 %v6458_v58  ;;  %6608 = vpow2.f32 %v3049_v38 }
 0x95c   : > { %v6607_v59 = vpop.eup %6606  ;;  %v6073_v60 = vpack.c.bf16 %v6460_v53, %v6459_v55 }
 0x95d   : > { %v3054_v31 = vsel %vm1666_vm3, %v6607_v59, 0.0 }
 0x95e   : > { %3055 = vadd.xlane.f32.xlu1 %v3054_v31  ;;  %6074 = vmatpush3.bf16.msra.mxu1 %v6073_v60 }
 0x95f   : > { %6078 = vmatprep.subr.bf16.mxu1 %v7038_v25 }
 0x964   : > { %v6609_v1 = vpop.eup %6608 }
 0x965   : > { %v3060_v8 = vsel %vm1666_vm3, %v6609_v1, 0.0 }
 0x96f   : > { %3387 = vrot.lane.b32.xlu1 %v7668_v2, %s7043_s21  ;;  %6487 = vrot.lane.b32.xlu0 %v7677_v13, %s7043_s21  ;;  %v6468_v13 = vpop.permute.xlu1 %6467 }
 0x970   : > { %v6469_v12 = vunpack.i.l.bf16 %v6468_v13 }
 0x973   : > { %6492 = vrot.lane.b32.xlu0 %v7690_v47, %s7043_s21  ;;  %v6470_v47 = vunpack.i.h.bf16 %v6468_v13 }
 0x975   : > { %v6079_v10 = vpack.c.bf16 %v6470_v47, %v6469_v12 }
 0x977   : > { %3551 = vrot.lane.b32.xlu0 %v7686_v19, %s7043_s21 }
 0x993   : > { %3061 = vadd.xlane.f32.xlu1 %v3060_v8 }
 0x9a4   : > { %3469 = vrot.lane.b32.xlu1 %v7682_v46, %s7043_s21  ;;  %v6473_v46 = vpop.permute.xlu1 %6472 }
 0x9a5   : > { %v6475_v30 = vunpack.i.h.bf16 %v6473_v46  ;;  %v6474_v32 = vunpack.i.l.bf16 %v6473_v46 }
 0x9a7   : > { %v6082_v41 = vpack.c.bf16 %v6475_v30, %v6474_v32 }
 0x9a8   : > { %3633 = vrot.lane.b32.xlu1 %v7699_v56, %s7043_s21  ;;  %v6483_v56 = vpop.permute.xlu1 %6482 }
 0x9a9   : > { %v6485_v51 = vunpack.i.h.bf16 %v6483_v56  ;;  %v6484_v40 = vunpack.i.l.bf16 %v6483_v56 }
 0x9b1   : > { %v3053_v2 = vpop.xlane.xlu0 %3052 }
 0x9b2   : > { %6610 = vrcp.f32 %v3053_v2 }
 0x9b5   : > { %v6478_v11 = vpop.permute.xlu0 %6477 }
 0x9b6   : > { %v6480_v24 = vunpack.i.h.bf16 %v6478_v11  ;;  %v6479_v26 = vunpack.i.l.bf16 %v6478_v11 }
 0x9b8   : > { %v6085_v54 = vpack.c.bf16 %v6480_v24, %v6479_v26 }
 0x9bc   : > { %v6611_v14 = vpop.eup %6610 }
 0x9bd   : > { %v3067_v19 = vmul.f32 %v6611_v14, %v6603_v22 }
 0x9bf   : > { %5787 = vmatmul.mubr.msk.f32.vlgmr.msra.gmra.mrb[28].mxu1 %vm1666_vm3, %v3067_v19 }
 0x9c0   : > { %6080 = vmatpush3.bf16.msra.mxu1 %v6079_v10  ;;  %5800 = vmatprep.mubr.msk.f32.mxu1 %vm7039_vm0, %v7040_v48 }
 0x9c1   : > { %6084 = vmatprep.subr.bf16.mxu1 %v7038_v25 }
 0x9e6   : > { %v3059_v15 = vpop.xlane.xlu0 %3058 }
 0x9e7   : > { %6612 = vrcp.f32 %v3059_v15 }
 0x9ea   : > { %v6488_v34 = vpop.permute.xlu0 %6487 }
 0x9eb   : > { %v3056_v16 = vpop.xlane.xlu1 %3055  ;;  %v6490_v22 = vunpack.i.h.bf16 %v6488_v34  ;;  %v6489_v36 = vunpack.i.l.bf16 %v6488_v34 }
 0x9ec   : > { %6614 = vrcp.f32 %v3056_v16 }
 0x9ed   : > { %v6093_v42 = vpack.c.bf16 %v6490_v22, %v6489_v36 }
 0x9ee   : > { %v6493_v29 = vpop.permute.xlu0 %6492 }
 0x9ef   : > { %v3388_v45 = vpop.permute.xlu1 %3387  ;;  %v6495_v35 = vunpack.i.h.bf16 %v6493_v29  ;;  %v6494_v49 = vunpack.i.l.bf16 %v6493_v29 }
 0x9f1   : > { %v6613_v27 = vpop.eup %6612  ;;  %v6097_v58 = vpack.c.bf16 %v6495_v35, %v6494_v49 }
 0x9f2   : > { %v3069_v28 = vmul.f32 %v6613_v27, %v6605_v44  ;;  %v3552_v63 = vpop.permute.xlu0 %3551  ;;  %v6089_v44 = vpack.c.bf16 %v6485_v51, %v6484_v40 }
 0x9f4   : > { %5801 = vmatmul.mubr.msk.f32.vlgmr.msra.gmra.mrb[30].mxu1 %vm1666_vm3, %v3069_v28 }
 0x9f5   : > { %6087 = vmatpush3.bf16.xpose.msk.msra.mxu1 %vm7654_vm2, %v6085_v54  ;;  %5814 = vmatprep.mubr.msk.f32.mxu1 %vm7039_vm0, %v7040_v48 }
 0x9f6   : > { %v6615_v57 = vpop.eup %6614  ;;  %6092 = vmatprep.subr.bf16.mxu1 %v7038_v25 }
 0x9f7   : > { %v3068_v3 = vmul.f32 %v6615_v57, %v6607_v59 }
 0x9f9   : > { %5794 = vmatmul.mubr.msk.f32.vlgmr.msra.gmra.mrb[32].mxu0 %vm1666_vm3, %v3068_v3 }
 0x9fa   : > { %6083 = vmatpush3.bf16.msra.mxu0 %v6082_v41  ;;  %5807 = vmatprep.mubr.msk.f32.mxu0 %vm7039_vm0, %v7040_v48 }
 0x9fb   : > { %6088 = vmatprep.subr.bf16.mxu0 %v7038_v25 }
 0x9fc   : > { %5815 = vmatmul.mubr.msk.f32.vlgmr.msra.gmra.mrb[32].mxu1 %vm1349_vm1, %v3388_v45 }
 0x9fd   : > { %6095 = vmatpush3.bf16.xpose.msk.msra.mxu1 %vm7654_vm2, %v6093_v42  ;;  %5828 = vmatprep.mubr.msk.f32.mxu1 %vm7039_vm0, %v7040_v48 }
 0x9fe   : > { %6100 = vmatprep.subr.bf16.mxu1 %v7038_v25 }
 0xa04   : > { %5829 = vmatmul.mubr.msk.f32.vlgmr.msra.gmra.mrb[34].mxu1 %vm1349_vm1, %v3552_v63 }
 0xa05   : > { %5842 = vmatprep.mubr.msk.f32.mxu1 %vm7039_vm0, %v7040_v48 }
 0xa20   : > { %v3062_v23 = vpop.xlane.xlu1 %3061 }
 0xa21   : > { %6616 = vrcp.f32 %v3062_v23 }
 0xa24   : > { %v3470_v53 = vpop.permute.xlu1 %3469 }
 0xa28   : > { %v3634_v55 = vpop.permute.xlu1 %3633 }
 0xa2b   : > { %v6617_v4 = vpop.eup %6616 }
 0xa2c   : > { %v3070_v43 = vmul.f32 %v6617_v4, %v6609_v1 }
 0xa2e   : > { %5808 = vmatmul.mubr.msk.f32.vlgmr.msra.gmra.mrb[34].mxu0 %vm1666_vm3, %v3070_v43 }
 0xa2f   : > { %6091 = vmatpush3.bf16.xpose.msk.msra.mxu0 %vm7654_vm2, %v6089_v44  ;;  %5821 = vmatprep.mubr.msk.f32.mxu0 %vm7039_vm0, %v7040_v48 }
 0xa30   : > { %6096 = vmatprep.subr.bf16.mxu0 %v7038_v25 }
 0xa36   : > { %5822 = vmatmul.mubr.msk.f32.vlgmr.msra.gmra.mrb[36].mxu0 %vm1349_vm1, %v3470_v53 }
 0xa37   : > { %6099 = vmatpush3.bf16.xpose.msk.msra.mxu0 %vm7654_vm2, %v6097_v58  ;;  %5835 = vmatprep.mubr.msk.f32.mxu0 %vm7039_vm0, %v7040_v48 }
 0xa38   : > { %6103 = vmatprep.subr.bf16.mxu0 %v7038_v25 }
 0xa3e   : > { %5836 = vmatmul.mubr.msk.f32.vlgmr.msra.gmra.mrb[38].mxu0 %vm1349_vm1, %v3634_v55 }
 0xa3f   : > { %5849 = vmatprep.mubr.msk.f32.mxu0 %vm7039_vm0, %v7040_v48 }
 0xa92   : > { %v3146_v59 = vpop.f32.mrb[28].mxu1 }
 0xa93   : > { %v5788_v60 = vpop.f32.mrb[29].mxu1 }
 0xac7   : > { %v7966_v31 = vpop.f32.mrb[30].mxu1 }
 0xac8   : > { %v5802_v61 = vpop.f32.mrb[31].mxu1 }
 0xacc   : > { %v3225_v38 = vpop.f32.mrb[32].mxu0 }
 0xacd   : > { %v6521_v1 = vpack.i.bf16 %v3225_v38, %v3146_v59  ;;  %v5795_v52 = vpop.f32.mrb[33].mxu0 }
 0xacf   : > { %v3465_v8 = vpop.f32.mrb[32].mxu1 }
 0xad0   : > { %v5816_v2 = vpop.f32.mrb[33].mxu1  ;;  %v3715_v13 = vsel %vm1666_vm3, %v3465_v8, -inf }
 0xad1   : > { %3716 = vmax.xlane.f32.xlu0 %v3715_v13 }
 0xad7   : > { %v3629_v47 = vpop.f32.mrb[34].mxu1 }
 0xad8   : > { %v5830_v12 = vpop.f32.mrb[35].mxu1  ;;  %v3721_v14 = vsel %vm1666_vm3, %v3629_v47, -inf }
 0xad9   : > { %3722 = vmax.xlane.f32.xlu0 %v3721_v14  ;;  %v4137_v14 = vld [vmem:[#allocation11] sm:$0xff] }
 0xb01   : > { %v7970_v19 = vpop.f32.mrb[34].mxu0 }
 0xb02   : > { %v6536_v10 = vpack.i.bf16 %v7970_v19, %v7966_v31  ;;  %v5809_v46 = vpop.f32.mrb[35].mxu0 }
 0xb03   : > { %v4138_v46 = vld [vmem:[#allocation11 + $0x8] sm:$0xff] }
 0xb09   : > { %v3547_v11 = vpop.f32.mrb[36].mxu0 }
 0xb0a   : > { %v5823_v15 = vpop.f32.mrb[37].mxu0  ;;  %v3718_v56 = vsel %vm1666_vm3, %v3547_v11, -inf }
 0xb0b   : > { %3719 = vmax.xlane.f32.xlu1 %v3718_v56  ;;  %v6112_v15 = vpack.c.bf16 %v4138_v46, %v4137_v14  ;;  %v4140_v56 = vld [vmem:[#allocation11 + $0x18] sm:$0xff] }
 0xb11   : > { %v3711_v16 = vpop.f32.mrb[38].mxu0 }
 0xb12   : > { %v5837_v24 = vpop.f32.mrb[39].mxu0  ;;  %v3724_v26 = vsel %vm1666_vm3, %v3711_v16, -inf }
 0xb13   : > { %3725 = vmax.xlane.f32.xlu0 %v3724_v26  ;;  %v4141_v24 = vld [vmem:[#allocation11 + $0x20] sm:$0xff]  ;;  %v4142_v26 = vld [vmem:[#allocation11 + $0x28] sm:$0xff] }
 0xb5e   : > { %v3717_v27 = vpop.xlane.xlu0 %3716 }
 0xb5f   : > { %v3727_v28 = vsub.f32 %v3465_v8, %v3717_v27  ;;  %v6120_v27 = vpack.c.bf16 %v4142_v26, %v4141_v24  ;;  %v6706_v24 = vld [vmem:[%s7477_s17 + $0x8] sm:$0xff] }
 0xb61   : > { %v3731_v54 = vmul.f32 1.442695, %v3727_v28  ;;  %v4143_v28 = vld [vmem:[#allocation11 + $0x30] sm:$0xff] }
 0xb63   : > { %6618 = vpow2.f32 %v3731_v54  ;;  %v4144_v54 = vld [vmem:[#allocation11 + $0x38] sm:$0xff] }
 0xb66   : > { %v3723_v30 = vpop.xlane.xlu0 %3722 }
 0xb67   : > { %v3729_v32 = vsub.f32 %v3629_v47, %v3723_v30  ;;  %v6124_v30 = vpack.c.bf16 %v4144_v54, %v4143_v28 }
 0xb69   : > { %v3735_v34 = vmul.f32 1.442695, %v3729_v32  ;;  %v4145_v32 = vld [vmem:[#allocation11 + $0x40] sm:$0xff] }
 0xb6b   : > { %6620 = vpow2.f32 %v3735_v34  ;;  %v4146_v34 = vld [vmem:[#allocation11 + $0x48] sm:$0xff] }
 0xb6d   : > { %v6619_v57 = vpop.eup %6618 }
 0xb6e   : > { %v3739_v3 = vsel %vm1666_vm3, %v6619_v57, 0.0 }
 0xb6f   : > { %3740 = vadd.xlane.f32.xlu0 %v3739_v3  ;;  %v4147_v3 = vld [vmem:[#allocation11 + $0x50] sm:$0xff] }
 0xb75   : > { %v6621_v22 = vpop.eup %6620 }
 0xb76   : > { %v3745_v36 = vsel %vm1666_vm3, %v6621_v22, 0.0 }
 0xb77   : > { %3746 = vadd.xlane.f32.xlu0 %v3745_v36 }
 0xb8d   : > { %6497 = vrot.lane.b32.xlu0 %v7708_v33, %s7043_s21 }
 0xb91   : > { %6517 = vrot.lane.b32.xlu0 %v6516_v6, %s7043_s21 }
 0xb98   : > { %v3720_v41 = vpop.xlane.xlu1 %3719 }
 0xb99   : > { %v3728_v42 = vsub.f32 %v3547_v11, %v3720_v41  ;;  %v4139_v11 = vld [vmem:[#allocation11 + $0x10] sm:$0xff] }
 0xb9b   : > { %v3733_v45 = vmul.f32 1.442695, %v3728_v42 }
 0xb9d   : > { %6622 = vpow2.f32 %v3733_v45  ;;  %v4149_v45 = vld [vmem:[#allocation11 + $0x60] sm:$0xff] }
 0xba0   : > { %v3726_v33 = vpop.xlane.xlu0 %3725 }
 0xba1   : > { %v3730_v23 = vsub.f32 %v3711_v16, %v3726_v33  ;;  %v6116_v16 = vpack.c.bf16 %v4140_v56, %v4139_v11  ;;  %v4151_v33 = vld [vmem:[#allocation11 + $0x70] sm:$0xff] }
 0xba3   : > { %v3737_v51 = vmul.f32 1.442695, %v3730_v23  ;;  %v4152_v23 = vld [vmem:[#allocation11 + $0x78] sm:$0xff] }
 0xba5   : > { %6624 = vpow2.f32 %v3737_v51  ;;  %v6140_v51 = vpack.c.bf16 %v4152_v23, %v4151_v33  ;;  %v4312_v33 = vld [vmem:[#allocation13] sm:$0xff] }
 0xba6   : > { %v4316_v23 = vld [vmem:[#allocation13 + $0x20] sm:$0xff] }
 0xba7   : > { %v6623_v29 = vpop.eup %6622 }
 0xba8   : > { %v3742_v63 = vsel %vm1666_vm3, %v6623_v29, 0.0 }
 0xba9   : > { %3743 = vadd.xlane.f32.xlu1 %v3742_v63 }
 0xbaf   : > { %v6625_v62 = vpop.eup %6624 }
 0xbb0   : > { %v3748_v5 = vsel %vm1666_vm3, %v6625_v62, 0.0 }
 0xbba   : > { %6502 = vrot.lane.b32.xlu1 %v7711_v37, %s7043_s21 }
 0xbbe   : > { %6507 = vrot.lane.b32.xlu1 %v7722_v17, %s7043_s21 }
 0xbe2   : > { %3749 = vadd.xlane.f32.xlu1 %v3748_v5 }
 0xbf3   : > { %6512 = vrot.lane.b32.xlu1 %v7732_v50, %s7043_s21 }
 0xbf7   : > { %6522 = vrot.lane.b32.xlu1 %v6521_v1, %s7042_s5 }
 0xbfb   : > { %6532 = vrot.lane.b32.xlu1 %v6531_v20, %s7043_s21  ;;  %s5243_s21 = sshll.u32 %s7173_s3, 9  ;;  %s7044_s3 = smov [#allocation16]  }
 0xbfc   : > { %v3741_v37 = vpop.xlane.xlu0 %3740  ;;  %s6942_s6 = sshll.u32 %s7044_s3, 4  ;;  %s6943_s6 = int_to_ptr.vmem [resolvable:$false] %s6942_s6 }
 0xbfd   : > { %6626 = vrcp.f32 %v3741_v37  ;;  %s6944_s4 = scalar_lea.vmem %s6943_s6, 1024 }
 0xc04   : > { %v3747_v17 = vpop.xlane.xlu0 %3746 }
 0xc05   : > { %6628 = vrcp.f32 %v3747_v17 }
 0xc07   : > { %v6627_v43 = vpop.eup %6626 }
 0xc08   : > { %v6498_v6 = vpop.permute.xlu0 %6497  ;;  %v3755_v35 = vmul.f32 %v6627_v43, %v6619_v57  ;;  %v6128_v57 = vpack.c.bf16 %v4146_v34, %v4145_v32 }
 0xc09   : > { %v6500_v40 = vunpack.i.h.bf16 %v6498_v6  ;;  %v6499_v4 = vunpack.i.l.bf16 %v6498_v6 }
 0xc0b   : > { %v6101_v44 = vpack.c.bf16 %v6500_v40, %v6499_v4 }
 0xc0d   : > { %6102 = vmatpush3.bf16.msra.mxu1 %v6101_v44  ;;  %v6518_v44 = vpop.permute.xlu0 %6517 }
 0xc0e   : > { %6106 = vmatprep.subr.bf16.mxu1 %v7038_v25 }
 0xc0f   : > { %v6629_v59 = vpop.eup %6628 }
 0xc10   : > { %5843 = vmatmul.mubr.msk.f32.vlgmr.msra.gmra.mrb[36].mxu1 %vm1666_vm3, %v3755_v35  ;;  %v3757_v1 = vmul.f32 %v6629_v59, %v6621_v22  ;;  %v4148_v22 = vld [vmem:[#allocation11 + $0x58] sm:$0xff] }
 0xc11   : > { %5856 = vmatprep.mubr.msk.f32.mxu1 %vm7039_vm0, %v7040_v48  ;;  %v6132_v42 = vpack.c.bf16 %v4148_v22, %v4147_v3  ;;  %v6709_v22 = vld [vmem:[%s7477_s17 + $0x18] sm:$0xff] }
 0xc36   : > { %v3744_v50 = vpop.xlane.xlu1 %3743 }
 0xc37   : > { %6630 = vrcp.f32 %v3744_v50  ;;  %v6520_v50 = vunpack.i.h.bf16 %v6518_v44 }
 0xc3a   : > { %v6503_v0 = vpop.permute.xlu1 %6502 }
 0xc3b   : > { %v6505_v18 = vunpack.i.h.bf16 %v6503_v0  ;;  %v6504_v20 = vunpack.i.l.bf16 %v6503_v0  ;;  %v6519_v0 = vunpack.i.l.bf16 %v6518_v44 }
 0xc3d   : > { %v6104_v49 = vpack.c.bf16 %v6505_v18, %v6504_v20  ;;  %v4123_v19 = vsel %vm1349_vm1, %v7802_v7, %v6519_v0  ;;  %v4324_v0 = vld [vmem:[#allocation13 + $0x60] sm:$0xff] }
 0xc3e   : > { %v6508_v58 = vpop.permute.xlu1 %6507 }
 0xc3f   : > { %v6510_v53 = vunpack.i.h.bf16 %v6508_v58  ;;  %v6509_v55 = vunpack.i.l.bf16 %v6508_v58  ;;  %6105 = vmatpush3.bf16.msra.mxu0 %v6104_v49  ;;  %v4124_v58 = vsel %vm1349_vm1, %v7804_v9, %v6520_v50  ;;  %v4320_v50 = vld [vmem:[#allocation13 + $0x40] sm:$0xff] }
 0xc40   : > { %6109 = vmatprep.subr.bf16.mxu0 %v7038_v25 }
 0xc41   : > { %v6631_v60 = vpop.eup %6630  ;;  %v6107_v61 = vpack.c.bf16 %v6510_v53, %v6509_v55 }
 0xc42   : > { %v3756_v38 = vmul.f32 %v6631_v60, %v6623_v29  ;;  %v4150_v29 = vld [vmem:[#allocation11 + $0x68] sm:$0xff] }
 0xc43   : > { %6108 = vmatpush3.bf16.msra.mxu1 %v6107_v61  ;;  %v6136_v63 = vpack.c.bf16 %v4150_v29, %v4149_v45  ;;  %v4315_v45 = vld [vmem:[#allocation13 + $0x18] sm:$0xff] }
 0xc44   : > { %5850 = vmatmul.mubr.msk.f32.vlgmr.msra.gmra.mrb[40].mxu0 %vm1666_vm3, %v3756_v38  ;;  %6113 = vmatprep.subr.bf16.mxu1 %v6112_v15 }
 0xc45   : > { %5863 = vmatprep.mubr.msk.f32.mxu0 %vm7039_vm0, %v7040_v48 }
 0xc46   : > { %5857 = vmatmul.mubr.msk.f32.vlgmr.msra.gmra.mrb[38].mxu1 %vm1666_vm3, %v3757_v1 }
 0xc47   : > { %6115 = vmatpush3.bf16.msra.mxu1 %v6112_v15 }
 0xc48   : > { %6117 = vmatprep.subr.bf16.mxu1 %v6116_v16 }
 0xc4b   : > { %6119 = vmatpush3.bf16.msra.mxu1 %v6116_v16 }
 0xc4c   : > { %6121 = vmatprep.subr.bf16.mxu1 %v6120_v27 }
 0xc4f   : > { %6123 = vmatpush3.bf16.msra.mxu1 %v6120_v27  ;;  %v6707_v27 = vld [vmem:[%s7477_s17] sm:$0xff] }
 0xc50   : > { %6125 = vmatprep.subr.bf16.mxu1 %v6124_v30 }
 0xc53   : > { %6127 = vmatpush3.bf16.msra.mxu1 %v6124_v30 }
 0xc54   : > { %6129 = vmatprep.subr.bf16.mxu1 %v6128_v57 }
 0xc57   : > { %6131 = vmatpush3.bf16.msra.mxu1 %v6128_v57  ;;  %v6708_v57 = vld [vmem:[%s7477_s17 + $0x10] sm:$0xff] }
 0xc58   : > { %6133 = vmatprep.subr.bf16.mxu1 %v6132_v42 }
 0xc5b   : > { %6135 = vmatpush3.bf16.msra.mxu1 %v6132_v42  ;;  %v4317_v42 = vld [vmem:[#allocation13 + $0x28] sm:$0xff] }
 0xc5c   : > { %6137 = vmatprep.subr.bf16.mxu1 %v6136_v63 }
 0xc5f   : > { %6139 = vmatpush3.bf16.msra.mxu1 %v6136_v63  ;;  %v4319_v63 = vld [vmem:[#allocation13 + $0x38] sm:$0xff] }
 0xc60   : > { %6141 = vmatprep.subr.bf16.mxu1 %v6140_v51 }
 0xc63   : > { %6143 = vmatpush3.bf16.msra.mxu1 %v6140_v51  ;;  %v6176_v51 = vpack.c.bf16 %v4319_v63, %v4315_v45  ;;  %v4344_v45 = vld [vmem:[#allocation13 + $0x100] sm:$0xff] }
 0xc65   : > { %6177 = vmatprep.subr.bf16.mxu1 %v6176_v51  ;;  %v4350_v51 = vld [vmem:[#allocation13 + $0x130] sm:$0xff] }
 0xc6f   : > { %v3750_v52 = vpop.xlane.xlu1 %3749 }
 0xc70   : > { %6632 = vrcp.f32 %v3750_v52 }
 0xc73   : > { %v6513_v8 = vpop.permute.xlu1 %6512 }
 0xc74   : > { %v6515_v2 = vunpack.i.h.bf16 %v6513_v8  ;;  %v6514_v13 = vunpack.i.l.bf16 %v6513_v8 }
 0xc76   : > { %v6110_v47 = vpack.c.bf16 %v6515_v2, %v6514_v13 }
 0xc77   : > { %v6523_v35 = vpop.permute.xlu1 %6522 }
 0xc78   : > { %6111 = vmatpush3.bf16.msra.mxu0 %v6110_v47  ;;  %v6525_v18 = vunpack.i.h.bf16 %v6523_v35  ;;  %v6524_v20 = vunpack.i.l.bf16 %v6523_v35 }
 0xc7a   : > { %v6633_v25 = vpop.eup %6632  ;;  %v4129_v55 = vsel %vm4127_vm4, %v4124_v58, %v6525_v18  ;;  %v4322_v18 = vld [vmem:[#allocation13 + $0x50] sm:$0xff]  ;;  %v4329_v58 = vld [vmem:[#allocation13 + $0x88] sm:$0xff] }
 0xc7b   : > { %v3758_v12 = vmul.f32 %v6633_v25, %v6625_v62  ;;  %v6533_v61 = vpop.permute.xlu1 %6532 }
 0xc7c   : > { %v6535_v1 = vunpack.i.h.bf16 %v6533_v61  ;;  %v6534_v52 = vunpack.i.l.bf16 %v6533_v61  ;;  %v4332_v61 = vld [vmem:[#allocation13 + $0xa0] sm:$0xff] }
 0xc7d   : > { %5864 = vmatmul.mubr.msk.f32.vlgmr.msra.gmra.mrb[42].mxu0 %vm1666_vm3, %v3758_v12 }
 0xc7e   : > { %4461 = vmatprep.mubr.f32.mxu0 %v7040_v48  ;;  %v4125_v47 = vsel %vm1349_vm1, %v7806_v39, %v6534_v52  ;;  %v4126_v25 = vsel %vm1349_vm1, %v7810_v21, %v6535_v1  ;;  %v5215_v39 = vld [vmem:[%s8292_s8] ss:$0 sm:$0xff]  ;;  %v4334_v1 = vld [vmem:[#allocation13 + $0xb0] sm:$0xff]  ;;  %s8297_s8 = sld [smem:[#allocation42_spill]] }
 0xc84   : > { %s8157_s17 = scalar_lea.hbm %s8297_s8, %s5243_s21 }
 0xce3   : > { %v3834_v36 = vpop.f32.mrb[36].mxu1 }
 0xce4   : > { %v5844_v41 = vpop.f32.mrb[37].mxu1 }
 0xce5   : > { %v4313_v41 = vld [vmem:[#allocation13 + $0x8] sm:$0xff] }
 0xce6   : > { %v6144_v29 = vpack.c.bf16 %v4317_v42, %v4313_v41  ;;  %v4351_v42 = vld [vmem:[#allocation13 + $0x138] sm:$0xff] }
 0xce8   : > { %6145 = vmatprep.subr.bf16.mxu0 %v6144_v29  ;;  %v4348_v29 = vld [vmem:[#allocation13 + $0x120] sm:$0xff] }
 0xd17   : > { %v3913_v62 = vpop.f32.mrb[40].mxu0 }
 0xd18   : > { %v6526_v5 = vpack.i.bf16 %v3913_v62, %v3834_v36  ;;  %v5851_v37 = vpop.f32.mrb[41].mxu0  ;;  %v6146_v62 = vpack.c.bf16 %v4316_v23, %v4312_v33  ;;  %v6162_v33 = vpack.c.bf16 %v4348_v29, %v4344_v45  ;;  %v4346_v23 = vld [vmem:[#allocation13 + $0x110] sm:$0xff] }
 0xd19   : > { %v3992_v17 = vpop.f32.mrb[38].mxu1  ;;  %v4318_v37 = vld [vmem:[#allocation13 + $0x30] sm:$0xff] }
 0xd1a   : > { %v5858_v6 = vpop.f32.mrb[39].mxu1  ;;  %6527 = vrot.lane.b32.xlu0 %v6526_v5, %s7041_s13  ;;  %v4314_v5 = vld [vmem:[#allocation13 + $0x10] sm:$0xff]  ;;  %6147 = vmatpush1.bf16.msra.mxu0 %v6146_v62  ;;  %v4353_v62 = vld [vmem:[#allocation13 + $0x148] sm:$0xff] }
 0xd1b   : > { %v6178_v6 = vpack.c.bf16 %v4318_v37, %v4314_v5  ;;  %v6194_v5 = vpack.c.bf16 %v4350_v51, %v4346_v23  ;;  %v4357_v37 = vld [vmem:[#allocation13 + $0x168] sm:$0xff]  ;;  %v5217_v51 = vld [vmem:[%s8294_s12] ss:$0 sm:$0xff] }
 0xd1e   : > { %6537 = vrot.lane.b32.xlu0 %v6536_v10, %s7042_s5  ;;  %v4128_v10 = vsel %vm4127_vm4, %v4123_v19, %v6524_v20  ;;  %v6150_v20 = vpack.c.bf16 %v4324_v0, %v4320_v50  ;;  %v4358_v0 = vld [vmem:[#allocation13 + $0x170] sm:$0xff]  ;;  %s775_s5 = scalar_lea.vmem [#allocation16], %s5135_s10 }
 0xd1f   : > { %s4965_s10 = sshll.u32 %s775_s5, 4  ;;  %s8152_s10 = int_to_ptr.vmem [resolvable:$true] %s4965_s10 }
 0xd20   : > { %p6945_p9 = scmp.lt.s32.totalorder %s8152_s10, %s6943_s6 }
 0xd50   : > { %v4071_v40 = vpop.f32.mrb[42].mxu0 }
 0xd51   : > { %v6541_v4 = vpack.i.bf16 %v4071_v40, %v3992_v17  ;;  %v5865_v43 = vpop.f32.mrb[43].mxu0  ;;  %v4321_v17 = vld [vmem:[#allocation13 + $0x48] sm:$0xff] }
 0xd52   : > { %v4325_v40 = vld [vmem:[#allocation13 + $0x68] sm:$0xff]  ;;  %v4327_v43 = vld [vmem:[#allocation13 + $0x78] sm:$0xff] }
 0xd53   : > { %6542 = vrot.lane.b32.xlu1 %v6541_v4, %s7041_s13  ;;  %v4323_v4 = vld [vmem:[#allocation13 + $0x58] sm:$0xff]  ;;  %v6148_v44 = vpack.c.bf16 %v4325_v40, %v4321_v17  ;;  %v6164_v40 = vpack.c.bf16 %v4357_v37, %v4353_v62  ;;  %s8296_s13 = sld [smem:[#allocation38_spill]] }
 0xd54   : > { %v6180_v35 = vpack.c.bf16 %v4327_v43, %v4323_v4  ;;  %v4355_v17 = vld [vmem:[#allocation13 + $0x158] sm:$0xff]  ;;  %v4352_v43 = vld [vmem:[#allocation13 + $0x140] sm:$0xff] }
 0xd55   : > { %6149 = vmatprep.subr.bf16.mxu0 %v6148_v44  ;;  %v4356_v44 = vld [vmem:[#allocation13 + $0x160] sm:$0xff] }
 0xd56   : > { %6151 = vmatpush1.bf16.msra.mxu0 %v6150_v20  ;;  %v6166_v50 = vpack.c.bf16 %v4356_v44, %v4352_v43  ;;  %v4365_v20 = vld [vmem:[#allocation13 + $0x1a8] sm:$0xff] }
 0xd8c   : > { %v6528_v49 = vpop.permute.xlu0 %6527 }
 0xd8d   : > { %v6530_v53 = vunpack.i.h.bf16 %v6528_v49  ;;  %v6529_v31 = vunpack.i.l.bf16 %v6528_v49  ;;  %v4326_v49 = vld [vmem:[#allocation13 + $0x70] sm:$0xff] }
 0xd8f   : > { %v4133_v59 = vsel %vm4132_vm5, %v4128_v10, %v6529_v31  ;;  %v4134_v60 = vsel %vm4132_vm5, %v4129_v55, %v6530_v53  ;;  %v4333_v53 = vld [vmem:[#allocation13 + $0xa8] sm:$0xff]  ;;  %v6182_v31 = vpack.c.bf16 %v4326_v49, %v4322_v18  ;;  %v4331_v10 = vld [vmem:[#allocation13 + $0x98] sm:$0xff] }
 0xd90   : > { %5898 = vmatprep.mubr.f32.mxu1 %v4133_v59  ;;  %v6538_v38 = vpop.permute.xlu0 %6537  ;;  %v6152_v19 = vpack.c.bf16 %v4333_v53, %v4329_v58  ;;  %v4335_v55 = vld [vmem:[#allocation13 + $0xb8] sm:$0xff]  ;;  %v4328_v59 = vld [vmem:[#allocation13 + $0x80] sm:$0xff]  ;;  %v4361_v18 = vld [vmem:[#allocation13 + $0x188] sm:$0xff] }
 0xd91   : > { %5899 = vmatmul.mubr.f32.vlgmr.msra.gmra.mrb[40].mxu1 %v4134_v60  ;;  %v6540_v9 = vunpack.i.h.bf16 %v6538_v38  ;;  %v6539_v8 = vunpack.i.l.bf16 %v6538_v38  ;;  %v6184_v60 = vpack.c.bf16 %v4335_v55, %v4331_v10  ;;  %v4330_v38 = vld [vmem:[#allocation13 + $0x90] sm:$0xff]  ;;  %v6154_v52 = vpack.c.bf16 %v4332_v61, %v4328_v59  ;;  %v4363_v53 = vld [vmem:[#allocation13 + $0x198] sm:$0xff]  ;;  %v4364_v55 = vld [vmem:[#allocation13 + $0x1a0] sm:$0xff] }
 0xd92   : > { %6179 = vmatpush1.bf16.msra.mxu1 %v6178_v6  ;;  %6153 = vmatprep.subr.bf16.mxu0 %v6152_v19  ;;  %v4359_v6 = vld [vmem:[#allocation13 + $0x178] sm:$0xff]  ;;  %v6168_v58 = vpack.c.bf16 %v4365_v20, %v4361_v18  ;;  %v4360_v19 = vld [vmem:[#allocation13 + $0x180] sm:$0xff]  ;;  %v4362_v59 = vld [vmem:[#allocation13 + $0x190] sm:$0xff] }
 0xd93   : > { %v4130_v12 = vsel %vm4127_vm4, %v4125_v47, %v6539_v8  ;;  %v4131_v14 = vsel %vm4127_vm4, %v4126_v25, %v6540_v9  ;;  %6181 = vmatprep.subr.bf16.mxu1 %v6180_v35  ;;  %v6186_v9 = vpack.c.bf16 %v4334_v1, %v4330_v38  ;;  %6155 = vmatpush1.bf16.msra.mxu0 %v6154_v52  ;;  %v4354_v35 = vld [vmem:[#allocation13 + $0x150] sm:$0xff]  ;;  %v4369_v38 = vld [vmem:[#allocation13 + $0x1c8] sm:$0xff]  ;;  %v4371_v52 = vld [vmem:[#allocation13 + $0x1d8] sm:$0xff] }
 0xd94   : > { %v6196_v4 = vpack.c.bf16 %v4359_v6, %v4355_v17  ;;  %v6198_v49 = vpack.c.bf16 %v4358_v0, %v4354_v35  ;;  %v6170_v61 = vpack.c.bf16 %v4364_v55, %v4360_v19  ;;  %v4373_v1 = vld [vmem:[#allocation13 + $0x1e8] sm:$0xff]  ;;  %v4751_v19 = vld [vmem:[#allocation14 + $0x180] sm:$0xff] }
 0xd95   : > { %v4752_v55 = vld [vmem:[#allocation14 + $0x188] sm:$0xff] }
 0xd96   : > { %6183 = vmatpush1.bf16.msra.mxu1 %v6182_v31  ;;  %v4367_v31 = vld [vmem:[#allocation13 + $0x1b8] sm:$0xff] }
 0xd97   : > { %6185 = vmatprep.subr.bf16.mxu1 %v6184_v60  ;;  %v6200_v10 = vpack.c.bf16 %v4367_v31, %v4363_v53  ;;  %v4366_v60 = vld [vmem:[#allocation13 + $0x1b0] sm:$0xff]  ;;  %v4719_v53 = vld [vmem:[#allocation14 + $0x80] sm:$0xff]  ;;  %v4720_v31 = vld [vmem:[#allocation14 + $0x88] sm:$0xff] }
 0xd9a   : > { %6187 = vmatpush1.bf16.msra.mxu1 %v6186_v9  ;;  %v6202_v9 = vpack.c.bf16 %v4366_v60, %v4362_v59  ;;  %v4703_v59 = vld [vmem:[#allocation14] sm:$0xff]  ;;  %v4704_v60 = vld [vmem:[#allocation14 + $0x8] sm:$0xff] }
 0xdc5   : > { %v6543_v2 = vpop.permute.xlu1 %6542 }
 0xdc6   : > { %v6545_v13 = vunpack.i.h.bf16 %v6543_v2  ;;  %v6544_v7 = vunpack.i.l.bf16 %v6543_v2 }
 0xdc8   : > { %v4135_v46 = vsel %vm4132_vm5, %v4130_v12, %v6544_v7  ;;  %v4136_v11 = vsel %vm4132_vm5, %v4131_v14, %v6545_v13 }
 0xdc9   : > { %5901 = vmatprep.mubr.f32.mxu1 %v4135_v46  ;;  %v4337_v46 = vld [vmem:[#allocation13 + $0xc8] sm:$0xff] }
 0xdca   : > { %5902 = vmatmul.mubr.f32.gmra.mrb[42].mxu1 %v4136_v11  ;;  %v4341_v11 = vld [vmem:[#allocation13 + $0xe8] sm:$0xff] }
 0xdcb   : > { %4550 = vmatprep.mubr.f32.mxu1 %v7040_v48 }
 0xe64   : > { %v5900_v15 = vpop.f32.mrb[40].mxu1 }
 0xe65   : > { %v4231_v56 = vadd.f32 %v5900_v15, %v5215_v39  ;;  %v4225_v21 = vpop.f32.mrb[41].mxu1  ;;  %v6156_v15 = vpack.c.bf16 %v4341_v11, %v4337_v46  ;;  %v4374_v46 = vld [vmem:[#allocation13 + $0x1f0] sm:$0xff] }
 0xe66   : > { %v4226_v16 = vadd.f32 %v5215_v39, %v4225_v21  ;;  %v4336_v21 = vld [vmem:[#allocation13 + $0xc0] sm:$0xff] }
 0xe67   : > { %v8035_v26 = vadd.f32 %v6706_v24, %v4231_v56  ;;  %v4343_v56 = vld [vmem:[#allocation13 + $0xf8] sm:$0xff]  ;;  %6157 = vmatprep.subr.bf16.mxu0 %v6156_v15 }
 0xe68   : > { %v8038_v28 = vadd.f32 %v6707_v27, %v4226_v16  ;;  %v4340_v16 = vld [vmem:[#allocation13 + $0xe0] sm:$0xff] }
 0xe69   : > { %4250 = vadd.xlane.f32.xlu1 %v8035_v26  ;;  %v6158_v27 = vpack.c.bf16 %v4340_v16, %v4336_v21 }
 0xe6a   : > { %4248 = vadd.xlane.f32.xlu0 %v8038_v28 }
 0xe6b   : > { %6159 = vmatpush1.bf16.msra.mxu0 %v6158_v27 }
 0xe9d   : > { %v5903_v54 = vpop.f32.mrb[42].mxu1 }
 0xe9e   : > { %v4235_v30 = vpop.f32.mrb[43].mxu1  ;;  %v4241_v34 = vadd.f32 %v5903_v54, %v5215_v39  ;;  %v4338_v54 = vld [vmem:[#allocation13 + $0xd0] sm:$0xff] }
 0xe9f   : > { %v4236_v32 = vadd.f32 %v5215_v39, %v4235_v30  ;;  %v4339_v39 = vld [vmem:[#allocation13 + $0xd8] sm:$0xff]  ;;  %v4342_v30 = vld [vmem:[#allocation13 + $0xf0] sm:$0xff] }
 0xea0   : > { %v8047_v36 = vadd.f32 %v6709_v22, %v4241_v34  ;;  %v6188_v24 = vpack.c.bf16 %v4343_v56, %v4339_v39  ;;  %v4345_v34 = vld [vmem:[#allocation13 + $0x108] sm:$0xff]  ;;  %v4347_v22 = vld [vmem:[#allocation13 + $0x118] sm:$0xff] }
 0xea1   : > { %v8043_v3 = vadd.f32 %v6708_v57, %v4236_v32  ;;  %v6190_v32 = vpack.c.bf16 %v4342_v30, %v4338_v54  ;;  %v4349_v57 = vld [vmem:[#allocation13 + $0x128] sm:$0xff]  ;;  %v6192_v63 = vpack.c.bf16 %v4351_v42, %v4347_v22 }
 0xea2   : > { %6189 = vmatprep.subr.bf16.mxu1 %v6188_v24  ;;  %v6160_v41 = vpack.c.bf16 %v4349_v57, %v4345_v34 }
 0xea3   : > { %4252 = vadd.xlane.f32.xlu0 %v8043_v3  ;;  %6191 = vmatpush1.bf16.msra.mxu1 %v6190_v32 }
 0xea4   : > { %6161 = vmatprep.subr.bf16.mxu0 %v6160_v41  ;;  %6193 = vmatprep.subr.bf16.mxu1 %v6192_v63  ;;  %v5216_v63 = vld [vmem:[%s8293_s2] ss:$0 sm:$0xff]  ;;  %s6938_s2 = scalar_lea.vmem %s8152_s10, 512 }
 0xea5   : > { %6163 = vmatpush1.bf16.msra.mxu0 %v6162_v33  ;;  %p6939_p4 = scmp.ne.s32.totalorder %s8152_s10, %s6938_s2  ;;  %p6946_p8 = scmp.lt.s32.totalorder %s6944_s4, %s6938_s2 }
 0xea6   : > { %6165 = vmatprep.subr.bf16.mxu0 %v6164_v40 }
 0xea7   : > { %4254 = vadd.xlane.f32.xlu0 %v8047_v36  ;;  %6195 = vmatpush1.bf16.msra.mxu1 %v6194_v5  ;;  %p6940_p5 = pnand %p6939_p4, %p8298_p10  ;;  %p6947_p11 = por %p6946_p8, %p6945_p9 }
 0xea8   : > { %6197 = vmatprep.subr.bf16.mxu1 %v6196_v4 }
 0xea9   : > { %6167 = vmatpush1.bf16.msra.mxu0 %v6166_v50  ;;  %p6941_p7 = pneg %p6940_p5 }
 0xeaa   : > { %6169 = vmatprep.subr.bf16.mxu0 %v6168_v58 }
 0xeab   : > { %6199 = vmatpush1.bf16.msra.mxu1 %v6198_v49  ;;  %p6948_p3 = pnand %p6947_p11, %p6941_p7 }
 0xeac   : > { %6201 = vmatprep.subr.bf16.mxu1 %v6200_v10  ;;  %v6208_v10 = vpack.c.bf16 %v4720_v31, %v4719_v53  ;;  %v4729_v53 = vld [vmem:[#allocation14 + $0xd0] sm:$0xff]  ;;  %v4730_v31 = vld [vmem:[#allocation14 + $0xd8] sm:$0xff] }
 0xead   : > { %6171 = vmatpush1.bf16.msra.mxu0 %v6170_v61  ;;  %v6240_v61 = vpack.c.bf16 %v4752_v55, %v4751_v19  ;;  %v4761_v19 = vld [vmem:[#allocation14 + $0x1d0] sm:$0xff]  ;;  %v4762_v55 = vld [vmem:[#allocation14 + $0x1d8] sm:$0xff] }
 0xeaf   : > { %6203 = vmatpush1.bf16.msra.mxu1 %v6202_v9 }
 0xef6   : > { %v4251_v8 = vpop.xlane.xlu1 %4250 }
 0xef7   : > { %v4257_v2 = vmul.f32 0.0078125, %v4251_v8  ;;  %v4249_v13 = vpop.xlane.xlu0 %4248  ;;  %v6172_v8 = vpack.c.bf16 %v4373_v1, %v4369_v38  ;;  %v6210_v38 = vpack.c.bf16 %v4704_v60, %v4703_v59  ;;  %v4735_v1 = vld [vmem:[#allocation14 + $0x100] sm:$0xff]  ;;  %v4713_v59 = vld [vmem:[#allocation14 + $0x50] sm:$0xff]  ;;  %v4714_v60 = vld [vmem:[#allocation14 + $0x58] sm:$0xff] }
 0xef8   : > { %v4256_v7 = vmul.f32 0.0078125, %v4249_v13  ;;  %v4368_v13 = vld [vmem:[#allocation13 + $0x1c0] sm:$0xff] }
 0xef9   : > { %v8051_v47 = vsub.f32 %v8035_v26, %v4257_v2  ;;  %v4375_v2 = vld [vmem:[#allocation13 + $0x1f8] sm:$0xff]  ;;  %6173 = vmatprep.subr.bf16.mxu0 %v6172_v8  ;;  %v4721_v8 = vld [vmem:[#allocation14 + $0x90] sm:$0xff] }
 0xefa   : > { %v8054_v25 = vsub.f32 %v8038_v28, %v4256_v7  ;;  %v4372_v7 = vld [vmem:[#allocation13 + $0x1e0] sm:$0xff] }
 0xefb   : > { %v4265_v12 = vmul.f32 %v8051_v47, %v8051_v47  ;;  %v6174_v11 = vpack.c.bf16 %v4372_v7, %v4368_v13  ;;  %v4754_v7 = vld [vmem:[#allocation14 + $0x198] sm:$0xff] }
 0xefc   : > { %v4264_v14 = vmul.f32 %v8054_v25, %v8054_v25 }
 0xefd   : > { %4270 = vadd.xlane.f32.xlu1 %v4265_v12  ;;  %v6204_v12 = vpack.c.bf16 %v4375_v2, %v4371_v52  ;;  %6175 = vmatpush1.bf16.msra.mxu0 %v6174_v11  ;;  %v4736_v52 = vld [vmem:[#allocation14 + $0x108] sm:$0xff]  ;;  %v4753_v2 = vld [vmem:[#allocation14 + $0x190] sm:$0xff] }
 0xefe   : > { %4268 = vadd.xlane.f32.xlu0 %v4264_v14  ;;  %v4370_v14 = vld [vmem:[#allocation13 + $0x1d0] sm:$0xff]  ;;  %6209 = vmatprep.subr.bf16.mxu0 %v6208_v10  ;;  %v6242_v9 = vpack.c.bf16 %v4736_v52, %v4735_v1  ;;  %v6228_v10 = vpack.c.bf16 %v4730_v31, %v4729_v53  ;;  %v4746_v52 = vld [vmem:[#allocation14 + $0x158] sm:$0xff] }
 0xeff   : > { %v6206_v39 = vpack.c.bf16 %v4374_v46, %v4370_v14  ;;  %6205 = vmatprep.subr.bf16.mxu1 %v6204_v12  ;;  %v4705_v12 = vld [vmem:[#allocation14 + $0x10] sm:$0xff]  ;;  %v4706_v14 = vld [vmem:[#allocation14 + $0x18] sm:$0xff]  ;;  %v6244_v46 = vpack.c.bf16 %v4754_v7, %v4753_v2  ;;  %v4763_v2 = vld [vmem:[#allocation14 + $0x1e0] sm:$0xff] }
 0xf00   : > { %v6214_v11 = vpack.c.bf16 %v4706_v14, %v4705_v12  ;;  %v4745_v1 = vld [vmem:[#allocation14 + $0x150] sm:$0xff]  ;;  %v4764_v7 = vld [vmem:[#allocation14 + $0x1e8] sm:$0xff]  ;;  %v4715_v12 = vld [vmem:[#allocation14 + $0x60] sm:$0xff] }
 0xf01   : > { %6207 = vmatpush1.bf16.msra.mxu1 %v6206_v39  ;;  %v4737_v39 = vld [vmem:[#allocation14 + $0x110] sm:$0xff]  ;;  %v4716_v14 = vld [vmem:[#allocation14 + $0x68] sm:$0xff] }
 0xf02   : > { %6241 = vmatprep.subr.bf16.mxu1 %v6240_v61  ;;  %v6260_v61 = vpack.c.bf16 %v4762_v55, %v4761_v19 }
 0xf30   : > { %v4253_v15 = vpop.xlane.xlu0 %4252 }
 0xf31   : > { %v4258_v56 = vmul.f32 0.0078125, %v4253_v15  ;;  %v4738_v15 = vld [vmem:[#allocation14 + $0x118] sm:$0xff] }
 0xf33   : > { %v4262_v21 = vsub.f32 %v8043_v3, %v4258_v56  ;;  %v6246_v56 = vpack.c.bf16 %v4738_v15, %v4737_v39  ;;  %v4747_v39 = vld [vmem:[#allocation14 + $0x160] sm:$0xff]  ;;  %v4748_v15 = vld [vmem:[#allocation14 + $0x168] sm:$0xff] }
 0xf34   : > { %v4255_v16 = vpop.xlane.xlu0 %4254 }
 0xf35   : > { %v4259_v24 = vmul.f32 0.0078125, %v4255_v16  ;;  %v4266_v27 = vmul.f32 %v4262_v21, %v4262_v21  ;;  %v4724_v16 = vld [vmem:[#allocation14 + $0xa8] sm:$0xff] }
 0xf37   : > { %v4263_v54 = vsub.f32 %v8047_v36, %v4259_v24  ;;  %4272 = vadd.xlane.f32.xlu0 %v4266_v27  ;;  %v4755_v24 = vld [vmem:[#allocation14 + $0x1a0] sm:$0xff] }
 0xf39   : > { %v4267_v30 = vmul.f32 %v4263_v54, %v4263_v54 }
 0xf3b   : > { %4274 = vadd.xlane.f32.xlu1 %v4267_v30  ;;  %v4707_v30 = vld [vmem:[#allocation14 + $0x20] sm:$0xff] }
 0xf8a   : > { %v4271_v32 = vpop.xlane.xlu1 %4270 }
 0xf8b   : > { %v4277_v34 = vmul.f32 0.0078125, %v4271_v32  ;;  %v4269_v57 = vpop.xlane.xlu0 %4268  ;;  %v4708_v32 = vld [vmem:[#allocation14 + $0x28] sm:$0xff] }
 0xf8c   : > { %v4276_v22 = vmul.f32 0.0078125, %v4269_v57  ;;  %v6218_v57 = vpack.c.bf16 %v4708_v32, %v4707_v30  ;;  %v4717_v30 = vld [vmem:[#allocation14 + $0x70] sm:$0xff]  ;;  %v4718_v32 = vld [vmem:[#allocation14 + $0x78] sm:$0xff] }
 0xf8d   : > { %v4281_v41 = vadd.f32 1e-05, %v4277_v34 }
 0xf8e   : > { %v4280_v42 = vadd.f32 1e-05, %v4276_v22  ;;  %v4739_v22 = vld [vmem:[#allocation14 + $0x120] sm:$0xff] }
 0xf8f   : > { %6634 = vrsqrt.f32 %v4281_v41  ;;  %v4740_v41 = vld [vmem:[#allocation14 + $0x128] sm:$0xff] }
 0xf90   : > { %6636 = vrsqrt.f32 %v4280_v42  ;;  %v6250_v42 = vpack.c.bf16 %v4740_v41, %v4739_v22  ;;  %v4749_v22 = vld [vmem:[#allocation14 + $0x170] sm:$0xff]  ;;  %v4750_v41 = vld [vmem:[#allocation14 + $0x178] sm:$0xff] }
 0xf99   : > { %v6635_v45 = vpop.eup %6634 }
 0xf9a   : > { %v6637_v29 = vpop.eup %6636  ;;  %v4289_v23 = vmul.f32 %v6635_v45, %v8051_v47  ;;  %v4725_v45 = vld [vmem:[#allocation14 + $0xb0] sm:$0xff] }
 0xf9b   : > { %v4288_v33 = vmul.f32 %v6637_v29, %v8054_v25  ;;  %v4726_v29 = vld [vmem:[#allocation14 + $0xb8] sm:$0xff] }
 0xf9c   : > { %v4299_v37 = vmul.f32 %v5216_v63, %v4289_v23  ;;  %v4758_v23 = vld [vmem:[#allocation14 + $0x1b8] sm:$0xff] }
 0xf9d   : > { %v4298_v62 = vmul.f32 %v5216_v63, %v4288_v33  ;;  %v6220_v33 = vpack.c.bf16 %v4726_v29, %v4725_v45  ;;  %v4377_v45 = vlaneseq }
 0xf9e   : > { %v4309_v17 = vadd.f32 %v5217_v51, %v4299_v37 }
 0xf9f   : > { %v4308_v5 = vadd.f32 %v5217_v51, %v4298_v62  ;;  %v4710_v62 = vld [vmem:[#allocation14 + $0x38] sm:$0xff]  ;;  %v4378_v29 = vshrl.u32 %v4377_v45, 7 }
 0xfa1   : > { %4462 = vmatmul.mubr.f32.vlgmr.msra.gmra.mrb[44].mxu0 %v4308_v5  ;;  %4551 = vmatmul.mubr.f32.vlgmr.msra.gmra.mrb[44].mxu1 %v4308_v5 }
 0xfa2   : > { %4467 = vmatprep.mubr.f32.mxu0 %v7040_v48  ;;  %4556 = vmatprep.mubr.f32.mxu1 %v7040_v48 }
 0xfa3   : > { %6211 = vmatpush3.bf16.msra.mxu0 %v6210_v38  ;;  %6243 = vmatpush3.bf16.msra.mxu1 %v6242_v9  ;;  %v6230_v38 = vpack.c.bf16 %v4714_v60, %v4713_v59  ;;  %v6262_v9 = vpack.c.bf16 %v4746_v52, %v4745_v1 }
 0xfa4   : > { %6245 = vmatprep.subr.bf16.mxu1 %v6244_v46  ;;  %v6264_v46 = vpack.c.bf16 %v4764_v7, %v4763_v2 }
 0xfa5   : > { %4468 = vmatmul.mubr.f32.gmra.mrb[46].mxu0 %v4309_v17  ;;  %4557 = vmatmul.mubr.f32.gmra.mrb[46].mxu1 %v4309_v17  ;;  %v4741_v17 = vld [vmem:[#allocation14 + $0x130] sm:$0xff] }
 0xfa6   : > { %4473 = vmatprep.mubr.f32.mxu0 %v7040_v48  ;;  %4562 = vmatprep.mubr.f32.mxu1 %v7040_v48 }
 0xfa7   : > { %6247 = vmatpush3.bf16.msra.mxu1 %v6246_v56  ;;  %v6266_v56 = vpack.c.bf16 %v4748_v15, %v4747_v39 }
 0xfc4   : > { %v4273_v47 = vpop.xlane.xlu0 %4272 }
 0xfc5   : > { %v4278_v25 = vmul.f32 0.0078125, %v4273_v47  ;;  %v4742_v47 = vld [vmem:[#allocation14 + $0x138] sm:$0xff] }
 0xfc7   : > { %v4282_v6 = vadd.f32 1e-05, %v4278_v25  ;;  %v6254_v25 = vpack.c.bf16 %v4742_v47, %v4741_v17 }
 0xfc8   : > { %v4275_v40 = vpop.xlane.xlu1 %4274 }
 0xfc9   : > { %6638 = vrsqrt.f32 %v4282_v6  ;;  %v4279_v4 = vmul.f32 0.0078125, %v4275_v40  ;;  %v4727_v6 = vld [vmem:[#allocation14 + $0xc0] sm:$0xff]  ;;  %v4728_v40 = vld [vmem:[#allocation14 + $0xc8] sm:$0xff] }
 0xfcb   : > { %v4283_v43 = vadd.f32 1e-05, %v4279_v4  ;;  %v4759_v4 = vld [vmem:[#allocation14 + $0x1c0] sm:$0xff] }
 0xfcd   : > { %6640 = vrsqrt.f32 %v4283_v43  ;;  %v6224_v43 = vpack.c.bf16 %v4728_v40, %v4727_v6 }
 0xfd3   : > { %v6639_v44 = vpop.eup %6638 }
 0xfd4   : > { %v4290_v35 = vmul.f32 %v6639_v44, %v4262_v21  ;;  %v4723_v21 = vld [vmem:[#allocation14 + $0xa0] sm:$0xff]  ;;  %v4760_v44 = vld [vmem:[#allocation14 + $0x1c8] sm:$0xff] }
 0xfd5   : > { %v6216_v27 = vpack.c.bf16 %v4724_v16, %v4723_v21  ;;  %v4733_v21 = vld [vmem:[#allocation14 + $0xf0] sm:$0xff]  ;;  %v4734_v16 = vld [vmem:[#allocation14 + $0xf8] sm:$0xff] }
 0xfd6   : > { %v4300_v50 = vmul.f32 %v5216_v63, %v4290_v35  ;;  %v4711_v35 = vld [vmem:[#allocation14 + $0x40] sm:$0xff] }
 0xfd7   : > { %v6641_v0 = vpop.eup %6640 }
 0xfd8   : > { %v4310_v18 = vadd.f32 %v5217_v51, %v4300_v50  ;;  %v4291_v20 = vmul.f32 %v6641_v0, %v4263_v54  ;;  %v4756_v54 = vld [vmem:[#allocation14 + $0x1a8] sm:$0xff]  ;;  %v6256_v0 = vpack.c.bf16 %v4760_v44, %v4759_v4 }
 0xfd9   : > { %v6248_v34 = vpack.c.bf16 %v4756_v54, %v4755_v24  ;;  %v4712_v50 = vld [vmem:[#allocation14 + $0x48] sm:$0xff]  ;;  %v4765_v24 = vld [vmem:[#allocation14 + $0x1f0] sm:$0xff]  ;;  %v4766_v54 = vld [vmem:[#allocation14 + $0x1f8] sm:$0xff] }
 0xfda   : > { %4474 = vmatmul.mubr.f32.gmra.mrb[48].mxu0 %v4310_v18  ;;  %4563 = vmatmul.mubr.f32.gmra.mrb[48].mxu1 %v4310_v18  ;;  %v4301_v49 = vmul.f32 %v5216_v63, %v4291_v20  ;;  %v4757_v63 = vld [vmem:[#allocation14 + $0x1b0] sm:$0xff]  ;;  %v6226_v18 = vpack.c.bf16 %v4712_v50, %v4711_v35  ;;  %v4743_v20 = vld [vmem:[#allocation14 + $0x140] sm:$0xff] }
 0xfdb   : > { %4479 = vmatprep.mubr.f32.mxu0 %v7040_v48  ;;  %4568 = vmatprep.mubr.f32.mxu1 %v7040_v48  ;;  %v4722_v48 = vld [vmem:[#allocation14 + $0x98] sm:$0xff]  ;;  %v6252_v5 = vpack.c.bf16 %v4758_v23, %v4757_v63  ;;  %v4379_v63 = vsub.s32 0, %v4378_v29  ;;  %v783_v23 = vld [vmem:[%s8295_s30] sm:$0xf] }
 0xfdc   : > { %v4311_v58 = vadd.f32 %v5217_v51, %v4301_v49  ;;  %v6212_v13 = vpack.c.bf16 %v4722_v48, %v4721_v8  ;;  %6249 = vmatprep.subr.bf16.mxu1 %v6248_v34  ;;  %v4709_v51 = vld [vmem:[#allocation14 + $0x30] sm:$0xff]  ;;  %v4744_v49 = vld [vmem:[#allocation14 + $0x148] sm:$0xff]  ;;  %v4731_v8 = vld [vmem:[#allocation14 + $0xe0] sm:$0xff]  ;;  %v6268_v34 = vpack.c.bf16 %v4766_v54, %v4765_v24 }
 0xfdd   : > { %6251 = vmatpush3.bf16.msra.mxu1 %v6250_v42  ;;  %v6222_v37 = vpack.c.bf16 %v4710_v62, %v4709_v51  ;;  %v4732_v48 = vld [vmem:[#allocation14 + $0xe8] sm:$0xff]  ;;  %v6270_v42 = vpack.c.bf16 %v4750_v41, %v4749_v22  ;;  %v4383_v51 = vsub.s32 1, %v4378_v29  ;;  %v4391_v62 = vsub.s32 3, %v4378_v29 }
 0xfde   : > { %4480 = vmatmul.mubr.f32.gmra.mrb[50].mxu0 %v4311_v58  ;;  %4569 = vmatmul.mubr.f32.gmra.mrb[50].mxu1 %v4311_v58  ;;  %v6258_v58 = vpack.c.bf16 %v4744_v49, %v4743_v20 }
 0xfdf   : > { %6213 = vmatprep.subr.bf16.mxu0 %v6212_v13  ;;  %6253 = vmatprep.subr.bf16.mxu1 %v6252_v5  ;;  %v6232_v13 = vpack.c.bf16 %v4732_v48, %v4731_v8  ;;  %v8079_v5 = vrot.slane %v783_v23, %v4379_v63  ;;  %v8083_v17 = vrot.slane %v783_v23, %v4383_v51 }
 0xfe0   : > { %6215 = vmatpush3.bf16.msra.mxu0 %v6214_v11  ;;  %v6234_v11 = vpack.c.bf16 %v4716_v14, %v4715_v12  ;;  %v8085_v47 = vrot.slane %v783_v23, %v4391_v62 }
 0xfe1   : > { %6217 = vmatprep.subr.bf16.mxu0 %v6216_v27  ;;  %6255 = vmatpush3.bf16.msra.mxu1 %v6254_v25  ;;  %v6236_v27 = vpack.c.bf16 %v4734_v16, %v4733_v21 }
 0xfe2   : > { %6257 = vmatprep.subr.bf16.mxu1 %v6256_v0 }
 0xfe4   : > { %6219 = vmatpush3.bf16.msra.mxu0 %v6218_v57  ;;  %v6238_v57 = vpack.c.bf16 %v4718_v32, %v4717_v30 }
 0xfe5   : > { %6221 = vmatprep.subr.bf16.mxu0 %v6220_v33  ;;  %6259 = vmatpush3.bf16.msra.mxu1 %v6258_v58  ;;  %v4387_v33 = vsub.s32 2, %v4378_v29 }
 0xfe6   : > { %6261 = vmatprep.subr.bf16.mxu1 %v6260_v61 }
 0xfe8   : > { %6223 = vmatpush3.bf16.msra.mxu0 %v6222_v37  ;;  %v8081_v37 = vrot.slane %v783_v23, %v4387_v33 }
 0xfe9   : > { %6225 = vmatprep.subr.bf16.mxu0 %v6224_v43  ;;  %6263 = vmatpush3.bf16.msra.mxu1 %v6262_v9 }
 0xfea   : > { %6265 = vmatprep.subr.bf16.mxu1 %v6264_v46 }
 0xfec   : > { %6227 = vmatpush3.bf16.msra.mxu0 %v6226_v18 }
 0xfed   : > { %6229 = vmatprep.subr.bf16.mxu0 %v6228_v10  ;;  %6267 = vmatpush3.bf16.msra.mxu1 %v6266_v56 }
 0xfee   : > { %6269 = vmatprep.subr.bf16.mxu1 %v6268_v34 }
 0xff0   : > { %6231 = vmatpush3.bf16.msra.mxu0 %v6230_v38 }
 0xff1   : > { %6233 = vmatprep.subr.bf16.mxu0 %v6232_v13  ;;  %6271 = vmatpush3.bf16.msra.mxu1 %v6270_v42 }
 0xff4   : > { %6235 = vmatpush3.bf16.msra.mxu0 %v6234_v11 }
 0xff5   : > { %6237 = vmatprep.subr.bf16.mxu0 %v6236_v27 }
 0xff8   : > { %6239 = vmatpush3.bf16.msra.mxu0 %v6238_v57 }
0x1074   : > { %v4463_v25 = vpop.f32.mrb[44].mxu0  ;;  %v4552_v6 = vpop.f32.mrb[44].mxu1 }
0x1075   : > { %v8088_v40 = vadd.f32 %v4463_v25, %v8079_v5  ;;  %v8091_v4 = vadd.f32 %v4552_v6, %v8081_v37  ;;  %v4465_v43 = vpop.f32.mrb[45].mxu0  ;;  %v4554_v44 = vpop.f32.mrb[45].mxu1 }
0x1076   : > { %v4466_v35 = vadd.f32 %v4465_v43, %v8083_v17  ;;  %v8095_v50 = vadd.f32 %v4554_v44, %v8085_v47 }
0x1077   : > { %v5218_v0 = vmul.f32 -1.702, %v8088_v40  ;;  %v5220_v18 = vmul.f32 -1.702, %v8091_v4 }
0x1078   : > { %v5219_v20 = vmul.f32 -1.702, %v4466_v35  ;;  %v5221_v49 = vmul.f32 -1.702, %v8095_v50  ;;  %v4469_v58 = vpop.f32.mrb[46].mxu0  ;;  %v4558_v53 = vpop.f32.mrb[46].mxu1 }
0x1079   : > { %v4607_v31 = vmul.f32 1.442695, %v5218_v0  ;;  %v4611_v19 = vmul.f32 1.442695, %v5220_v18  ;;  %v8101_v10 = vadd.f32 %v4469_v58, %v8079_v5  ;;  %v8104_v55 = vadd.f32 %v4558_v53, %v8081_v37  ;;  %v4471_v59 = vpop.f32.mrb[47].mxu0  ;;  %v4560_v60 = vpop.f32.mrb[47].mxu1 }
0x107a   : > { %v4609_v61 = vmul.f32 1.442695, %v5219_v20  ;;  %v4613_v38 = vmul.f32 1.442695, %v5221_v49  ;;  %v4472_v1 = vadd.f32 %v4471_v59, %v8083_v17  ;;  %v4561_v52 = vadd.f32 %v4560_v60, %v8085_v47 }
0x107b   : > { %6642 = vpow2.f32 %v4607_v31  ;;  %v5222_v9 = vmul.f32 -1.702, %v8101_v10  ;;  %v5224_v8 = vmul.f32 -1.702, %v8104_v55 }
0x107c   : > { %6644 = vpow2.f32 %v4611_v19  ;;  %v5223_v48 = vmul.f32 -1.702, %v4472_v1  ;;  %v5225_v2 = vmul.f32 -1.702, %v4561_v52 }
0x107d   : > { %6646 = vpow2.f32 %v4609_v61  ;;  %v4615_v13 = vmul.f32 1.442695, %v5222_v9  ;;  %v4619_v7 = vmul.f32 1.442695, %v5224_v8 }
0x107e   : > { %6648 = vpow2.f32 %v4613_v38  ;;  %v4617_v12 = vmul.f32 1.442695, %v5223_v48  ;;  %v4621_v14 = vmul.f32 1.442695, %v5225_v2 }
0x107f   : > { %6650 = vpow2.f32 %v4615_v13 }
0x1080   : > { %6652 = vpow2.f32 %v4619_v7 }
0x1081   : > { %6654 = vpow2.f32 %v4617_v12 }
0x1082   : > { %6656 = vpow2.f32 %v4621_v14 }
0x1085   : > { %v6643_v46 = vpop.eup %6642 }
0x1086   : > { %v6645_v11 = vpop.eup %6644  ;;  %v4639_v39 = vadd.f32 1.0, %v6643_v46 }
0x1087   : > { %v6647_v15 = vpop.eup %6646  ;;  %v4641_v56 = vadd.f32 1.0, %v6645_v11 }
0x1088   : > { %v6649_v21 = vpop.eup %6648  ;;  %6658 = vrcp.f32 %v4639_v39  ;;  %v4640_v16 = vadd.f32 1.0, %v6647_v15 }
0x1089   : > { %v6651_v24 = vpop.eup %6650  ;;  %6660 = vrcp.f32 %v4641_v56  ;;  %v4642_v27 = vadd.f32 1.0, %v6649_v21 }
0x108a   : > { %v6653_v54 = vpop.eup %6652  ;;  %6662 = vrcp.f32 %v4640_v16  ;;  %v4643_v30 = vadd.f32 1.0, %v6651_v24 }
0x108b   : > { %v6655_v32 = vpop.eup %6654  ;;  %6664 = vrcp.f32 %v4642_v27  ;;  %v4645_v34 = vadd.f32 1.0, %v6653_v54 }
0x108c   : > { %v6657_v57 = vpop.eup %6656  ;;  %6666 = vrcp.f32 %v4643_v30  ;;  %v4644_v22 = vadd.f32 1.0, %v6655_v32 }
0x108d   : > { %6668 = vrcp.f32 %v4645_v34  ;;  %v4646_v41 = vadd.f32 1.0, %v6657_v57 }
0x108e   : > { %6670 = vrcp.f32 %v4644_v22 }
0x108f   : > { %6672 = vrcp.f32 %v4646_v41 }
0x1092   : > { %v6659_v42 = vpop.eup %6658 }
0x1093   : > { %v6661_v45 = vpop.eup %6660  ;;  %v4687_v51 = vmul.f32 %v6659_v42, %v8088_v40 }
0x1094   : > { %v6663_v29 = vpop.eup %6662  ;;  %v4689_v6 = vmul.f32 %v6661_v45, %v8091_v4 }
0x1095   : > { %v6665_v63 = vpop.eup %6664  ;;  %v4688_v33 = vmul.f32 %v6663_v29, %v4466_v35 }
0x1096   : > { %v6667_v23 = vpop.eup %6666  ;;  %v4690_v62 = vmul.f32 %v6665_v63, %v8095_v50 }
0x1097   : > { %v6669_v25 = vpop.eup %6668  ;;  %4837 = vmatprep.mubr.f32.mxu0 %v4688_v33  ;;  %v4691_v18 = vmul.f32 %v6667_v23, %v8101_v10 }
0x1098   : > { %v6671_v43 = vpop.eup %6670  ;;  %4922 = vmatprep.mubr.f32.mxu1 %v4690_v62  ;;  %4838 = vmatmul.mubr.f32.vlgmr.msra.gmra.mrb[52].mxu0 %v4687_v51  ;;  %v4693_v35 = vmul.f32 %v6669_v25, %v8104_v55 }
0x1099   : > { %v6673_v44 = vpop.eup %6672  ;;  %v4692_v0 = vmul.f32 %v6671_v43, %v4472_v1  ;;  %4923 = vmatmul.mubr.f32.vlgmr.msra.gmra.mrb[52].mxu1 %v4689_v6 }
0x109a   : > { %v4694_v20 = vmul.f32 %v6673_v44, %v4561_v52 }
0x109b   : > { %4842 = vmatprep.mubr.f32.mxu0 %v4692_v0 }
0x109c   : > { %4927 = vmatprep.mubr.f32.mxu1 %v4694_v20  ;;  %4843 = vmatmul.mubr.f32.gmra.mrb[54].mxu0 %v4691_v18 }
0x109d   : > { %4928 = vmatmul.mubr.f32.gmra.mrb[54].mxu1 %v4693_v35 }
0x10ad   : > { %v4475_v40 = vpop.f32.mrb[48].mxu0  ;;  %v4564_v50 = vpop.f32.mrb[48].mxu1 }
0x10ae   : > { %v8116_v4 = vadd.f32 %v4475_v40, %v8079_v5  ;;  %v8119_v49 = vadd.f32 %v4564_v50, %v8081_v37  ;;  %v4477_v58 = vpop.f32.mrb[49].mxu0  ;;  %v4566_v53 = vpop.f32.mrb[49].mxu1 }
0x10af   : > { %v4478_v31 = vadd.f32 %v4477_v58, %v8083_v17  ;;  %v8123_v19 = vadd.f32 %v4566_v53, %v8085_v47 }
0x10b0   : > { %v5226_v10 = vmul.f32 -1.702, %v8116_v4  ;;  %v5228_v55 = vmul.f32 -1.702, %v8119_v49 }
0x10b1   : > { %v5227_v59 = vmul.f32 -1.702, %v4478_v31  ;;  %v5229_v60 = vmul.f32 -1.702, %v8123_v19  ;;  %v4481_v61 = vpop.f32.mrb[50].mxu0  ;;  %v4570_v38 = vpop.f32.mrb[50].mxu1 }
0x10b2   : > { %v4623_v1 = vmul.f32 1.442695, %v5226_v10  ;;  %v4627_v52 = vmul.f32 1.442695, %v5228_v55  ;;  %v8129_v9 = vadd.f32 %v4481_v61, %v8079_v5  ;;  %v8132_v8 = vadd.f32 %v4570_v38, %v8081_v37  ;;  %v4483_v48 = vpop.f32.mrb[51].mxu0  ;;  %v4572_v2 = vpop.f32.mrb[51].mxu1 }
0x10b3   : > { %v4625_v13 = vmul.f32 1.442695, %v5227_v59  ;;  %v4629_v7 = vmul.f32 1.442695, %v5229_v60  ;;  %v4484_v12 = vadd.f32 %v4483_v48, %v8083_v17  ;;  %v4573_v14 = vadd.f32 %v4572_v2, %v8085_v47 }
0x10b4   : > { %6674 = vpow2.f32 %v4623_v1  ;;  %v5230_v46 = vmul.f32 -1.702, %v8129_v9  ;;  %v5232_v11 = vmul.f32 -1.702, %v8132_v8 }
0x10b5   : > { %6676 = vpow2.f32 %v4627_v52  ;;  %v5231_v39 = vmul.f32 -1.702, %v4484_v12  ;;  %v5233_v5 = vmul.f32 -1.702, %v4573_v14 }
0x10b6   : > { %6678 = vpow2.f32 %v4625_v13  ;;  %v4631_v15 = vmul.f32 1.442695, %v5230_v46  ;;  %v4635_v37 = vmul.f32 1.442695, %v5232_v11 }
0x10b7   : > { %6680 = vpow2.f32 %v4629_v7  ;;  %v4633_v56 = vmul.f32 1.442695, %v5231_v39  ;;  %v4637_v21 = vmul.f32 1.442695, %v5233_v5 }
0x10b8   : > { %6682 = vpow2.f32 %v4631_v15 }
0x10b9   : > { %6684 = vpow2.f32 %v4635_v37 }
0x10ba   : > { %6686 = vpow2.f32 %v4633_v56 }
0x10bb   : > { %6688 = vpow2.f32 %v4637_v21 }
0x10be   : > { %v6675_v17 = vpop.eup %6674 }
0x10bf   : > { %v6677_v47 = vpop.eup %6676  ;;  %v4647_v16 = vadd.f32 1.0, %v6675_v17 }
0x10c0   : > { %v6679_v24 = vpop.eup %6678  ;;  %v4649_v27 = vadd.f32 1.0, %v6677_v47 }
0x10c1   : > { %v6681_v54 = vpop.eup %6680  ;;  %6690 = vrcp.f32 %v4647_v16  ;;  %v4648_v30 = vadd.f32 1.0, %v6679_v24 }
0x10c2   : > { %v6683_v32 = vpop.eup %6682  ;;  %6692 = vrcp.f32 %v4649_v27  ;;  %v4650_v34 = vadd.f32 1.0, %v6681_v54 }
0x10c3   : > { %v6685_v57 = vpop.eup %6684  ;;  %6694 = vrcp.f32 %v4648_v30  ;;  %v4651_v22 = vadd.f32 1.0, %v6683_v32 }
0x10c4   : > { %v6687_v41 = vpop.eup %6686  ;;  %6696 = vrcp.f32 %v4650_v34  ;;  %v4653_v42 = vadd.f32 1.0, %v6685_v57 }
0x10c5   : > { %v6689_v45 = vpop.eup %6688  ;;  %6698 = vrcp.f32 %v4651_v22  ;;  %v4652_v29 = vadd.f32 1.0, %v6687_v41 }
0x10c6   : > { %6700 = vrcp.f32 %v4653_v42  ;;  %v4654_v63 = vadd.f32 1.0, %v6689_v45 }
0x10c7   : > { %6702 = vrcp.f32 %v4652_v29 }
0x10c8   : > { %6704 = vrcp.f32 %v4654_v63 }
0x10cb   : > { %v6691_v33 = vpop.eup %6690 }
0x10cc   : > { %v6693_v23 = vpop.eup %6692  ;;  %v4695_v43 = vmul.f32 %v6691_v33, %v8116_v4 }
0x10cd   : > { %v6695_v51 = vpop.eup %6694  ;;  %v4697_v18 = vmul.f32 %v6693_v23, %v8119_v49  ;;  %v5234_v49 = vld [vmem:[%s8296_s13] ss:$0 sm:$0xff] }
0x10ce   : > { %v6697_v62 = vpop.eup %6696  ;;  %v4696_v25 = vmul.f32 %v6695_v51, %v4478_v31 }
0x10cf   : > { %v6699_v6 = vpop.eup %6698  ;;  %v4698_v44 = vmul.f32 %v6697_v62, %v8123_v19 }
0x10d0   : > { %v6701_v0 = vpop.eup %6700  ;;  %4847 = vmatprep.mubr.f32.mxu0 %v4696_v25  ;;  %v4699_v50 = vmul.f32 %v6699_v6, %v8129_v9 }
0x10d1   : > { %v6703_v20 = vpop.eup %6702  ;;  %4932 = vmatprep.mubr.f32.mxu1 %v4698_v44  ;;  %4848 = vmatmul.mubr.f32.gmra.mrb[56].mxu0 %v4695_v43  ;;  %v4701_v53 = vmul.f32 %v6701_v0, %v8132_v8 }
0x10d2   : > { %v6705_v35 = vpop.eup %6704  ;;  %v4700_v40 = vmul.f32 %v6703_v20, %v4484_v12  ;;  %4933 = vmatmul.mubr.f32.gmra.mrb[56].mxu1 %v4697_v18 }
0x10d3   : > { %v4702_v58 = vmul.f32 %v6705_v35, %v4573_v14 }
0x10d4   : > { %4852 = vmatprep.mubr.f32.mxu0 %v4700_v40 }
0x10d5   : > { %4937 = vmatprep.mubr.f32.mxu1 %v4702_v58  ;;  %4853 = vmatmul.mubr.f32.gmra.mrb[58].mxu0 %v4699_v50 }
0x10d6   : > { %4938 = vmatmul.mubr.f32.gmra.mrb[58].mxu1 %v4701_v53 }
0x116b   : > { %v5460_v4 = vpop.f32.mrb[52].mxu0 }
0x116c   : > { %v5504_v31 = vpop.f32.mrb[52].mxu1  ;;  %v5461_v19 = vpop.f32.mrb[53].mxu0 }
0x116d   : > { %v5462_v10 = vadd.f32 %v5461_v19, %v5460_v4  ;;  %v5505_v55 = vpop.f32.mrb[53].mxu1 }
0x116e   : > { %v5506_v59 = vadd.f32 %v5505_v55, %v5504_v31 }
0x116f   : > { %v4840_v60 = vadd.f32 %v5462_v10, %v5234_v49  ;;  %v5463_v61 = vpop.f32.mrb[54].mxu0 }
0x1170   : > { %v5507_v38 = vpop.f32.mrb[54].mxu1  ;;  %v5464_v1 = vpop.f32.mrb[55].mxu0 }
0x1171   : > { %v4925_v52 = vadd.f32 %v5506_v59, %v4840_v60  ;;  %v5465_v9 = vadd.f32 %v5464_v1, %v5463_v61  ;;  %v5508_v8 = vpop.f32.mrb[55].mxu1 }
0x1172   : > { %v5509_v48 = vadd.f32 %v5508_v8, %v5507_v38 }
0x1173   : > { %v4943_v2 = vadd.f32 %v4925_v52, %v8038_v28  ;;  %v4845_v13 = vadd.f32 %v5465_v9, %v5234_v49 }
0x1175   : > { %4947 = vst [vmem:[%s775_s5] sm:$0xff] %v4943_v2  ;;  %v4930_v7 = vadd.f32 %v5509_v48, %v4845_v13 }
0x1177   : > { %v4944_v12 = vadd.f32 %v4930_v7, %v8035_v26 }
0x1179   : > { %4948 = vst [vmem:[%s775_s5 + $0x8] sm:$0xff] %v4944_v12 }
0x11a4   : > { %v5466_v14 = vpop.f32.mrb[56].mxu0 }
0x11a5   : > { %v5510_v46 = vpop.f32.mrb[56].mxu1  ;;  %v5467_v11 = vpop.f32.mrb[57].mxu0 }
0x11a6   : > { %v5468_v39 = vadd.f32 %v5467_v11, %v5466_v14  ;;  %v5511_v5 = vpop.f32.mrb[57].mxu1 }
0x11a7   : > { %v5512_v15 = vadd.f32 %v5511_v5, %v5510_v46 }
0x11a8   : > { %v4850_v37 = vadd.f32 %v5468_v39, %v5234_v49  ;;  %v5469_v56 = vpop.f32.mrb[58].mxu0 }
0x11a9   : > { %v5513_v21 = vpop.f32.mrb[58].mxu1  ;;  %v5470_v28 = vpop.f32.mrb[59].mxu0 }
0x11aa   : > { %v4935_v17 = vadd.f32 %v5512_v15, %v4850_v37  ;;  %v5471_v47 = vadd.f32 %v5470_v28, %v5469_v56  ;;  %v5514_v16 = vpop.f32.mrb[59].mxu1 }
0x11ab   : > { %v5515_v24 = vadd.f32 %v5514_v16, %v5513_v21 }
0x11ac   : > { %v4945_v26 = vadd.f32 %v4935_v17, %v8043_v3  ;;  %v4855_v27 = vadd.f32 %v5471_v47, %v5234_v49 }
0x11ae   : > { %4949 = vst [vmem:[%s775_s5 + $0x10] sm:$0xff] %v4945_v26  ;;  %v4940_v54 = vadd.f32 %v5515_v24, %v4855_v27 }
0x11b0   : > { %v4946_v30 = vadd.f32 %v4940_v54, %v8047_v36 }
0x11b2   : > { %4950 = vst [vmem:[%s775_s5 + $0x18] sm:$0xff] %v4946_v30 }
0x11b3   : > { %6951 = shalt.err (!%p6948_p3)
}
0x11b4   : > { %s6952_s12 = scalar_lea.hbm %s8157_s17, 512  ;;  %s6956_s30 = scalar_lea.hbm %s8297_s8, 1024 }
0x11b5   : > { %p6953_p12 = scmp.ne.s32.totalorder %s8157_s17, %s6952_s12  ;;  %p6957_p0 = scmp.lt.u32.totalorder %s8157_s17, %s8297_s8 }
0x11b6   : > { %p6958_p6 = scmp.lt.u32.totalorder %s6956_s30, %s6952_s12  ;;  %p6960_p4 = scmp.lt.u32.totalorder %s6952_s12, %s8157_s17 }
0x11b7   : > { %p6954_p1 = pnand %p6953_p12, %p8298_p10 }
0x11b8   : > { %p6959_p2 = por %p6958_p6, %p6957_p0 }
0x11b9   : > { %p6955_p13 = pneg %p6954_p1 }
0x11ba   : > { %p6961_p5 = por %p6960_p4, %p6959_p2 }
0x11bc   : > { %p6962_p7 = pnand %p6961_p5, %p6955_p13 }
0x11be   : > { %6965 = shalt.err (!%p6962_p7)
}
0x11bf   : > { %s7045_s13 = smov 128   ;;  %s7046_s5 = smov 8  }
0x11c0   : > { %6300 = dma.vmem_to_hbm [thread:$0]  (%p8298_p10), %s8152_s10, 512, %s8157_s17, %s4952_s16, %s7045_s13, %s7045_s13, %s7046_s5  }
0x11c1 PF: > { %s4980_s21 = sand.u32 1, %s7012_s1   ;;  %p8299_p9 = scmp.ne.s32.totalorder %s8271_s11, 0 }
0x11c2   : > { %p8300_p8 = scmp.ge.s32.totalorder %s7024_s24, 2  ;;  %s4981_s20 = scalar_lea.sflag [#allocation4], %s4980_s21 }
0x11c4   : > { %p6329_p11 = pnand %p8300_p8, %p8299_p9 }
0x11c6   : > { %7007 = dma.done.wait (!%p6329_p11), %s4981_s20, 512  }
0x11c7   : > { %7009 = vsyncadd (!%p6329_p11), %s4981_s20, 4294966784  ;;  %s8301_s0 = sld [smem:[#allocation24_spill]]  ;;  %p39_p3 = scmp.ge.s32.totalorder %s7343_s27, 4  }
0x11c8   : > { %s8302_s1 = smov %s7016_s22  ;;  %s8303_s22 = smov %s7020_s23 }
0x11c9   : > { %s8305_s24 = smov %s7343_s27  ;;  %41 = sbr.rel (!%p39_p3) target bundleno = 29 (0x1d), region = 182 }
0x11cd   : > { %s8304_s23 = smov %s8301_s0 }
0x11d0   :  { %4986 = vsyncpa [#allocation3], 1 }
0x11d1   :  { %4988 = vsyncpa [#allocation3 + $0x1], 1 }
0x11d2   :  { %4989 = vsyncpa [#allocation6], 1 }
0x11d3   :  { %4991 = vsyncpa [#allocation6 + $0x1], 1 }
0x11d4   :  { %4992 = vsyncpa [#allocation9], 1 }
0x11d5   :  { %4993 = vsyncpa [#allocation12], 1 }
0x11d6   :  { %4994 = vsyncpa [#allocation15], 1 }
0x11d7   :  { %4995 = vsyncpa [#allocation4], 1 }
0x11d8   :  { %4997 = vsyncpa [#allocation4 + $0x1], 1 }

</bundles_post_ra>
